<compile_context>
chip_gen: v6e
topology: v6e:2x2x1
jax: 0.10.0
libtpu: 0.0.40
codegen_flags: <defaults>
</compile_context>

<pallas_src>
import jax
import jax.numpy as jnp
from jax.experimental import pallas as pl
from jax.experimental.pallas import tpu as pltpu

# Model dimensions (fixed by the PyTorch module).
D = 768                      # embed_dim
NUM_HEADS = 8
HEAD_DIM = D // NUM_HEADS    # 96
NUM_CLASSES = 2
NCLS_PAD = 128               # lane-dense padded classifier width

# Small example shapes.
B = 2                        # batch
S = 8                        # sequence length
VOCAB = 64                   # stub vocab for the embedding lookup
BS = B * S
NUM_STEPS = 4                # step 0: routing, steps 1..3: q / k / v projections


# ----------------------------------------------------------------------------
# Fused kernel, grid=(4,):
#   step 0      : routed = relu(x @ Wr + br)            -> VMEM scratch (bf16)
#   steps 1..3  : q/k/v   = routed @ W{q,k,v} + b        -> VMEM scratch (f32)
#   step 3 also : 8-head attention for the CLS query row -> folded
#                 (out_proj @ classifier) epilogue       -> (B, 128) output
# The (4, D, D) stacked weight is the only per-step block, so Pallas
# double-buffers its 1.1 MiB tiles and their DMAs overlap compute.
# ----------------------------------------------------------------------------
def fused_forward_kernel(x_ref, w_ref, b_ref, wcls_ref, bcls_ref, out_ref,
                         routed_sc, qkv_sc):
    step = pl.program_id(0)

    # Step 0: routing Linear + ReLU (bf16 MXU inputs, f32 accumulate).
    @pl.when(step == 0)
    def _():
        r = jnp.dot(x_ref[...].astype(jnp.bfloat16), w_ref[0],
                    preferred_element_type=jnp.float32) + b_ref[0]
        routed_sc[...] = jnp.maximum(r, 0.0).astype(jnp.bfloat16)

    # Steps 1..3: q / k / v projections into the (3*BS, D) scratch.
    @pl.when(step > 0)
    def _():
        part = jnp.dot(routed_sc[...], w_ref[0],
                       preferred_element_type=jnp.float32) + b_ref[0]  # (BS, D)
        row0 = pl.multiple_of((step - 1) * BS, BS)
        qkv_sc[pl.ds(row0, BS), :] = part

    # Last step: CLS-row attention + fused (out_proj . classifier) epilogue.
    @pl.when(step == pl.num_programs(0) - 1)
    def _():
        scale = 1.0 / (HEAD_DIM ** 0.5)

        # 0/1 head-selection matrices built in-register (no HBM traffic);
        # bf16 so both head matmuls use the native bf16 MXU path.
        lane_dh = jax.lax.broadcasted_iota(jnp.int32, (D, NUM_HEADS), 0)
        head_dh = jax.lax.broadcasted_iota(jnp.int32, (D, NUM_HEADS), 1)
        mask_dh = ((lane_dh >= head_dh * HEAD_DIM)
                   & (lane_dh < (head_dh + 1) * HEAD_DIM)
                   ).astype(jnp.bfloat16)                       # (D, H)
        head_hd = jax.lax.broadcasted_iota(jnp.int32, (NUM_HEADS, D), 0)
        lane_hd = jax.lax.broadcasted_iota(jnp.int32, (NUM_HEADS, D), 1)
        mask_hd = ((lane_hd >= head_hd * HEAD_DIM)
                   & (lane_hd < (head_hd + 1) * HEAD_DIM)
                   ).astype(jnp.bfloat16)                       # (H, D)

        # Only attended[:, 0, :] is consumed downstream, so compute attention
        # for the CLS query row of each batch only.  Per-head structure is
        # expressed with 0/1 head-selection matmuls (lane-aligned shapes).
        ctx_rows = []
        for bi in range(B):                                     # static, B == 2
            lo = bi * S
            q_cls = qkv_sc[lo:lo + 1, :] * scale                # (1, D)
            k_b = qkv_sc[BS + lo:BS + lo + S, :]                # (S, D)
            v_b = qkv_sc[2 * BS + lo:2 * BS + lo + S, :]        # (S, D)

            e = (k_b * q_cls).astype(jnp.bfloat16)              # (S, D)
            # scores[j, h] = sum_{i in head h} q_cls[i] * k_b[j, i]
            scores = jnp.dot(e, mask_dh,
                             preferred_element_type=jnp.float32)   # (S, H)

            # softmax over key positions (axis 0), per head column; exact
            # EUP reciprocal for the normalisation.
            m = jnp.max(scores, axis=0, keepdims=True)
            p = jnp.exp(scores - m)
            denom = jnp.sum(p, axis=0, keepdims=True)
            p = p * pl.reciprocal(denom, approx=False)          # (S, H)

            # Broadcast per-head weights back to that head's lanes, then
            # reduce over key positions.
            p_full = jnp.dot(p.astype(jnp.bfloat16), mask_hd,
                             preferred_element_type=jnp.float32)   # (S, D)
            ctx_rows.append(jnp.sum(p_full * v_b, axis=0, keepdims=True))

        attended_cls = jnp.concatenate(ctx_rows, axis=0)        # (B, D)

        # Folded (out_proj @ classifier) epilogue, lane-dense N = 128.
        logits = jnp.dot(attended_cls.astype(jnp.bfloat16), wcls_ref[...],
                         preferred_element_type=jnp.float32) + bcls_ref[...]
        out_ref[...] = logits.astype(out_ref.dtype)


def run_fused_forward(hidden, params):
    x2d = hidden.reshape(BS, D)

    flops = (2 * BS * D * D * NUM_STEPS          # routing + q/k/v projections
             + 4 * B * S * D * NUM_HEADS          # head-selection matmuls
             + 2 * B * D * NCLS_PAD)              # folded classifier
    bytes_accessed = (x2d.size * 4
                      + params["w_stack"].size * 2
                      + params["b_stack"].size * 4
                      + params["wcls"].size * 2
                      + params["bcls"].size * 4
                      + B * NCLS_PAD * 4)

    padded = pl.pallas_call(
        fused_forward_kernel,
        out_shape=jax.ShapeDtypeStruct((B, NCLS_PAD), jnp.float32),
        grid_spec=pltpu.PrefetchScalarGridSpec(
            num_scalar_prefetch=0,
            grid=(NUM_STEPS,),
            in_specs=[
                pl.BlockSpec((BS, D), lambda k: (0, 0)),         # x, resident
                pl.BlockSpec((1, D, D), lambda k: (k, 0, 0)),    # weight tiles
                pl.BlockSpec((1, 1, D), lambda k: (k, 0, 0)),    # bias tiles
                pl.BlockSpec((D, NCLS_PAD), lambda k: (0, 0)),   # folded Wo@Wc
                pl.BlockSpec((1, NCLS_PAD), lambda k: (0, 0)),   # folded bias
            ],
            out_specs=pl.BlockSpec((B, NCLS_PAD), lambda k: (0, 0)),
            scratch_shapes=[
                pltpu.VMEM((BS, D), jnp.bfloat16),               # routed
                pltpu.VMEM((3 * BS, D), jnp.float32),            # q / k / v
            ]),
        compiler_params=pltpu.CompilerParams(
            dimension_semantics=("arbitrary",),
            vmem_limit_bytes=32 << 20),
        cost_estimate=pl.CostEstimate(
            flops=flops,
            transcendentals=B * S * NUM_HEADS + 2 * NUM_HEADS,
            bytes_accessed=bytes_accessed),
    )(x2d, params["w_stack"], params["b_stack"],
      params["wcls"], params["bcls"])
    return padded[:, :NUM_CLASSES]


# ----------------------------------------------------------------------------
# Full forward (glue in plain JAX).
# ----------------------------------------------------------------------------
@jax.jit
def sentimixture_forward(input_ids, attention_mask, params):
    # TODO(synk): XLMRobertaModel.from_pretrained('xlm-roberta-base') — the
    # only consumer of attention_mask — has no checkpoint-free Pallas
    # equivalent; a deterministic embedding lookup stands in for
    # last_hidden_state.  The nn.MultiheadAttention call itself is unmasked in
    # the PyTorch module, so no key_padding_mask is applied here either.
    del attention_mask
    hidden = params["emb"][input_ids]                 # (B, S, D) f32
    return run_fused_forward(hidden, params)


def init_params(key):
    ks = jax.random.split(key, 10)

    def nrm(k, shape, scale=0.02):
        return scale * jax.random.normal(k, shape, dtype=jnp.float32)

    emb = nrm(ks[0], (VOCAB, D), 1.0)
    # All linear weights stored pre-transposed: (D_in, D_out).
    wr = nrm(ks[1], (D, D))
    br = nrm(ks[2], (1, D))
    wqkv = nrm(ks[3], (D, 3 * D))
    bqkv = nrm(ks[4], (1, 3 * D))
    wo = nrm(ks[5], (D, D))
    bo = nrm(ks[6], (1, D))
    wc = nrm(ks[7], (D, NUM_CLASSES))
    bc = nrm(ks[8], (1, NUM_CLASSES))

    # Stack routing + q/k/v projection weights -> one streamed (4, D, D) bf16
    # operand (one 1.1 MiB DMA per grid step, double-buffered by Pallas).
    w_stack = jnp.stack(
        [wr, wqkv[:, :D], wqkv[:, D:2 * D], wqkv[:, 2 * D:]], axis=0
    ).astype(jnp.bfloat16)                                        # (4, D, D)
    b_stack = jnp.stack(
        [br, bqkv[:, :D], bqkv[:, D:2 * D], bqkv[:, 2 * D:]], axis=0
    )                                                             # (4, 1, D) f32

    # Fold out_proj into the classifier (no nonlinearity between them, dropout
    # is identity at inference):  logits = ctx @ (Wo @ Wc) + (bo @ Wc + bc).
    wcls = wo @ wc                                                # (D, 2)
    bcls = bo @ wc + bc                                           # (1, 2)
    wcls_pad = jnp.zeros((D, NCLS_PAD), jnp.float32
                         ).at[:, :NUM_CLASSES].set(wcls).astype(jnp.bfloat16)
    bcls_pad = jnp.zeros((1, NCLS_PAD), jnp.float32
                         ).at[:, :NUM_CLASSES].set(bcls)

    params = {"emb": emb, "w_stack": w_stack, "b_stack": b_stack,
              "wcls": wcls_pad, "bcls": bcls_pad}
    # Keep the unfolded f32 weights for the pure-JAX reference check.
    ref = {"wr": wr, "br": br, "wqkv": wqkv, "bqkv": bqkv,
           "wo": wo, "bo": bo, "wc": wc, "bc": bc}
    return params, ref


def reference_forward(input_ids, params, ref):
    """Pure-JAX f32 reference of the same forward (same embedding stub)."""
    hidden = params["emb"][input_ids]                             # (B, S, D)
    x = hidden.reshape(B * S, D)
    routed = jnp.maximum(x @ ref["wr"] + ref["br"], 0.0)
    qkv = routed @ ref["wqkv"] + ref["bqkv"]
    q = qkv[:, :D].reshape(B, S, NUM_HEADS, HEAD_DIM)
    k = qkv[:, D:2 * D].reshape(B, S, NUM_HEADS, HEAD_DIM)
    v = qkv[:, 2 * D:].reshape(B, S, NUM_HEADS, HEAD_DIM)
    scale = 1.0 / (HEAD_DIM ** 0.5)
    scores = jnp.einsum("bhd,bkhd->bhk", q[:, 0] * scale, k)      # (B, H, S)
    p = jax.nn.softmax(scores, axis=-1)
    ctx = jnp.einsum("bhk,bkhd->bhd", p, v).reshape(B, D)
    y = ctx @ ref["wo"] + ref["bo"]
    return y @ ref["wc"] + ref["bc"]


if __name__ == "__main__":
    key = jax.random.PRNGKey(0)
    k_ids, k_params = jax.random.split(key)

    input_ids = jax.random.randint(k_ids, (B, S), 0, VOCAB, dtype=jnp.int32)
    attention_mask = jnp.ones((B, S), dtype=jnp.int32)
    params, ref_w = init_params(k_params)

    logits = sentimixture_forward(input_ids, attention_mask, params)
    logits = jax.block_until_ready(logits)

    assert logits.shape == (B, NUM_CLASSES), logits.shape
    assert logits.dtype == jnp.float32
    assert bool(jnp.all(jnp.isfinite(logits)))

    # Tolerance check vs. an f32 pure-JAX reference (kernel uses bf16 weights
    # / MXU inputs, so a loose bound is expected and sufficient to catch
    # structural bugs).
    expected = reference_forward(input_ids, params, ref_w)
    max_err = float(jnp.max(jnp.abs(logits - expected)))
    tol = 2e-2 + 0.05 * float(jnp.max(jnp.abs(expected)))
    assert max_err < tol, f"max abs error {max_err} vs f32 reference (tol {tol})"

    print("KERNEL_OK")
</pallas_src>

<mosaic_0001>
module attributes {stable_mosaic.version = 11 : i64} {
  func.func @fused_forward_kernel(%arg0: i32, %arg1: memref<16x768xf32, #tpu.memory_space<vmem>>, %arg2: memref<1x768x768xbf16, #tpu.memory_space<vmem>>, %arg3: memref<1x1x768xf32, #tpu.memory_space<vmem>>, %arg4: memref<768x128xbf16, #tpu.memory_space<vmem>>, %arg5: memref<1x128xf32, #tpu.memory_space<vmem>>, %arg6: memref<2x128xf32, #tpu.memory_space<vmem>>, %arg7: memref<16x768xbf16, #tpu.memory_space<vmem>>, %arg8: memref<48x768xf32, #tpu.memory_space<vmem>>) attributes {dimension_semantics = [#tpu.dimension_semantics<arbitrary>], iteration_bounds = array<i64: 4>, scalar_prefetch = 0 : i64, scratch_operands = 2 : i64, tpu.core_type = #tpu.core_type<tc>, window_params = [{pipeline_mode = #tpu.pipeline_mode<synchronous>, transform_indices = @transform_0, window_bounds = array<i64: 16, 768>}, {transform_indices = @transform_1, window_bounds = array<i64: 1, 768, 768>}, {transform_indices = @transform_2, window_bounds = array<i64: 1, 1, 768>}, {pipeline_mode = #tpu.pipeline_mode<synchronous>, transform_indices = @transform_3, window_bounds = array<i64: 768, 128>}, {pipeline_mode = #tpu.pipeline_mode<synchronous>, transform_indices = @transform_4, window_bounds = array<i64: 1, 128>}, {pipeline_mode = #tpu.pipeline_mode<synchronous>, transform_indices = @transform_5, window_bounds = array<i64: 2, 128>}]} {
    %c0_i32 = arith.constant 0 : i32
    %0 = arith.cmpi eq, %arg0, %c0_i32 : i32
    %1 = arith.extui %0 : i1 to i32
    %c0_i32_0 = arith.constant 0 : i32
    %2 = arith.cmpi ne, %1, %c0_i32_0 : i32
    scf.if %2 {
      %c0 = arith.constant 0 : index
      %c0_4 = arith.constant 0 : index
      %9 = vector.load %arg1[%c0, %c0_4] : memref<16x768xf32, #tpu.memory_space<vmem>>, vector<16x768xf32>
      %10 = arith.truncf %9 : vector<16x768xf32> to vector<16x768xbf16>
      %c0_5 = arith.constant 0 : index
      %c0_6 = arith.constant 0 : index
      %c0_7 = arith.constant 0 : index
      %11 = vector.load %arg2[%c0_5, %c0_6, %c0_7] : memref<1x768x768xbf16, #tpu.memory_space<vmem>>, vector<1x768x768xbf16>
      %12 = vector.shape_cast %11 : vector<1x768x768xbf16> to vector<768x768xbf16>
      %cst = arith.constant dense<0.000000e+00> : vector<16x768xf32>
      %13 = tpu.matmul %10, %12, %cst {dimension_numbers = #tpu.dot_dimension_numbers<[1], [0], [0], [1], [0, 0, 1, 1], [], []>} : vector<16x768xbf16>, vector<768x768xbf16>, vector<16x768xf32> -> vector<16x768xf32>
      %c0_8 = arith.constant 0 : index
      %c0_9 = arith.constant 0 : index
      %c0_10 = arith.constant 0 : index
      %14 = vector.load %arg3[%c0_8, %c0_9, %c0_10] : memref<1x1x768xf32, #tpu.memory_space<vmem>>, vector<1x1x768xf32>
      %15 = vector.shape_cast %14 : vector<1x1x768xf32> to vector<1x768xf32>
      %16 = vector.broadcast %15 : vector<1x768xf32> to vector<16x768xf32>
      %17 = arith.addf %13, %16 : vector<16x768xf32>
      %cst_11 = arith.constant 0.000000e+00 : f32
      %18 = vector.broadcast %cst_11 : f32 to vector<16x768xf32>
      %19 = arith.maximumf %17, %18 : vector<16x768xf32>
      %20 = arith.truncf %19 : vector<16x768xf32> to vector<16x768xbf16>
      %c0_12 = arith.constant 0 : index
      %c0_13 = arith.constant 0 : index
      %21 = vector.load %arg7[%c0_12, %c0_13] : memref<16x768xbf16, #tpu.memory_space<vmem>>, vector<16x768xbf16>
      tpu.vector_store %arg7[%c0_12, %c0_13], %20 {strides = array<i32>} : memref<16x768xbf16, #tpu.memory_space<vmem>>, vector<16x768xbf16>,
    } else {
    }
    %c0_i32_1 = arith.constant 0 : i32
    %3 = arith.cmpi sgt, %arg0, %c0_i32_1 : i32
    %4 = arith.extui %3 : i1 to i32
    %c0_i32_2 = arith.constant 0 : i32
    %5 = arith.cmpi ne, %4, %c0_i32_2 : i32
    scf.if %5 {
      %c0 = arith.constant 0 : index
      %c0_4 = arith.constant 0 : index
      %9 = vector.load %arg7[%c0, %c0_4] : memref<16x768xbf16, #tpu.memory_space<vmem>>, vector<16x768xbf16>
      %c0_5 = arith.constant 0 : index
      %c0_6 = arith.constant 0 : index
      %c0_7 = arith.constant 0 : index
      %10 = vector.load %arg2[%c0_5, %c0_6, %c0_7] : memref<1x768x768xbf16, #tpu.memory_space<vmem>>, vector<1x768x768xbf16>
      %11 = vector.shape_cast %10 : vector<1x768x768xbf16> to vector<768x768xbf16>
      %cst = arith.constant dense<0.000000e+00> : vector<16x768xf32>
      %12 = tpu.matmul %9, %11, %cst {dimension_numbers = #tpu.dot_dimension_numbers<[1], [0], [0], [1], [0, 0, 1, 1], [], []>} : vector<16x768xbf16>, vector<768x768xbf16>, vector<16x768xf32> -> vector<16x768xf32>
      %c0_8 = arith.constant 0 : index
      %c0_9 = arith.constant 0 : index
      %c0_10 = arith.constant 0 : index
      %13 = vector.load %arg3[%c0_8, %c0_9, %c0_10] : memref<1x1x768xf32, #tpu.memory_space<vmem>>, vector<1x1x768xf32>
      %14 = vector.shape_cast %13 : vector<1x1x768xf32> to vector<1x768xf32>
      %15 = vector.broadcast %14 : vector<1x768xf32> to vector<16x768xf32>
      %16 = arith.addf %12, %15 : vector<16x768xf32>
      %c1_i32 = arith.constant 1 : i32
      %17 = arith.subi %arg0, %c1_i32 : i32
      %c16_i32 = arith.constant 16 : i32
      %18 = arith.muli %17, %c16_i32 : i32
      %19 = tpu.assume_multiple %18, 16 : i32
      %20 = arith.index_cast %19 : i32 to index
      %c0_11 = arith.constant 0 : index
      %21 = vector.load %arg8[%20, %c0_11] : memref<48x768xf32, #tpu.memory_space<vmem>>, vector<16x768xf32>
      tpu.vector_store %arg8[%20, %c0_11], %16 {strides = array<i32>} : memref<48x768xf32, #tpu.memory_space<vmem>>, vector<16x768xf32>,
    } else {
    }
    %c3_i32 = arith.constant 3 : i32
    %6 = arith.cmpi eq, %arg0, %c3_i32 : i32
    %7 = arith.extui %6 : i1 to i32
    %c0_i32_3 = arith.constant 0 : i32
    %8 = arith.cmpi ne, %7, %c0_i32_3 : i32
    scf.if %8 {
      %9 = tpu.iota {dimensions = array<i32: 0>} : vector<768x8xi32>
      %10 = tpu.iota {dimensions = array<i32: 1>} : vector<768x8xi32>
      %c96_i32 = arith.constant 96 : i32
      %11 = vector.broadcast %c96_i32 : i32 to vector<768x8xi32>
      %12 = arith.muli %10, %11 : vector<768x8xi32>
      %13 = arith.cmpi sge, %9, %12 : vector<768x8xi32>
      %c1_i32 = arith.constant 1 : i32
      %14 = vector.broadcast %c1_i32 : i32 to vector<768x8xi32>
      %15 = arith.addi %10, %14 : vector<768x8xi32>
      %c96_i32_4 = arith.constant 96 : i32
      %16 = vector.broadcast %c96_i32_4 : i32 to vector<768x8xi32>
      %17 = arith.muli %15, %16 : vector<768x8xi32>
      %18 = arith.cmpi slt, %9, %17 : vector<768x8xi32>
      %19 = arith.andi %13, %18 : vector<768x8xi1>
      %20 = arith.extui %19 : vector<768x8xi1> to vector<768x8xi32>
      %21 = arith.sitofp %20 : vector<768x8xi32> to vector<768x8xf32>
      %22 = arith.truncf %21 : vector<768x8xf32> to vector<768x8xbf16>
      %23 = tpu.iota {dimensions = array<i32: 0>} : vector<8x768xi32>
      %24 = tpu.iota {dimensions = array<i32: 1>} : vector<8x768xi32>
      %c96_i32_5 = arith.constant 96 : i32
      %25 = vector.broadcast %c96_i32_5 : i32 to vector<8x768xi32>
      %26 = arith.muli %23, %25 : vector<8x768xi32>
      %27 = arith.cmpi sge, %24, %26 : vector<8x768xi32>
      %c1_i32_6 = arith.constant 1 : i32
      %28 = vector.broadcast %c1_i32_6 : i32 to vector<8x768xi32>
      %29 = arith.addi %23, %28 : vector<8x768xi32>
      %c96_i32_7 = arith.constant 96 : i32
      %30 = vector.broadcast %c96_i32_7 : i32 to vector<8x768xi32>
      %31 = arith.muli %29, %30 : vector<8x768xi32>
      %32 = arith.cmpi slt, %24, %31 : vector<8x768xi32>
      %33 = arith.andi %27, %32 : vector<8x768xi1>
      %34 = arith.extui %33 : vector<8x768xi1> to vector<8x768xi32>
      %35 = arith.sitofp %34 : vector<8x768xi32> to vector<8x768xf32>
      %36 = arith.truncf %35 : vector<8x768xf32> to vector<8x768xbf16>
      %c0 = arith.constant 0 : index
      %c0_8 = arith.constant 0 : index
      %37 = vector.load %arg8[%c0, %c0_8] : memref<48x768xf32, #tpu.memory_space<vmem>>, vector<1x768xf32>
      %cst = arith.constant 0.102062076 : f32
      %38 = vector.broadcast %cst : f32 to vector<1x768xf32>
      %39 = arith.mulf %37, %38 : vector<1x768xf32>
      %c16 = arith.constant 16 : index
      %c0_9 = arith.constant 0 : index
      %40 = vector.load %arg8[%c16, %c0_9] : memref<48x768xf32, #tpu.memory_space<vmem>>, vector<8x768xf32>
      %c32 = arith.constant 32 : index
      %c0_10 = arith.constant 0 : index
      %41 = vector.load %arg8[%c32, %c0_10] : memref<48x768xf32, #tpu.memory_space<vmem>>, vector<8x768xf32>
      %42 = vector.broadcast %39 : vector<1x768xf32> to vector<8x768xf32>
      %43 = arith.mulf %40, %42 : vector<8x768xf32>
      %44 = arith.truncf %43 : vector<8x768xf32> to vector<8x768xbf16>
      %cst_11 = arith.constant dense<0.000000e+00> : vector<8x8xf32>
      %45 = tpu.matmul %44, %22, %cst_11 {dimension_numbers = #tpu.dot_dimension_numbers<[1], [0], [0], [1], [0, 0, 1, 1], [], []>} : vector<8x768xbf16>, vector<768x8xbf16>, vector<8x8xf32> -> vector<8x8xf32>
      %cst_12 = arith.constant dense<0xFF800000> : vector<8xf32>
      %46 = vector.multi_reduction <maximumf>, %45, %cst_12 [0] : vector<8x8xf32> to vector<8xf32>
      %47 = vector.shape_cast %46 : vector<8xf32> to vector<1x8xf32>
      %48 = vector.broadcast %47 : vector<1x8xf32> to vector<8x8xf32>
      %49 = arith.subf %45, %48 : vector<8x8xf32>
      %50 = math.exp %49 : vector<8x8xf32>
      %cst_13 = arith.constant dense<0.000000e+00> : vector<8xf32>
      %51 = vector.multi_reduction <add>, %50, %cst_13 [0] : vector<8x8xf32> to vector<8xf32>
      %52 = vector.shape_cast %51 : vector<8xf32> to vector<1x8xf32>
      %53 = tpu.reciprocal %52 : vector<1x8xf32> -> vector<1x8xf32>
      %54 = vector.broadcast %53 : vector<1x8xf32> to vector<8x8xf32>
      %55 = arith.mulf %50, %54 : vector<8x8xf32>
      %56 = arith.truncf %55 : vector<8x8xf32> to vector<8x8xbf16>
      %cst_14 = arith.constant dense<0.000000e+00> : vector<8x768xf32>
      %57 = tpu.matmul %56, %36, %cst_14 {dimension_numbers = #tpu.dot_dimension_numbers<[1], [0], [0], [1], [0, 0, 1, 1], [], []>} : vector<8x8xbf16>, vector<8x768xbf16>, vector<8x768xf32> -> vector<8x768xf32>
      %58 = arith.mulf %57, %41 : vector<8x768xf32>
      %cst_15 = arith.constant dense<0.000000e+00> : vector<768xf32>
      %59 = vector.multi_reduction <add>, %58, %cst_15 [0] : vector<8x768xf32> to vector<768xf32>
      %60 = vector.shape_cast %59 : vector<768xf32> to vector<1x768xf32>
      %c8 = arith.constant 8 : index
      %c0_16 = arith.constant 0 : index
      %61 = vector.load %arg8[%c8, %c0_16] : memref<48x768xf32, #tpu.memory_space<vmem>>, vector<1x768xf32>
      %cst_17 = arith.constant 0.102062076 : f32
      %62 = vector.broadcast %cst_17 : f32 to vector<1x768xf32>
      %63 = arith.mulf %61, %62 : vector<1x768xf32>
      %c24 = arith.constant 24 : index
      %c0_18 = arith.constant 0 : index
      %64 = vector.load %arg8[%c24, %c0_18] : memref<48x768xf32, #tpu.memory_space<vmem>>, vector<8x768xf32>
      %c40 = arith.constant 40 : index
      %c0_19 = arith.constant 0 : index
      %65 = vector.load %arg8[%c40, %c0_19] : memref<48x768xf32, #tpu.memory_space<vmem>>, vector<8x768xf32>
      %66 = vector.broadcast %63 : vector<1x768xf32> to vector<8x768xf32>
      %67 = arith.mulf %64, %66 : vector<8x768xf32>
      %68 = arith.truncf %67 : vector<8x768xf32> to vector<8x768xbf16>
      %cst_20 = arith.constant dense<0.000000e+00> : vector<8x8xf32>
      %69 = tpu.matmul %68, %22, %cst_20 {dimension_numbers = #tpu.dot_dimension_numbers<[1], [0], [0], [1], [0, 0, 1, 1], [], []>} : vector<8x768xbf16>, vector<768x8xbf16>, vector<8x8xf32> -> vector<8x8xf32>
      %cst_21 = arith.constant dense<0xFF800000> : vector<8xf32>
      %70 = vector.multi_reduction <maximumf>, %69, %cst_21 [0] : vector<8x8xf32> to vector<8xf32>
      %71 = vector.shape_cast %70 : vector<8xf32> to vector<1x8xf32>
      %72 = vector.broadcast %71 : vector<1x8xf32> to vector<8x8xf32>
      %73 = arith.subf %69, %72 : vector<8x8xf32>
      %74 = math.exp %73 : vector<8x8xf32>
      %cst_22 = arith.constant dense<0.000000e+00> : vector<8xf32>
      %75 = vector.multi_reduction <add>, %74, %cst_22 [0] : vector<8x8xf32> to vector<8xf32>
      %76 = vector.shape_cast %75 : vector<8xf32> to vector<1x8xf32>
      %77 = tpu.reciprocal %76 : vector<1x8xf32> -> vector<1x8xf32>
      %78 = vector.broadcast %77 : vector<1x8xf32> to vector<8x8xf32>
      %79 = arith.mulf %74, %78 : vector<8x8xf32>
      %80 = arith.truncf %79 : vector<8x8xf32> to vector<8x8xbf16>
      %cst_23 = arith.constant dense<0.000000e+00> : vector<8x768xf32>
      %81 = tpu.matmul %80, %36, %cst_23 {dimension_numbers = #tpu.dot_dimension_numbers<[1], [0], [0], [1], [0, 0, 1, 1], [], []>} : vector<8x8xbf16>, vector<8x768xbf16>, vector<8x768xf32> -> vector<8x768xf32>
      %82 = arith.mulf %81, %65 : vector<8x768xf32>
      %cst_24 = arith.constant dense<0.000000e+00> : vector<768xf32>
      %83 = vector.multi_reduction <add>, %82, %cst_24 [0] : vector<8x768xf32> to vector<768xf32>
      %84 = vector.shape_cast %83 : vector<768xf32> to vector<1x768xf32>
      %85 = tpu.concatenate %60, %84 in 0 : vector<1x768xf32>, vector<1x768xf32> -> vector<2x768xf32>
      %86 = arith.truncf %85 : vector<2x768xf32> to vector<2x768xbf16>
      %c0_25 = arith.constant 0 : index
      %c0_26 = arith.constant 0 : index
      %87 = vector.load %arg4[%c0_25, %c0_26] : memref<768x128xbf16, #tpu.memory_space<vmem>>, vector<768x128xbf16>
      %cst_27 = arith.constant dense<0.000000e+00> : vector<2x128xf32>
      %88 = tpu.matmul %86, %87, %cst_27 {dimension_numbers = #tpu.dot_dimension_numbers<[1], [0], [0], [1], [0, 0, 1, 1], [], []>} : vector<2x768xbf16>, vector<768x128xbf16>, vector<2x128xf32> -> vector<2x128xf32>
      %c0_28 = arith.constant 0 : index
      %c0_29 = arith.constant 0 : index
      %89 = vector.load %arg5[%c0_28, %c0_29] : memref<1x128xf32, #tpu.memory_space<vmem>>, vector<1x128xf32>
      %90 = vector.broadcast %89 : vector<1x128xf32> to vector<2x128xf32>
      %91 = arith.addf %88, %90 : vector<2x128xf32>
      %c0_30 = arith.constant 0 : index
      %c0_31 = arith.constant 0 : index
      %92 = vector.load %arg6[%c0_30, %c0_31] : memref<2x128xf32, #tpu.memory_space<vmem>>, vector<2x128xf32>
      tpu.vector_store %arg6[%c0_30, %c0_31], %91 {strides = array<i32>} : memref<2x128xf32, #tpu.memory_space<vmem>>, vector<2x128xf32>,
    } else {
    }
    return
  }
  func.func @transform_0(%arg0: i32) -> (i32, i32) {
    %c0_i32 = arith.constant 0 : i32
    %c0_i32_0 = arith.constant 0 : i32
    %c0_i32_1 = arith.constant 0 : i32
    return %c0_i32, %c0_i32_0 : i32, i32
  }
  func.func @transform_1(%arg0: i32) -> (i32, i32, i32) {
    %c0_i32 = arith.constant 0 : i32
    %c0_i32_0 = arith.constant 0 : i32
    %c0_i32_1 = arith.constant 0 : i32
    return %arg0, %c0_i32, %c0_i32_0 : i32, i32, i32
  }
  func.func @transform_2(%arg0: i32) -> (i32, i32, i32) {
    %c0_i32 = arith.constant 0 : i32
    %c0_i32_0 = arith.constant 0 : i32
    %c0_i32_1 = arith.constant 0 : i32
    return %arg0, %c0_i32, %c0_i32_0 : i32, i32, i32
  }
  func.func @transform_3(%arg0: i32) -> (i32, i32) {
    %c0_i32 = arith.constant 0 : i32
    %c0_i32_0 = arith.constant 0 : i32
    %c0_i32_1 = arith.constant 0 : i32
    return %c0_i32, %c0_i32_0 : i32, i32
  }
  func.func @transform_4(%arg0: i32) -> (i32, i32) {
    %c0_i32 = arith.constant 0 : i32
    %c0_i32_0 = arith.constant 0 : i32
    %c0_i32_1 = arith.constant 0 : i32
    return %c0_i32, %c0_i32_0 : i32, i32
  }
  func.func @transform_5(%arg0: i32) -> (i32, i32) {
    %c0_i32 = arith.constant 0 : i32
    %c0_i32_0 = arith.constant 0 : i32
    %c0_i32_1 = arith.constant 0 : i32
    return %c0_i32, %c0_i32_0 : i32, i32
  }
}

</mosaic_0001>

<bundles_post_ra>
// kernel: sentimixture_forward.1
= control target key start
LH: loop header
LB: loop body
LE: loop exit
PB: predicated region body
PF: predicated region fallthrough
CT: control target
= control target key end

     0   :  { %10 = vsyncpa [#allocation5], 0  ;;  %s11691_s0 = inlined_call_operand.vmem [shape: f32[16,768], index: 0, kind: input, shape index: {}]   ;;  %s11692_s1 = inlined_call_operand.hbm [shape: bf16[4,768,768], index: 1, kind: input, shape index: {}]   ;;  %s11693_s2 = inlined_call_operand.hbm [shape: f32[4,1,768], index: 2, kind: input, shape index: {}]   ;;  %s11694_s3 = inlined_call_operand.hbm [shape: bf16[768,128], index: 3, kind: input, shape index: {}]   ;;  %s11695_s4 = inlined_call_operand.hbm [shape: f32[1,128], index: 4, kind: input, shape index: {}]   ;;  %s11696_s5 = inlined_call_operand.hbm [shape: f32[2,128], index: 5, kind: output, shape index: {}]  }
   0x1   :  { %12 = vsyncpa [#allocation5 + $0x1], 0 }
   0x2   :  { %13 = vsyncpa [#allocation8], 0 }
   0x3   :  { %15 = vsyncpa [#allocation8 + $0x1], 0 }
   0x4   :  { %16 = vsyncpa [#allocation11], 0 }
   0x5   :  { %17 = vsyncpa [#allocation6], 0  ;;  %s9197_s18 = smov 0   ;;  %s9199_s19 = smov 0  }
   0x6   :  { %s9201_s20 = smov 0   ;;  %s9203_s21 = smov 0  }
   0x7 LB: > { %s9216_s22 = sadd.s32 4294967295, %s9153_s21   ;;  %p64_p0 = scmp.ne.s32.totalorder %s9145_s19, %s9141_s18  ;;  %s9153_s21 = sphi %s9203_s21, %s12325_s21   ;;  %s9149_s20 = sphi %s9201_s20, %s12324_s20   ;;  %s9145_s19 = sphi %s9199_s19, %s12323_s19   ;;  %s9141_s18 = sphi %s9197_s18, %s12322_s18  }
   0x8   : > { %p11697_p1 = scmp.eq.s32.totalorder %s9216_s22, 0  ;;  %p6786_p2 = scmp.ge.s32.totalorder %s9153_s21, 1 }
   0x9   : > { %p164_p3 = scmp.lt.s32.totalorder %s9153_s21, 5  ;;  %s9155_s25 = smov [#allocation9]  }
   0xa   : > { %p9225_p5 = por %p11697_p1, %p64_p0  ;;  %s179_s26 = sshll.u32 %s9155_s25, 4  ;;  %s180_s26 = int_to_ptr.vmem [resolvable:$true] %s179_s26 }
   0xb   : > { %p9229_p6 = pnand %p6786_p2, %p164_p3  ;;  %s9156_s28 = smov [#allocation10]  }
   0xc   : > { %s11882_s23 = scalar_select %p9225_p5, 1, 0 }
   0xd   : > { %s11883_s24 = scalar_select %p9229_p6, 1, 0 }
   0xe   : > { %p7975_p7 = pneg %p9229_p6  ;;  %s193_s29 = sshll.u32 %s9156_s28, 4  ;;  %s194_s29 = int_to_ptr.vmem [resolvable:$true] %s193_s29 }
   0xf   : > { %s8982_s30 = scalar_lea.vmem %s180_s26, 6144  ;;  %p8990_p13 = scmp.lt.s32.totalorder %s180_s26, %s180_s26 }
  0x10   : > { %p9237_p8 = pnand %p7975_p7, %p11697_p1  ;;  %p8983_p10 = scmp.ne.s32.totalorder %s180_s26, %s8982_s30 }
  0x11   : > { %p8991_p0 = scmp.lt.s32.totalorder %s8982_s30, %s8982_s30 }
  0x12   : > { %p8973_p9 = pneg %p9237_p8 }
  0x13   : > { %p8992_p2 = por %p8991_p0, %p8990_p13 }
  0x14   : > { %p8985_p11 = pnand %p8983_p10, %p8973_p9 }
  0x16   : > { %p8986_p12 = pneg %p8985_p11 }
  0x18   : > { %p8993_p3 = pnand %p8992_p2, %p8986_p12 }
  0x1a   : > { %8996 = shalt.err (!%p8993_p3)
}
  0x1b   : > { %s9157_s6 = smov 64   ;;  %s9158_s7 = smov 4  }
  0x1c   : > { %7978 = dma.hbm_to_vmem [thread:$0]  (!%p9237_p8), %s11694_s3, 6144, %s180_s26, [#allocation8], %s9157_s6, %s9157_s6, %s9158_s7  }
  0x1d   : > { %s9008_s10 = scalar_lea.vmem %s194_s29, 16  ;;  %s9015_s11 = scalar_lea.vmem %s194_s29, 32 }
  0x1e   : > { %p9009_p7 = scmp.ne.s32.totalorder %s194_s29, %s9008_s10  ;;  %p9016_p4 = scmp.lt.s32.totalorder %s194_s29, %s194_s29 }
  0x1f   : > { %p9017_p13 = scmp.lt.s32.totalorder %s9015_s11, %s9008_s10 }
  0x20   : > { %p9011_p10 = pnand %p9009_p7, %p8973_p9 }
  0x21   : > { %p9018_p12 = por %p9017_p13, %p9016_p4 }
  0x22   : > { %p9012_p11 = pneg %p9011_p10 }
  0x24   : > { %p9019_p0 = pnand %p9018_p12, %p9012_p11 }
  0x26   : > { %9022 = shalt.err (!%p9019_p0)
}
  0x27   : > { %7981 = dma.hbm_to_vmem [thread:$0]  (!%p9237_p8), %s11695_s4, 16, %s194_s29, [#allocation11]  }
  0x28   : > { %s9260_s14 = sadd.s32 1, %s9153_s21   ;;  %s51_s15 = sadd.s32 1, %s9149_s20 }
  0x29   : > { %s48_s16 = ssub.s32 %s9153_s21, %s9260_s14  ;;  %p58_p4 = scmp.ne.s32.totalorder %s9149_s20, %s9145_s19 }
  0x2a   : > { %p49_p9 = scmp.eq.s32.totalorder %s48_s16, 0  ;;  %p59_p2 = scmp.eq.s32.totalorder %s9153_s21, 0 }
  0x2b   : > { %p7991_p3 = scmp.lt.s32.totalorder %s9153_s21, 4  ;;  %s9270_s17 = sand.u32 1, %s9149_s20  }
  0x2c   : > { %s9273_s18 = scalar_select %p49_p9, %s9149_s20, %s51_s15  }
  0x2d   : > { %p60_p7 = por %p59_p2, %p58_p4  ;;  %s7953_s25 = smul.u32 2304, %s9270_s17 }
  0x2e   : > { %s7954_s26 = smul.u32 36864, %s9153_s21  ;;  %s205_s8 = scalar_lea.sflag [#allocation5], %s9270_s17 }
  0x2f   : > { %p9277_p10 = pnand %p7991_p3, %p60_p7  ;;  %s208_s6 = scalar_lea.vmem [#allocation4], %s7953_s25 }
  0x30   : > { %s9284_s30 = scalar_lea.hbm %s11692_s1, %s7954_s26  ;;  %s215_s7 = sshll.u32 %s208_s6, 4  ;;  %s9286_s7 = int_to_ptr.vmem [resolvable:$true] %s215_s7 }
  0x31   : > { %s9023_s9 = scalar_lea.hbm %s9284_s30, 36864  ;;  %p9025_p11 = pneg %p9277_p10 }
  0x32   : > { %p9024_p8 = scmp.ne.s32.totalorder %s9284_s30, %s9023_s9  ;;  %s9028_s12 = scalar_lea.hbm %s11692_s1, 147456 }
  0x33   : > { %p9029_p0 = scmp.lt.s32.totalorder %s9284_s30, %s11692_s1  ;;  %p9030_p4 = scmp.lt.s32.totalorder %s9028_s12, %s9023_s9 }
  0x34   : > { %p9026_p13 = pnand %p9025_p11, %p9024_p8 }
  0x35   : > { %p9031_p9 = por %p9030_p4, %p9029_p0 }
  0x36   : > { %p9027_p12 = pneg %p9026_p13 }
  0x38   : > { %p9032_p2 = pnand %p9031_p9, %p9027_p12 }
  0x3a   : > { %9035 = shalt.err (!%p9032_p2)
}
  0x3b   : > { %s9036_s16 = scalar_lea.vmem %s9286_s7, 36864  ;;  %s9159_s25 = smov [#allocation4]  }
  0x3c   : > { %p9037_p3 = scmp.ne.s32.totalorder %s9286_s7, %s9036_s16  ;;  %s9041_s26 = sshll.u32 %s9159_s25, 4  ;;  %s9042_s26 = int_to_ptr.vmem [resolvable:$false] %s9041_s26 }
  0x3d   : > { %s9043_s28 = scalar_lea.vmem %s9042_s26, 73728  ;;  %p9044_p13 = scmp.lt.s32.totalorder %s9286_s7, %s9042_s26 }
  0x3e   : > { %p9039_p7 = pnand %p9037_p3, %p9025_p11  ;;  %p9045_p1 = scmp.lt.s32.totalorder %s9043_s28, %s9036_s16 }
  0x40   : > { %p9040_p8 = pneg %p9039_p7  ;;  %p9046_p5 = por %p9045_p1, %p9044_p13 }
  0x42   : > { %p9047_p0 = pnand %p9046_p5, %p9040_p8 }
  0x44   : > { %9050 = shalt.err (!%p9047_p0)
}
  0x45   : > { %s9160_s29 = smov 384   ;;  %s9161_s6 = smov 24  }
  0x46   : > { %7985 = dma.hbm_to_vmem [thread:$0]  (!%p9277_p10), %s9284_s30, 36864, %s9286_s7, %s205_s8, %s9160_s29, %s9160_s29, %s9161_s6  }
  0x47   : > { %s225_s9 = sand.u32 1, %s9153_s21   ;;  %s7955_s10 = smul.u32 6, %s9270_s17 }
  0x48   : > { %s7956_s11 = smul.u32 96, %s9153_s21  ;;  %s226_s26 = scalar_lea.sflag [#allocation8], %s225_s9 }
  0x49   : > { %s229_s16 = scalar_lea.vmem [#allocation7], %s7955_s10  ;;  %s9056_s30 = scalar_lea.hbm %s11693_s2, 384 }
  0x4a   : > { %s9321_s15 = scalar_lea.hbm %s11693_s2, %s7956_s11  ;;  %s237_s25 = sshll.u32 %s229_s16, 4  ;;  %s238_s25 = int_to_ptr.vmem [resolvable:$true] %s237_s25 }
  0x4b   : > { %s9051_s28 = scalar_lea.hbm %s9321_s15, 96  ;;  %p9057_p4 = scmp.lt.s32.totalorder %s9321_s15, %s11693_s2 }
  0x4c   : > { %p9052_p1 = scmp.ne.s32.totalorder %s9321_s15, %s9051_s28  ;;  %p9058_p9 = scmp.lt.s32.totalorder %s9056_s30, %s9051_s28 }
  0x4e   : > { %p9054_p5 = pnand %p9052_p1, %p9025_p11  ;;  %p9059_p2 = por %p9058_p9, %p9057_p4 }
  0x50   : > { %p9055_p12 = pneg %p9054_p5 }
  0x52   : > { %p9060_p3 = pnand %p9059_p2, %p9055_p12 }
  0x54   : > { %9063 = shalt.err (!%p9060_p3)
}
  0x55   : > { %s9064_s29 = scalar_lea.vmem %s238_s25, 96  ;;  %s9162_s6 = smov [#allocation7]  }
  0x56   : > { %p9065_p7 = scmp.ne.s32.totalorder %s238_s25, %s9064_s29  ;;  %s9069_s9 = sshll.u32 %s9162_s6, 4  ;;  %s9070_s9 = int_to_ptr.vmem [resolvable:$false] %s9069_s9 }
  0x57   : > { %s9071_s10 = scalar_lea.vmem %s9070_s9, 192  ;;  %p9072_p0 = scmp.lt.s32.totalorder %s238_s25, %s9070_s9 }
  0x58   : > { %p9067_p8 = pnand %p9065_p7, %p9025_p11  ;;  %p9073_p1 = scmp.lt.s32.totalorder %s9071_s10, %s9064_s29 }
  0x5a   : > { %p9068_p13 = pneg %p9067_p8  ;;  %p9074_p5 = por %p9073_p1, %p9072_p0 }
  0x5c   : > { %p9075_p6 = pnand %p9074_p5, %p9068_p13 }
  0x5e   : > { %9078 = shalt.err (!%p9075_p6)
}
  0x5f   : > { %7988 = dma.hbm_to_vmem [thread:$0]  (!%p9277_p10), %s9321_s15, 96, %s238_s25, %s226_s26  }
  0x60   : > { %p11886_p12 = scmp.ne.s32.totalorder %s11883_s24, 0 }
  0x61   : > { %s248_s11 = sand.u32 (!%p11886_p12), 1, %s9145_s19   ;;  %p11887_p11 = scmp.ne.s32.totalorder (!%p11886_p12), %s11882_s23, 0 }
  0x62   : > { %246 = sbr.rel (%p11886_p12) target bundleno = 2403 (0x963), region = 40  ;;  %s249_s13 = scalar_lea.sflag (!%p11886_p12), [#allocation5], %s248_s11 }
  0x63   : > { %s7957_s12 = smul.u32 (!%p11886_p12), 2304, %s248_s11 }
  0x65   : > { %s9344_s16 = scalar_lea.vmem (!%p11886_p12), [#allocation4], %s7957_s12 }
  0x67   : > { %9120 = dma.done.wait (%p11887_p11), %s249_s13, 36864  }
  0x68   : > { %9122 = vsyncadd (%p11887_p11), %s249_s13, 4294930432  ;;  %s257_s27 = sand.u32 1, %s9216_s22   ;;  %s7958_s28 = smul.u32 6, %s248_s11 }
  0x69   : > { %s258_s15 = scalar_lea.sflag [#allocation8], %s257_s27 }
  0x6a   : > { %s9351_s25 = scalar_lea.vmem [#allocation7], %s7958_s28 }
  0x6b   : > { %9124 = dma.done.wait (%p11887_p11), %s258_s15, 96  }
  0x6c   : > { %9126 = vsyncadd (%p11887_p11), %s258_s15, 4294967200  ;;  %p11888_p6 = scmp.eq.s32.totalorder %s9216_s22, 0 }
  0x6e   : > { %9128 = dma.done.wait (%p11888_p6), [#allocation8], 6144   ;;  %p11889_p10 = pmov %p11888_p6 }
  0x6f   : > { %p11890_p4 = pmov %p11888_p6 }
  0x70   : > { %9130 = vsyncadd (%p11889_p10), [#allocation8], 4294961152 }
  0x71   : > { %9132 = dma.done.wait (%p11890_p4), [#allocation11], 16   ;;  %p11891_p9 = pmov %p11890_p4 }
  0x72   : > { %p11892_p2 = scmp.ne.s32.totalorder %s9216_s22, 0 }
  0x73   : > { %9134 = vsyncadd (%p11891_p9), [#allocation11], 4294967280 }
  0x74   : > { %300 = sbr.rel (%p11892_p2) target bundleno = 648 (0x288), region = 60 }
  0x79   : > { %v8038_v0 = vld [vmem:[%s9344_s16 + $0x154] ss:$24 sps:$4 sm:$0xff]   ;;  %v8040_v1 = vld [vmem:[%s9344_s16 + $0x150] ss:$24 sps:$4 sm:$0xff]   ;;  %v8044_v4 = vld [vmem:[%s9344_s16 + $0x124] ss:$24 sps:$4 sm:$0xff]  }
  0x7a   : > { %2079 = vmatprep.subr.bf16.mxu0 %v8038_v0  ;;  %v8041_v2 = vld [vmem:[%s9344_s16 + $0x454] ss:$24 sps:$4 sm:$0xff]   ;;  %v8043_v3 = vld [vmem:[%s9344_s16 + $0x450] ss:$24 sps:$4 sm:$0xff]   ;;  %v8046_v5 = vld [vmem:[%s9344_s16 + $0x120] ss:$24 sps:$4 sm:$0xff]  }
  0x7b   : > { %2080 = vmatpush1.bf16.msra.mxu0 %v8040_v1  ;;  %2122 = vmatprep.subr.bf16.mxu1 %v8041_v2  ;;  %v8047_v6 = vld [vmem:[%s9344_s16 + $0x424] ss:$24 sps:$4 sm:$0xff]   ;;  %v8049_v7 = vld [vmem:[%s9344_s16 + $0x420] ss:$24 sps:$4 sm:$0xff]   ;;  %v8050_v8 = vld [vmem:[%s9344_s16 + $0xf4] ss:$24 sps:$4 sm:$0xff]  }
  0x7c   : > { %2123 = vmatpush1.bf16.msra.mxu1 %v8043_v3  ;;  %2081 = vmatprep.subr.bf16.mxu0 %v8044_v4  ;;  %v8052_v9 = vld [vmem:[%s9344_s16 + $0xf0] ss:$24 sps:$4 sm:$0xff]   ;;  %v8053_v10 = vld [vmem:[%s9344_s16 + $0x3f4] ss:$24 sps:$4 sm:$0xff]   ;;  %v8056_v11 = vld [vmem:[%s9344_s16 + $0xc4] ss:$24 sps:$4 sm:$0xff]  }
  0x7d   : > { %2124 = vmatprep.subr.bf16.mxu1 %v8047_v6  ;;  %v8055_v12 = vld [vmem:[%s9344_s16 + $0x3f0] ss:$24 sps:$4 sm:$0xff]   ;;  %v8059_v13 = vld [vmem:[%s9344_s16 + $0x3c4] ss:$24 sps:$4 sm:$0xff]   ;;  %v8058_v14 = vld [vmem:[%s9344_s16 + $0xc0] ss:$24 sps:$4 sm:$0xff]  }
  0x7e   : > { %v8062_v15 = vld [vmem:[%s9344_s16 + $0x94] ss:$24 sps:$4 sm:$0xff]   ;;  %v8061_v16 = vld [vmem:[%s9344_s16 + $0x3c0] ss:$24 sps:$4 sm:$0xff]   ;;  %v8064_v18 = vld [vmem:[%s9344_s16 + $0x90] ss:$24 sps:$4 sm:$0xff]  }
  0x7f   : > { %2082 = vmatpush1.bf16.msra.mxu0 %v8046_v5  ;;  %v8065_v17 = vld [vmem:[%s9344_s16 + $0x394] ss:$24 sps:$4 sm:$0xff]   ;;  %v8068_v19 = vld [vmem:[%s9344_s16 + $0x64] ss:$24 sps:$4 sm:$0xff]   ;;  %v8067_v20 = vld [vmem:[%s9344_s16 + $0x390] ss:$24 sps:$4 sm:$0xff]  }
  0x80   : > { %2083 = vmatprep.subr.bf16.mxu0 %v8050_v8  ;;  %2125 = vmatpush1.bf16.msra.mxu1 %v8049_v7  ;;  %v8071_v21 = vld [vmem:[%s9344_s16 + $0x364] ss:$24 sps:$4 sm:$0xff]   ;;  %v8070_v22 = vld [vmem:[%s9344_s16 + $0x60] ss:$24 sps:$4 sm:$0xff]   ;;  %v8074_v23 = vld [vmem:[%s9344_s16 + $0x34] ss:$24 sps:$4 sm:$0xff]  }
  0x81   : > { %2126 = vmatprep.subr.bf16.mxu1 %v8053_v10  ;;  %v8073_v24 = vld [vmem:[%s9344_s16 + $0x360] ss:$24 sps:$4 sm:$0xff]   ;;  %v8077_v25 = vld [vmem:[%s9344_s16 + $0x334] ss:$24 sps:$4 sm:$0xff]   ;;  %v8076_v26 = vld [vmem:[%s9344_s16 + $0x30] ss:$24 sps:$4 sm:$0xff]  }
  0x82   : > { %v8080_v27 = vld [vmem:[%s9344_s16 + $0x4] ss:$24 sps:$4 sm:$0xff]   ;;  %v8079_v28 = vld [vmem:[%s9344_s16 + $0x330] ss:$24 sps:$4 sm:$0xff]   ;;  %v8082_v30 = vld [vmem:[%s9344_s16] ss:$24 sps:$4 sm:$0xff]  }
  0x83   : > { %2084 = vmatpush1.bf16.msra.mxu0 %v8052_v9  ;;  %v8083_v29 = vld [vmem:[%s9344_s16 + $0x304] ss:$24 sps:$4 sm:$0xff]   ;;  %v8086_v31 = vld [vmem:[%s9344_s16 + $0x2d4] ss:$24 sps:$4 sm:$0xff]   ;;  %v8085_v32 = vld [vmem:[%s9344_s16 + $0x300] ss:$24 sps:$4 sm:$0xff]  }
  0x84   : > { %2085 = vmatprep.subr.bf16.mxu0 %v8056_v11  ;;  %2127 = vmatpush1.bf16.msra.mxu1 %v8055_v12  ;;  %v8089_v33 = vld [vmem:[%s9344_s16 + $0x5d4] ss:$24 sps:$4 sm:$0xff]   ;;  %v8088_v34 = vld [vmem:[%s9344_s16 + $0x2d0] ss:$24 sps:$4 sm:$0xff]   ;;  %v8092_v35 = vld [vmem:[%s9344_s16 + $0x2a4] ss:$24 sps:$4 sm:$0xff]  }
  0x85   : > { %2128 = vmatprep.subr.bf16.mxu1 %v8059_v13  ;;  %v8091_v36 = vld [vmem:[%s9344_s16 + $0x5d0] ss:$24 sps:$4 sm:$0xff]   ;;  %v8095_v37 = vld [vmem:[%s9344_s16 + $0x5a4] ss:$24 sps:$4 sm:$0xff]   ;;  %v8094_v38 = vld [vmem:[%s9344_s16 + $0x2a0] ss:$24 sps:$4 sm:$0xff]  }
  0x86   : > { %v8098_v39 = vld [vmem:[%s9344_s16 + $0x274] ss:$24 sps:$4 sm:$0xff]   ;;  %v8097_v40 = vld [vmem:[%s9344_s16 + $0x5a0] ss:$24 sps:$4 sm:$0xff]   ;;  %v8100_v42 = vld [vmem:[%s9344_s16 + $0x270] ss:$24 sps:$4 sm:$0xff]  }
  0x87   : > { %2086 = vmatpush1.bf16.msra.mxu0 %v8058_v14  ;;  %v8101_v41 = vld [vmem:[%s9344_s16 + $0x574] ss:$24 sps:$4 sm:$0xff]   ;;  %v8104_v43 = vld [vmem:[%s9344_s16 + $0x244] ss:$24 sps:$4 sm:$0xff]   ;;  %v8103_v44 = vld [vmem:[%s9344_s16 + $0x570] ss:$24 sps:$4 sm:$0xff]  }
  0x88   : > { %2087 = vmatprep.subr.bf16.mxu0 %v8062_v15  ;;  %2129 = vmatpush1.bf16.msra.mxu1 %v8061_v16  ;;  %v8107_v45 = vld [vmem:[%s9344_s16 + $0x544] ss:$24 sps:$4 sm:$0xff]   ;;  %v308_v47 = vld [vmem:[%s11691_s0 + $0x38] sm:$0xff]  ;;  %v8106_v48 = vld [vmem:[%s9344_s16 + $0x240] ss:$24 sps:$4 sm:$0xff]  }
  0x89   : > { %2130 = vmatprep.subr.bf16.mxu1 %v8065_v17  ;;  %v302_v46 = vld [vmem:[%s11691_s0 + $0x8] sm:$0xff]  ;;  %v8110_v50 = vld [vmem:[%s9344_s16 + $0x214] ss:$24 sps:$4 sm:$0xff]   ;;  %v8112_v56 = vld [vmem:[%s9344_s16 + $0x210] ss:$24 sps:$4 sm:$0xff]  }
  0x8a   : > { %v9420_v49 = vpack.c.bf16 %v308_v47, %v302_v46  ;;  %v8109_v51 = vld [vmem:[%s9344_s16 + $0x540] ss:$24 sps:$4 sm:$0xff]   ;;  %v304_v52 = vld [vmem:[%s11691_s0 + $0x18] sm:$0xff]  ;;  %v8116_v57 = vld [vmem:[%s9344_s16 + $0x1e4] ss:$24 sps:$4 sm:$0xff]  }
  0x8b   : > { %2088 = vmatpush1.bf16.msra.mxu0 %v8064_v18  ;;  %v310_v53 = vld [vmem:[%s11691_s0 + $0x48] sm:$0xff]  ;;  %v8113_v54 = vld [vmem:[%s9344_s16 + $0x514] ss:$24 sps:$4 sm:$0xff]   ;;  %v8115_v58 = vld [vmem:[%s9344_s16 + $0x510] ss:$24 sps:$4 sm:$0xff]  }
  0x8c   : > { %2089 = vmatprep.subr.bf16.mxu0 %v8068_v19  ;;  %2131 = vmatpush1.bf16.msra.mxu1 %v8067_v20  ;;  %v9432_v55 = vpack.c.bf16 %v310_v53, %v304_v52  ;;  %v8119_v59 = vld [vmem:[%s9344_s16 + $0x4e4] ss:$24 sps:$4 sm:$0xff]   ;;  %v8118_v60 = vld [vmem:[%s9344_s16 + $0x1e0] ss:$24 sps:$4 sm:$0xff]   ;;  %v8122_v61 = vld [vmem:[%s9344_s16 + $0x1b4] ss:$24 sps:$4 sm:$0xff]  }
  0x8d   : > { %2132 = vmatprep.subr.bf16.mxu1 %v8071_v21  ;;  %2111 = vmatprep.mubr.bf16.mxu0 %v9420_v49  ;;  %v8121_v62 = vld [vmem:[%s9344_s16 + $0x4e0] ss:$24 sps:$4 sm:$0xff]   ;;  %v8125_v63 = vld [vmem:[%s9344_s16 + $0x4b4] ss:$24 sps:$4 sm:$0xff]   ;;  %v8124_v0 = vld [vmem:[%s9344_s16 + $0x1b0] ss:$24 sps:$4 sm:$0xff]  }
  0x8e   : > { %2154 = vmatprep.mubr.bf16.mxu1 %v9432_v55  ;;  %v8127_v1 = vld [vmem:[%s9344_s16 + $0x4b0] ss:$24 sps:$4 sm:$0xff]   ;;  %v8128_v2 = vld [vmem:[%s9344_s16 + $0x184] ss:$24 sps:$4 sm:$0xff]   ;;  %v8130_v3 = vld [vmem:[%s9344_s16 + $0x180] ss:$24 sps:$4 sm:$0xff]  }
  0x8f   : > { %2090 = vmatpush1.bf16.msra.mxu0 %v8070_v22  ;;  %v8131_v4 = vld [vmem:[%s9344_s16 + $0x484] ss:$24 sps:$4 sm:$0xff]   ;;  %v301_v5 = vld [vmem:[%s11691_s0] sm:$0xff]  ;;  %v8133_v6 = vld [vmem:[%s9344_s16 + $0x480] ss:$24 sps:$4 sm:$0xff]  }
  0x90   : > { %2091 = vmatprep.subr.bf16.mxu0 %v8074_v23  ;;  %2133 = vmatpush1.bf16.msra.mxu1 %v8073_v24  ;;  %v307_v7 = vld [vmem:[%s11691_s0 + $0x30] sm:$0xff]  ;;  %v8136_v8 = vld [vmem:[%s9344_s16 + $0x754] ss:$24 sps:$4 sm:$0xff]   ;;  %v8134_v13 = vld [vmem:[%s9344_s16 + $0x750] ss:$24 sps:$4 sm:$0xff]  }
  0x91   : > { %2134 = vmatprep.subr.bf16.mxu1 %v8077_v25  ;;  %v303_v9 = vld [vmem:[%s11691_s0 + $0x10] sm:$0xff]  ;;  %v309_v10 = vld [vmem:[%s11691_s0 + $0x40] sm:$0xff]  ;;  %v9462_v11 = vpack.c.bf16 %v307_v7, %v301_v5 }
  0x92   : > { %v8139_v12 = vld [vmem:[%s9344_s16 + $0x15c] ss:$24 sps:$4 sm:$0xff]   ;;  %v9466_v14 = vpack.c.bf16 %v309_v10, %v303_v9  ;;  %v8137_v16 = vld [vmem:[%s9344_s16 + $0x158] ss:$24 sps:$4 sm:$0xff]   ;;  %v8145_v17 = vld [vmem:[%s9344_s16 + $0x12c] ss:$24 sps:$4 sm:$0xff]  }
  0x93   : > { %2092 = vmatpush1.bf16.msra.mxu0 %v8076_v26  ;;  %v8142_v15 = vld [vmem:[%s9344_s16 + $0x724] ss:$24 sps:$4 sm:$0xff]   ;;  %v8140_v18 = vld [vmem:[%s9344_s16 + $0x720] ss:$24 sps:$4 sm:$0xff]   ;;  %v8148_v19 = vld [vmem:[%s9344_s16 + $0x6f4] ss:$24 sps:$4 sm:$0xff]  }
  0x94   : > { %2093 = vmatprep.subr.bf16.mxu0 %v8080_v27  ;;  %2135 = vmatpush1.bf16.msra.mxu1 %v8079_v28  ;;  %v8143_v20 = vld [vmem:[%s9344_s16 + $0x128] ss:$24 sps:$4 sm:$0xff]   ;;  %v8151_v21 = vld [vmem:[%s9344_s16 + $0xfc] ss:$24 sps:$4 sm:$0xff]   ;;  %v8149_v24 = vld [vmem:[%s9344_s16 + $0xf8] ss:$24 sps:$4 sm:$0xff]  }
  0x95   : > { %2136 = vmatprep.subr.bf16.mxu1 %v8083_v29  ;;  %v8146_v22 = vld [vmem:[%s9344_s16 + $0x6f0] ss:$24 sps:$4 sm:$0xff]   ;;  %v8154_v23 = vld [vmem:[%s9344_s16 + $0x6c4] ss:$24 sps:$4 sm:$0xff]   ;;  %v8152_v26 = vld [vmem:[%s9344_s16 + $0x6c0] ss:$24 sps:$4 sm:$0xff]  }
  0x96   : > { %v8157_v25 = vld [vmem:[%s9344_s16 + $0xcc] ss:$24 sps:$4 sm:$0xff]   ;;  %v8155_v28 = vld [vmem:[%s9344_s16 + $0xc8] ss:$24 sps:$4 sm:$0xff]   ;;  %v8163_v29 = vld [vmem:[%s9344_s16 + $0x9c] ss:$24 sps:$4 sm:$0xff]  }
  0x97   : > { %2094 = vmatpush1.bf16.msra.mxu0 %v8082_v30  ;;  %v8160_v27 = vld [vmem:[%s9344_s16 + $0x694] ss:$24 sps:$4 sm:$0xff]   ;;  %v8158_v30 = vld [vmem:[%s9344_s16 + $0x690] ss:$24 sps:$4 sm:$0xff]   ;;  %v8212_v7 = vld [vmem:[%s9344_s16 + $0x7e0] ss:$24 sps:$4 sm:$0xff]  }
  0x98   : > { %2095 = vmatprep.subr.bf16.mxu0 %v8086_v31  ;;  %2137 = vmatpush1.bf16.msra.mxu1 %v8085_v32  ;;  %v8166_v31 = vld [vmem:[%s9344_s16 + $0x664] ss:$24 sps:$4 sm:$0xff]   ;;  %v8161_v32 = vld [vmem:[%s9344_s16 + $0x98] ss:$24 sps:$4 sm:$0xff]   ;;  %v8184_v46 = vld [vmem:[%s9344_s16 + $0x8d4] ss:$24 sps:$4 sm:$0xff]  }
  0x99   : > { %2138 = vmatprep.subr.bf16.mxu1 %v8089_v33  ;;  %v8169_v33 = vld [vmem:[%s9344_s16 + $0x6c] ss:$24 sps:$4 sm:$0xff]   ;;  %v8179_v47 = vld [vmem:[%s9344_s16 + $0x8] ss:$24 sps:$4 sm:$0xff]   ;;  %v8185_v52 = vld [vmem:[%s9344_s16 + $0x2d8] ss:$24 sps:$4 sm:$0xff]  }
  0x9a   : > { %v8193_v53 = vld [vmem:[%s9344_s16 + $0x2ac] ss:$24 sps:$4 sm:$0xff]   ;;  %v8209_v5 = vld [vmem:[%s9344_s16 + $0x218] ss:$24 sps:$4 sm:$0xff]   ;;  %v8215_v9 = vld [vmem:[%s9344_s16 + $0x1e8] ss:$24 sps:$4 sm:$0xff]  }
  0x9b   : > { %2096 = vmatpush2.bf16.msra.mxu0 %v8088_v34  ;;  %v8164_v34 = vld [vmem:[%s9344_s16 + $0x660] ss:$24 sps:$4 sm:$0xff]   ;;  %v8223_v10 = vld [vmem:[%s9344_s16 + $0x1bc] ss:$24 sps:$4 sm:$0xff]  }
  0x9c   : > { %2097 = vmatprep.subr.bf16.mxu0 %v8092_v35  ;;  %2139 = vmatpush2.bf16.msra.mxu1 %v8091_v36  ;;  %v8172_v35 = vld [vmem:[%s9344_s16 + $0x634] ss:$24 sps:$4 sm:$0xff]   ;;  %v8167_v36 = vld [vmem:[%s9344_s16 + $0x68] ss:$24 sps:$4 sm:$0xff]  }
  0x9d   : > { %2140 = vmatprep.subr.bf16.mxu1 %v8095_v37  ;;  %v8175_v37 = vld [vmem:[%s9344_s16 + $0x3c] ss:$24 sps:$4 sm:$0xff]  }
  0x9f   : > { %2098 = vmatpush2.bf16.msra.mxu0 %v8094_v38  ;;  %v8170_v38 = vld [vmem:[%s9344_s16 + $0x630] ss:$24 sps:$4 sm:$0xff]  }
  0xa0   : > { %2099 = vmatprep.subr.bf16.mxu0 %v8098_v39  ;;  %2141 = vmatpush2.bf16.msra.mxu1 %v8097_v40  ;;  %v8178_v39 = vld [vmem:[%s9344_s16 + $0x604] ss:$24 sps:$4 sm:$0xff]  }
  0xa1   : > { %2142 = vmatprep.subr.bf16.mxu1 %v8101_v41  ;;  %v306_v40 = vld [vmem:[%s11691_s0 + $0x28] sm:$0xff]  ;;  %v312_v41 = vld [vmem:[%s11691_s0 + $0x58] sm:$0xff] }
  0xa3   : > { %2100 = vmatpush2.bf16.msra.mxu0 %v8100_v42  ;;  %v8173_v42 = vld [vmem:[%s9344_s16 + $0x38] ss:$24 sps:$4 sm:$0xff]  }
  0xa4   : > { %2101 = vmatprep.subr.bf16.mxu0 %v8104_v43  ;;  %2143 = vmatpush2.bf16.msra.mxu1 %v8103_v44  ;;  %v9503_v43 = vpack.c.bf16 %v312_v41, %v306_v40  ;;  %v8181_v44 = vld [vmem:[%s9344_s16 + $0xc] ss:$24 sps:$4 sm:$0xff]   ;;  %v8254_v40 = vld [vmem:[%s9344_s16 + $0x398] ss:$24 sps:$4 sm:$0xff]  }
  0xa5   : > { %2144 = vmatprep.subr.bf16.mxu1 %v8107_v45  ;;  %v8176_v45 = vld [vmem:[%s9344_s16 + $0x600] ss:$24 sps:$4 sm:$0xff]   ;;  %v8262_v41 = vld [vmem:[%s9344_s16 + $0x36c] ss:$24 sps:$4 sm:$0xff]  }
  0xa7   : > { %2102 = vmatpush2.bf16.msra.mxu0 %v8106_v48  ;;  %v8187_v48 = vld [vmem:[%s9344_s16 + $0x2dc] ss:$24 sps:$4 sm:$0xff]  }
  0xa8   : > { %2103 = vmatprep.subr.bf16.mxu0 %v8110_v50  ;;  %2145 = vmatpush2.bf16.msra.mxu1 %v8109_v51  ;;  %v8182_v50 = vld [vmem:[%s9344_s16 + $0x8d0] ss:$24 sps:$4 sm:$0xff]   ;;  %v8190_v51 = vld [vmem:[%s9344_s16 + $0x8a4] ss:$24 sps:$4 sm:$0xff]  }
  0xa9   : > { %2146 = vmatprep.subr.bf16.mxu1 %v8113_v54  ;;  %v8188_v54 = vld [vmem:[%s9344_s16 + $0x8a0] ss:$24 sps:$4 sm:$0xff]  }
  0xab   : > { %2104 = vmatpush2.bf16.msra.mxu0 %v8112_v56  ;;  %v8196_v56 = vld [vmem:[%s9344_s16 + $0x874] ss:$24 sps:$4 sm:$0xff]  }
  0xac   : > { %2105 = vmatprep.subr.bf16.mxu0 %v8116_v57  ;;  %2147 = vmatpush2.bf16.msra.mxu1 %v8115_v58  ;;  %v8191_v57 = vld [vmem:[%s9344_s16 + $0x2a8] ss:$24 sps:$4 sm:$0xff]   ;;  %v8199_v58 = vld [vmem:[%s9344_s16 + $0x27c] ss:$24 sps:$4 sm:$0xff]  }
  0xad   : > { %2148 = vmatprep.subr.bf16.mxu1 %v8119_v59  ;;  %v8194_v59 = vld [vmem:[%s9344_s16 + $0x870] ss:$24 sps:$4 sm:$0xff]  }
  0xaf   : > { %2106 = vmatpush2.bf16.msra.mxu0 %v8118_v60  ;;  %v8202_v60 = vld [vmem:[%s9344_s16 + $0x844] ss:$24 sps:$4 sm:$0xff]  }
  0xb0   : > { %2107 = vmatprep.subr.bf16.mxu0 %v8122_v61  ;;  %2149 = vmatpush2.bf16.msra.mxu1 %v8121_v62  ;;  %v8197_v61 = vld [vmem:[%s9344_s16 + $0x278] ss:$24 sps:$4 sm:$0xff]   ;;  %v8205_v62 = vld [vmem:[%s9344_s16 + $0x24c] ss:$24 sps:$4 sm:$0xff]  }
  0xb1   : > { %2150 = vmatprep.subr.bf16.mxu1 %v8125_v63  ;;  %v8200_v63 = vld [vmem:[%s9344_s16 + $0x840] ss:$24 sps:$4 sm:$0xff]  }
  0xb3   : > { %2108 = vmatpush2.bf16.msra.mxu0 %v8124_v0  ;;  %v8208_v0 = vld [vmem:[%s9344_s16 + $0x814] ss:$24 sps:$4 sm:$0xff]  }
  0xb4   : > { %2109 = vmatprep.subr.bf16.mxu0 %v8128_v2  ;;  %2151 = vmatpush2.bf16.msra.mxu1 %v8127_v1  ;;  %v8203_v1 = vld [vmem:[%s9344_s16 + $0x248] ss:$24 sps:$4 sm:$0xff]   ;;  %v8211_v2 = vld [vmem:[%s9344_s16 + $0x21c] ss:$24 sps:$4 sm:$0xff]  }
  0xb5   : > { %2152 = vmatprep.subr.bf16.mxu1 %v8131_v4  ;;  %v8214_v4 = vld [vmem:[%s9344_s16 + $0x7e4] ss:$24 sps:$4 sm:$0xff]  }
  0xb7   : > { %2110 = vmatpush2.bf16.msra.mxu0 %v8130_v3  ;;  %v8206_v3 = vld [vmem:[%s9344_s16 + $0x810] ss:$24 sps:$4 sm:$0xff]  }
  0xb8   : > { %2165 = vmatprep.subr.bf16.mxu0 %v8136_v8  ;;  %2153 = vmatpush2.bf16.msra.mxu1 %v8133_v6  ;;  %v8217_v6 = vld [vmem:[%s9344_s16 + $0x1ec] ss:$24 sps:$4 sm:$0xff]  }
  0xb9   : > { %2208 = vmatprep.subr.bf16.mxu1 %v8139_v12  ;;  %v8220_v8 = vld [vmem:[%s9344_s16 + $0x7b4] ss:$24 sps:$4 sm:$0xff]   ;;  %v8218_v12 = vld [vmem:[%s9344_s16 + $0x7b0] ss:$24 sps:$4 sm:$0xff]  }
  0xba   : > { %2112 = vmatmul.mubr.bf16.vlgmr.msra.gmra.mxu0 %v9462_v11 }
  0xbb   : > { %2166 = vmatpush1.bf16.msra.mxu0 %v8134_v13  ;;  %2155 = vmatmul.mubr.bf16.vlgmr.msra.gmra.mxu1 %v9466_v14  ;;  %v8226_v13 = vld [vmem:[%s9344_s16 + $0x784] ss:$24 sps:$4 sm:$0xff]  }
  0xbc   : > { %2167 = vmatprep.subr.bf16.mxu0 %v8142_v15  ;;  %2209 = vmatpush1.bf16.msra.mxu1 %v8137_v16  ;;  %v8221_v15 = vld [vmem:[%s9344_s16 + $0x1b8] ss:$24 sps:$4 sm:$0xff]  }
  0xbd   : > { %2240 = vmatprep.mubr.bf16.mxu1 %v9420_v49  ;;  %2210 = vmatprep.subr.bf16.mxu1 %v8145_v17  ;;  %v8224_v16 = vld [vmem:[%s9344_s16 + $0x780] ss:$24 sps:$4 sm:$0xff]   ;;  %v8229_v17 = vld [vmem:[%s9344_s16 + $0x18c] ss:$24 sps:$4 sm:$0xff]  }
  0xbe   : > { %2197 = vmatprep.mubr.bf16.mxu0 %v9503_v43 }
  0xbf   : > { %2168 = vmatpush1.bf16.msra.mxu0 %v8140_v18  ;;  %v305_v18 = vld [vmem:[%s11691_s0 + $0x20] sm:$0xff] }
  0xc0   : > { %2169 = vmatprep.subr.bf16.mxu0 %v8148_v19  ;;  %2211 = vmatpush1.bf16.msra.mxu1 %v8143_v20  ;;  %v311_v19 = vld [vmem:[%s11691_s0 + $0x50] sm:$0xff]  ;;  %v8232_v20 = vld [vmem:[%s9344_s16 + $0x45c] ss:$24 sps:$4 sm:$0xff]  }
  0xc1   : > { %2212 = vmatprep.subr.bf16.mxu1 %v8151_v21  ;;  %v8227_v21 = vld [vmem:[%s9344_s16 + $0x188] ss:$24 sps:$4 sm:$0xff]  }
  0xc3   : > { %2170 = vmatpush1.bf16.msra.mxu0 %v8146_v22  ;;  %v9548_v22 = vpack.c.bf16 %v311_v19, %v305_v18  ;;  %v8316_v18 = vld [vmem:[%s9344_s16 + $0x4bc] ss:$24 sps:$4 sm:$0xff]   ;;  %v8311_v19 = vld [vmem:[%s9344_s16 + $0x7e8] ss:$24 sps:$4 sm:$0xff]  }
  0xc4   : > { %2171 = vmatprep.subr.bf16.mxu0 %v8154_v23  ;;  %2213 = vmatpush1.bf16.msra.mxu1 %v8149_v24  ;;  %v8235_v23 = vld [vmem:[%s9344_s16 + $0x75c] ss:$24 sps:$4 sm:$0xff]   ;;  %v8230_v24 = vld [vmem:[%s9344_s16 + $0x458] ss:$24 sps:$4 sm:$0xff]  }
  0xc5   : > { %2214 = vmatprep.subr.bf16.mxu1 %v8157_v25  ;;  %v8238_v25 = vld [vmem:[%s9344_s16 + $0x42c] ss:$24 sps:$4 sm:$0xff]  }
  0xc7   : > { %2172 = vmatpush1.bf16.msra.mxu0 %v8152_v26  ;;  %v8233_v26 = vld [vmem:[%s9344_s16 + $0x758] ss:$24 sps:$4 sm:$0xff]  }
  0xc8   : > { %2173 = vmatprep.subr.bf16.mxu0 %v8160_v27  ;;  %2215 = vmatpush1.bf16.msra.mxu1 %v8155_v28  ;;  %v8241_v27 = vld [vmem:[%s9344_s16 + $0x72c] ss:$24 sps:$4 sm:$0xff]   ;;  %v8236_v28 = vld [vmem:[%s9344_s16 + $0x428] ss:$24 sps:$4 sm:$0xff]  }
  0xc9   : > { %2216 = vmatprep.subr.bf16.mxu1 %v8163_v29  ;;  %v8244_v29 = vld [vmem:[%s9344_s16 + $0x3fc] ss:$24 sps:$4 sm:$0xff]  }
  0xcb   : > { %2174 = vmatpush1.bf16.msra.mxu0 %v8158_v30  ;;  %v8239_v30 = vld [vmem:[%s9344_s16 + $0x728] ss:$24 sps:$4 sm:$0xff]  }
  0xcc   : > { %2175 = vmatprep.subr.bf16.mxu0 %v8166_v31  ;;  %2217 = vmatpush1.bf16.msra.mxu1 %v8161_v32  ;;  %v8247_v31 = vld [vmem:[%s9344_s16 + $0x6fc] ss:$24 sps:$4 sm:$0xff]   ;;  %v8242_v32 = vld [vmem:[%s9344_s16 + $0x3f8] ss:$24 sps:$4 sm:$0xff]  }
  0xcd   : > { %2218 = vmatprep.subr.bf16.mxu1 %v8169_v33  ;;  %v8250_v33 = vld [vmem:[%s9344_s16 + $0x3cc] ss:$24 sps:$4 sm:$0xff]  }
  0xcf   : > { %2176 = vmatpush1.bf16.msra.mxu0 %v8164_v34  ;;  %v8245_v34 = vld [vmem:[%s9344_s16 + $0x6f8] ss:$24 sps:$4 sm:$0xff]  }
  0xd0   : > { %2177 = vmatprep.subr.bf16.mxu0 %v8172_v35  ;;  %2219 = vmatpush1.bf16.msra.mxu1 %v8167_v36  ;;  %v8253_v35 = vld [vmem:[%s9344_s16 + $0x6cc] ss:$24 sps:$4 sm:$0xff]   ;;  %v8248_v36 = vld [vmem:[%s9344_s16 + $0x3c8] ss:$24 sps:$4 sm:$0xff]  }
  0xd1   : > { %2220 = vmatprep.subr.bf16.mxu1 %v8175_v37  ;;  %v8256_v37 = vld [vmem:[%s9344_s16 + $0x39c] ss:$24 sps:$4 sm:$0xff]  }
  0xd3   : > { %2178 = vmatpush1.bf16.msra.mxu0 %v8170_v38  ;;  %v8251_v38 = vld [vmem:[%s9344_s16 + $0x6c8] ss:$24 sps:$4 sm:$0xff]  }
  0xd4   : > { %2179 = vmatprep.subr.bf16.mxu0 %v8178_v39  ;;  %2221 = vmatpush1.bf16.msra.mxu1 %v8173_v42  ;;  %v8259_v39 = vld [vmem:[%s9344_s16 + $0x69c] ss:$24 sps:$4 sm:$0xff]   ;;  %v8257_v42 = vld [vmem:[%s9344_s16 + $0x698] ss:$24 sps:$4 sm:$0xff]  }
  0xd5   : > { %2222 = vmatprep.subr.bf16.mxu1 %v8181_v44  ;;  %v8265_v44 = vld [vmem:[%s9344_s16 + $0x66c] ss:$24 sps:$4 sm:$0xff]  }
  0xd7   : > { %2180 = vmatpush1.bf16.msra.mxu0 %v8176_v45  ;;  %v8260_v45 = vld [vmem:[%s9344_s16 + $0x368] ss:$24 sps:$4 sm:$0xff]  }
  0xd8   : > { %2181 = vmatprep.subr.bf16.mxu0 %v8184_v46  ;;  %2223 = vmatpush1.bf16.msra.mxu1 %v8179_v47  ;;  %v8268_v46 = vld [vmem:[%s9344_s16 + $0x33c] ss:$24 sps:$4 sm:$0xff]   ;;  %v8263_v47 = vld [vmem:[%s9344_s16 + $0x668] ss:$24 sps:$4 sm:$0xff]  }
  0xd9   : > { %2224 = vmatprep.subr.bf16.mxu1 %v8187_v48  ;;  %v8271_v48 = vld [vmem:[%s9344_s16 + $0x63c] ss:$24 sps:$4 sm:$0xff]  }
  0xdb   : > { %2182 = vmatpush2.bf16.msra.mxu0 %v8182_v50  ;;  %v8266_v50 = vld [vmem:[%s9344_s16 + $0x338] ss:$24 sps:$4 sm:$0xff]  }
  0xdc   : > { %2183 = vmatprep.subr.bf16.mxu0 %v8190_v51  ;;  %2225 = vmatpush2.bf16.msra.mxu1 %v8185_v52  ;;  %v8274_v51 = vld [vmem:[%s9344_s16 + $0x30c] ss:$24 sps:$4 sm:$0xff]   ;;  %v8269_v52 = vld [vmem:[%s9344_s16 + $0x638] ss:$24 sps:$4 sm:$0xff]  }
  0xdd   : > { %2226 = vmatprep.subr.bf16.mxu1 %v8193_v53  ;;  %v8277_v53 = vld [vmem:[%s9344_s16 + $0x60c] ss:$24 sps:$4 sm:$0xff]  }
  0xdf   : > { %2184 = vmatpush2.bf16.msra.mxu0 %v8188_v54  ;;  %v8272_v54 = vld [vmem:[%s9344_s16 + $0x308] ss:$24 sps:$4 sm:$0xff]  }
  0xe0   : > { %2185 = vmatprep.subr.bf16.mxu0 %v8196_v56  ;;  %2227 = vmatpush2.bf16.msra.mxu1 %v8191_v57  ;;  %v8280_v56 = vld [vmem:[%s9344_s16 + $0x5dc] ss:$24 sps:$4 sm:$0xff]   ;;  %v8275_v57 = vld [vmem:[%s9344_s16 + $0x608] ss:$24 sps:$4 sm:$0xff]  }
  0xe1   : > { %2228 = vmatprep.subr.bf16.mxu1 %v8199_v58  ;;  %v8283_v58 = vld [vmem:[%s9344_s16 + $0x8dc] ss:$24 sps:$4 sm:$0xff]  }
  0xe3   : > { %2186 = vmatpush2.bf16.msra.mxu0 %v8194_v59  ;;  %v8278_v59 = vld [vmem:[%s9344_s16 + $0x5d8] ss:$24 sps:$4 sm:$0xff]  }
  0xe4   : > { %2187 = vmatprep.subr.bf16.mxu0 %v8202_v60  ;;  %2229 = vmatpush2.bf16.msra.mxu1 %v8197_v61  ;;  %v8286_v60 = vld [vmem:[%s9344_s16 + $0x5ac] ss:$24 sps:$4 sm:$0xff]   ;;  %v8281_v61 = vld [vmem:[%s9344_s16 + $0x8d8] ss:$24 sps:$4 sm:$0xff]  }
  0xe5   : > { %2230 = vmatprep.subr.bf16.mxu1 %v8205_v62  ;;  %v8289_v62 = vld [vmem:[%s9344_s16 + $0x8ac] ss:$24 sps:$4 sm:$0xff]  }
  0xe7   : > { %2188 = vmatpush2.bf16.msra.mxu0 %v8200_v63  ;;  %v8284_v63 = vld [vmem:[%s9344_s16 + $0x5a8] ss:$24 sps:$4 sm:$0xff]  }
  0xe8   : > { %2189 = vmatprep.subr.bf16.mxu0 %v8208_v0  ;;  %2231 = vmatpush2.bf16.msra.mxu1 %v8203_v1  ;;  %v8292_v0 = vld [vmem:[%s9344_s16 + $0x57c] ss:$24 sps:$4 sm:$0xff]   ;;  %v8287_v1 = vld [vmem:[%s9344_s16 + $0x8a8] ss:$24 sps:$4 sm:$0xff]  }
  0xe9   : > { %2232 = vmatprep.subr.bf16.mxu1 %v8211_v2  ;;  %v8295_v2 = vld [vmem:[%s9344_s16 + $0x87c] ss:$24 sps:$4 sm:$0xff]  }
  0xeb   : > { %2190 = vmatpush2.bf16.msra.mxu0 %v8206_v3  ;;  %v8290_v3 = vld [vmem:[%s9344_s16 + $0x578] ss:$24 sps:$4 sm:$0xff]  }
  0xec   : > { %2191 = vmatprep.subr.bf16.mxu0 %v8214_v4  ;;  %2233 = vmatpush2.bf16.msra.mxu1 %v8209_v5  ;;  %v8298_v4 = vld [vmem:[%s9344_s16 + $0x54c] ss:$24 sps:$4 sm:$0xff]   ;;  %v8293_v5 = vld [vmem:[%s9344_s16 + $0x878] ss:$24 sps:$4 sm:$0xff]  }
  0xed   : > { %2234 = vmatprep.subr.bf16.mxu1 %v8217_v6  ;;  %v8301_v6 = vld [vmem:[%s9344_s16 + $0x84c] ss:$24 sps:$4 sm:$0xff]  }
  0xef   : > { %2192 = vmatpush2.bf16.msra.mxu0 %v8212_v7  ;;  %v8296_v7 = vld [vmem:[%s9344_s16 + $0x548] ss:$24 sps:$4 sm:$0xff]  }
  0xf0   : > { %2193 = vmatprep.subr.bf16.mxu0 %v8220_v8  ;;  %2235 = vmatpush2.bf16.msra.mxu1 %v8215_v9  ;;  %v8304_v8 = vld [vmem:[%s9344_s16 + $0x51c] ss:$24 sps:$4 sm:$0xff]   ;;  %v8299_v9 = vld [vmem:[%s9344_s16 + $0x848] ss:$24 sps:$4 sm:$0xff]  }
  0xf1   : > { %2236 = vmatprep.subr.bf16.mxu1 %v8223_v10  ;;  %v8307_v10 = vld [vmem:[%s9344_s16 + $0x81c] ss:$24 sps:$4 sm:$0xff]  }
  0xf3   : > { %2194 = vmatpush2.bf16.msra.mxu0 %v8218_v12  ;;  %v8302_v12 = vld [vmem:[%s9344_s16 + $0x518] ss:$24 sps:$4 sm:$0xff]  }
  0xf4   : > { %2195 = vmatprep.subr.bf16.mxu0 %v8226_v13  ;;  %2237 = vmatpush2.bf16.msra.mxu1 %v8221_v15  ;;  %v8310_v13 = vld [vmem:[%s9344_s16 + $0x4ec] ss:$24 sps:$4 sm:$0xff]   ;;  %v8305_v15 = vld [vmem:[%s9344_s16 + $0x818] ss:$24 sps:$4 sm:$0xff]  }
  0xf5   : > { %2238 = vmatprep.subr.bf16.mxu1 %v8229_v17  ;;  %v8308_v17 = vld [vmem:[%s9344_s16 + $0x4e8] ss:$24 sps:$4 sm:$0xff]  }
  0xf7   : > { %2196 = vmatpush2.bf16.msra.mxu0 %v8224_v16  ;;  %v8313_v16 = vld [vmem:[%s9344_s16 + $0x7ec] ss:$24 sps:$4 sm:$0xff]  }
  0xf8   : > { %2251 = vmatprep.subr.bf16.mxu0 %v8232_v20  ;;  %2239 = vmatpush2.bf16.msra.mxu1 %v8227_v21  ;;  %v8319_v20 = vld [vmem:[%s9344_s16 + $0x7bc] ss:$24 sps:$4 sm:$0xff]   ;;  %v8314_v21 = vld [vmem:[%s9344_s16 + $0x4b8] ss:$24 sps:$4 sm:$0xff]  }
  0xf9   : > { %2294 = vmatprep.subr.bf16.mxu1 %v8235_v23  ;;  %v8322_v23 = vld [vmem:[%s9344_s16 + $0x48c] ss:$24 sps:$4 sm:$0xff]  }
  0xfa   : > { %2198 = vmatmul.mubr.bf16.vlgmr.msra.gmra.mxu0 %v9548_v22 }
  0xfb   : > { %2252 = vmatpush1.bf16.msra.mxu0 %v8230_v24  ;;  %2283 = vmatprep.mubr.bf16.mxu0 %v9432_v55  ;;  %v8317_v24 = vld [vmem:[%s9344_s16 + $0x7b8] ss:$24 sps:$4 sm:$0xff]  }
  0xfc   : > { %2241 = vmatmul.mubr.bf16.vlgmr.msra.gmra.mxu1 %v9462_v11  ;;  %2253 = vmatprep.subr.bf16.mxu0 %v8238_v25  ;;  %v8325_v25 = vld [vmem:[%s9344_s16 + $0x78c] ss:$24 sps:$4 sm:$0xff]  }
  0xfd   : > { %2295 = vmatpush1.bf16.msra.mxu1 %v8233_v26  ;;  %2326 = vmatprep.mubr.bf16.mxu1 %v9503_v43  ;;  %v8320_v26 = vld [vmem:[%s9344_s16 + $0x488] ss:$24 sps:$4 sm:$0xff]  }
  0xfe   : > { %2296 = vmatprep.subr.bf16.mxu1 %v8241_v27  ;;  %v8328_v27 = vld [vmem:[%s9344_s16 + $0x164] ss:$24 sps:$4 sm:$0xff]  }
  0xff   : > { %2254 = vmatpush1.bf16.msra.mxu0 %v8236_v28  ;;  %v8323_v28 = vld [vmem:[%s9344_s16 + $0x788] ss:$24 sps:$4 sm:$0xff]  }
 0x100   : > { %2255 = vmatprep.subr.bf16.mxu0 %v8244_v29  ;;  %v8331_v29 = vld [vmem:[%s9344_s16 + $0x464] ss:$24 sps:$4 sm:$0xff]  }
 0x101   : > { %2297 = vmatpush1.bf16.msra.mxu1 %v8239_v30  ;;  %v8326_v30 = vld [vmem:[%s9344_s16 + $0x160] ss:$24 sps:$4 sm:$0xff]  }
 0x102   : > { %2298 = vmatprep.subr.bf16.mxu1 %v8247_v31  ;;  %v8334_v31 = vld [vmem:[%s9344_s16 + $0x134] ss:$24 sps:$4 sm:$0xff]  }
 0x103   : > { %2256 = vmatpush1.bf16.msra.mxu0 %v8242_v32  ;;  %v8329_v32 = vld [vmem:[%s9344_s16 + $0x460] ss:$24 sps:$4 sm:$0xff]  }
 0x104   : > { %2257 = vmatprep.subr.bf16.mxu0 %v8250_v33  ;;  %v8337_v33 = vld [vmem:[%s9344_s16 + $0x434] ss:$24 sps:$4 sm:$0xff]  }
 0x105   : > { %2299 = vmatpush1.bf16.msra.mxu1 %v8245_v34  ;;  %v8332_v34 = vld [vmem:[%s9344_s16 + $0x130] ss:$24 sps:$4 sm:$0xff]  }
 0x106   : > { %2300 = vmatprep.subr.bf16.mxu1 %v8253_v35  ;;  %v8340_v35 = vld [vmem:[%s9344_s16 + $0x104] ss:$24 sps:$4 sm:$0xff]  }
 0x107   : > { %2258 = vmatpush1.bf16.msra.mxu0 %v8248_v36  ;;  %v8335_v36 = vld [vmem:[%s9344_s16 + $0x430] ss:$24 sps:$4 sm:$0xff]  }
 0x108   : > { %2259 = vmatprep.subr.bf16.mxu0 %v8256_v37  ;;  %v8343_v37 = vld [vmem:[%s9344_s16 + $0x404] ss:$24 sps:$4 sm:$0xff]  }
 0x109   : > { %2301 = vmatpush1.bf16.msra.mxu1 %v8251_v38  ;;  %v8338_v38 = vld [vmem:[%s9344_s16 + $0x100] ss:$24 sps:$4 sm:$0xff]  }
 0x10a   : > { %2302 = vmatprep.subr.bf16.mxu1 %v8259_v39  ;;  %v8341_v39 = vld [vmem:[%s9344_s16 + $0x400] ss:$24 sps:$4 sm:$0xff]  }
 0x10b   : > { %2260 = vmatpush1.bf16.msra.mxu0 %v8254_v40  ;;  %v8349_v40 = vld [vmem:[%s9344_s16 + $0x3d4] ss:$24 sps:$4 sm:$0xff]  }
 0x10c   : > { %2261 = vmatprep.subr.bf16.mxu0 %v8262_v41  ;;  %v8344_v41 = vld [vmem:[%s9344_s16 + $0xd0] ss:$24 sps:$4 sm:$0xff]  }
 0x10d   : > { %2303 = vmatpush1.bf16.msra.mxu1 %v8257_v42  ;;  %v8347_v42 = vld [vmem:[%s9344_s16 + $0x3d0] ss:$24 sps:$4 sm:$0xff]  }
 0x10e   : > { %2304 = vmatprep.subr.bf16.mxu1 %v8265_v44  ;;  %v8355_v44 = vld [vmem:[%s9344_s16 + $0x3a4] ss:$24 sps:$4 sm:$0xff]  }
 0x10f   : > { %2262 = vmatpush1.bf16.msra.mxu0 %v8260_v45  ;;  %v8350_v45 = vld [vmem:[%s9344_s16 + $0xa0] ss:$24 sps:$4 sm:$0xff]  }
 0x110   : > { %2263 = vmatprep.subr.bf16.mxu0 %v8268_v46  ;;  %v8358_v46 = vld [vmem:[%s9344_s16 + $0x74] ss:$24 sps:$4 sm:$0xff]  }
 0x111   : > { %2305 = vmatpush1.bf16.msra.mxu1 %v8263_v47  ;;  %v8353_v47 = vld [vmem:[%s9344_s16 + $0x3a0] ss:$24 sps:$4 sm:$0xff]  }
 0x112   : > { %2306 = vmatprep.subr.bf16.mxu1 %v8271_v48  ;;  %v8361_v48 = vld [vmem:[%s9344_s16 + $0x374] ss:$24 sps:$4 sm:$0xff]  }
 0x113   : > { %2264 = vmatpush1.bf16.msra.mxu0 %v8266_v50  ;;  %v8356_v50 = vld [vmem:[%s9344_s16 + $0x70] ss:$24 sps:$4 sm:$0xff]  }
 0x114   : > { %2265 = vmatprep.subr.bf16.mxu0 %v8274_v51  ;;  %v8364_v51 = vld [vmem:[%s9344_s16 + $0x44] ss:$24 sps:$4 sm:$0xff]  }
 0x115   : > { %2307 = vmatpush1.bf16.msra.mxu1 %v8269_v52  ;;  %v8359_v52 = vld [vmem:[%s9344_s16 + $0x370] ss:$24 sps:$4 sm:$0xff]  }
 0x116   : > { %2308 = vmatprep.subr.bf16.mxu1 %v8277_v53  ;;  %v8367_v53 = vld [vmem:[%s9344_s16 + $0x344] ss:$24 sps:$4 sm:$0xff]  }
 0x117   : > { %2266 = vmatpush1.bf16.msra.mxu0 %v8272_v54  ;;  %v8362_v54 = vld [vmem:[%s9344_s16 + $0x40] ss:$24 sps:$4 sm:$0xff]  }
 0x118   : > { %2267 = vmatprep.subr.bf16.mxu0 %v8280_v56  ;;  %v8370_v56 = vld [vmem:[%s9344_s16 + $0x14] ss:$24 sps:$4 sm:$0xff]  }
 0x119   : > { %2309 = vmatpush1.bf16.msra.mxu1 %v8275_v57  ;;  %v8365_v57 = vld [vmem:[%s9344_s16 + $0x340] ss:$24 sps:$4 sm:$0xff]  }
 0x11a   : > { %2310 = vmatprep.subr.bf16.mxu1 %v8283_v58  ;;  %v8373_v58 = vld [vmem:[%s9344_s16 + $0x314] ss:$24 sps:$4 sm:$0xff]  }
 0x11b   : > { %2268 = vmatpush2.bf16.msra.mxu0 %v8278_v59  ;;  %v8368_v59 = vld [vmem:[%s9344_s16 + $0x10] ss:$24 sps:$4 sm:$0xff]  }
 0x11c   : > { %2269 = vmatprep.subr.bf16.mxu0 %v8286_v60  ;;  %v8376_v60 = vld [vmem:[%s9344_s16 + $0x2e4] ss:$24 sps:$4 sm:$0xff]  }
 0x11d   : > { %2311 = vmatpush2.bf16.msra.mxu1 %v8281_v61  ;;  %v8371_v61 = vld [vmem:[%s9344_s16 + $0x310] ss:$24 sps:$4 sm:$0xff]  }
 0x11e   : > { %2312 = vmatprep.subr.bf16.mxu1 %v8289_v62  ;;  %v8379_v62 = vld [vmem:[%s9344_s16 + $0x5e4] ss:$24 sps:$4 sm:$0xff]  }
 0x11f   : > { %2270 = vmatpush2.bf16.msra.mxu0 %v8284_v63  ;;  %v8374_v63 = vld [vmem:[%s9344_s16 + $0x2e0] ss:$24 sps:$4 sm:$0xff]  }
 0x120   : > { %2271 = vmatprep.subr.bf16.mxu0 %v8292_v0  ;;  %v8382_v0 = vld [vmem:[%s9344_s16 + $0x2b4] ss:$24 sps:$4 sm:$0xff]  }
 0x121   : > { %2313 = vmatpush2.bf16.msra.mxu1 %v8287_v1  ;;  %v8377_v1 = vld [vmem:[%s9344_s16 + $0x5e0] ss:$24 sps:$4 sm:$0xff]  }
 0x122   : > { %2314 = vmatprep.subr.bf16.mxu1 %v8295_v2  ;;  %v8385_v2 = vld [vmem:[%s9344_s16 + $0x5b4] ss:$24 sps:$4 sm:$0xff]  }
 0x123   : > { %2272 = vmatpush2.bf16.msra.mxu0 %v8290_v3  ;;  %v8380_v3 = vld [vmem:[%s9344_s16 + $0x2b0] ss:$24 sps:$4 sm:$0xff]  }
 0x124   : > { %2273 = vmatprep.subr.bf16.mxu0 %v8298_v4  ;;  %v8388_v4 = vld [vmem:[%s9344_s16 + $0x284] ss:$24 sps:$4 sm:$0xff]  }
 0x125   : > { %2315 = vmatpush2.bf16.msra.mxu1 %v8293_v5  ;;  %v8383_v5 = vld [vmem:[%s9344_s16 + $0x5b0] ss:$24 sps:$4 sm:$0xff]  }
 0x126   : > { %2316 = vmatprep.subr.bf16.mxu1 %v8301_v6  ;;  %v8391_v6 = vld [vmem:[%s9344_s16 + $0x584] ss:$24 sps:$4 sm:$0xff]  }
 0x127   : > { %2274 = vmatpush2.bf16.msra.mxu0 %v8296_v7  ;;  %v8386_v7 = vld [vmem:[%s9344_s16 + $0x280] ss:$24 sps:$4 sm:$0xff]  }
 0x128   : > { %2275 = vmatprep.subr.bf16.mxu0 %v8304_v8  ;;  %v8394_v8 = vld [vmem:[%s9344_s16 + $0x254] ss:$24 sps:$4 sm:$0xff]  }
 0x129   : > { %2317 = vmatpush2.bf16.msra.mxu1 %v8299_v9  ;;  %v8389_v9 = vld [vmem:[%s9344_s16 + $0x580] ss:$24 sps:$4 sm:$0xff]  }
 0x12a   : > { %2318 = vmatprep.subr.bf16.mxu1 %v8307_v10  ;;  %v8397_v10 = vld [vmem:[%s9344_s16 + $0x554] ss:$24 sps:$4 sm:$0xff]  }
 0x12b   : > { %2276 = vmatpush2.bf16.msra.mxu0 %v8302_v12  ;;  %v8392_v12 = vld [vmem:[%s9344_s16 + $0x250] ss:$24 sps:$4 sm:$0xff]  }
 0x12c   : > { %2277 = vmatprep.subr.bf16.mxu0 %v8310_v13  ;;  %v8400_v13 = vld [vmem:[%s9344_s16 + $0x224] ss:$24 sps:$4 sm:$0xff]  }
 0x12d   : > { %2319 = vmatpush2.bf16.msra.mxu1 %v8305_v15  ;;  %v8395_v15 = vld [vmem:[%s9344_s16 + $0x550] ss:$24 sps:$4 sm:$0xff]  }
 0x12e   : > { %2320 = vmatprep.subr.bf16.mxu1 %v8313_v16  ;;  %v8403_v16 = vld [vmem:[%s9344_s16 + $0x524] ss:$24 sps:$4 sm:$0xff]  }
 0x12f   : > { %2278 = vmatpush2.bf16.msra.mxu0 %v8308_v17  ;;  %v8398_v17 = vld [vmem:[%s9344_s16 + $0x220] ss:$24 sps:$4 sm:$0xff]  }
 0x130   : > { %2279 = vmatprep.subr.bf16.mxu0 %v8316_v18  ;;  %v8406_v18 = vld [vmem:[%s9344_s16 + $0x1f4] ss:$24 sps:$4 sm:$0xff]  }
 0x131   : > { %2321 = vmatpush2.bf16.msra.mxu1 %v8311_v19  ;;  %v8401_v19 = vld [vmem:[%s9344_s16 + $0x520] ss:$24 sps:$4 sm:$0xff]  }
 0x132   : > { %2322 = vmatprep.subr.bf16.mxu1 %v8319_v20  ;;  %v8409_v20 = vld [vmem:[%s9344_s16 + $0x4f4] ss:$24 sps:$4 sm:$0xff]  }
 0x133   : > { %2280 = vmatpush2.bf16.msra.mxu0 %v8314_v21  ;;  %v8404_v21 = vld [vmem:[%s9344_s16 + $0x1f0] ss:$24 sps:$4 sm:$0xff]  }
 0x134   : > { %2281 = vmatprep.subr.bf16.mxu0 %v8322_v23  ;;  %v8412_v23 = vld [vmem:[%s9344_s16 + $0x1c4] ss:$24 sps:$4 sm:$0xff]  }
 0x135   : > { %2323 = vmatpush2.bf16.msra.mxu1 %v8317_v24  ;;  %v8407_v24 = vld [vmem:[%s9344_s16 + $0x4f0] ss:$24 sps:$4 sm:$0xff]  }
 0x136   : > { %2324 = vmatprep.subr.bf16.mxu1 %v8325_v25  ;;  %v8415_v25 = vld [vmem:[%s9344_s16 + $0x4c4] ss:$24 sps:$4 sm:$0xff]  }
 0x137   : > { %2282 = vmatpush2.bf16.msra.mxu0 %v8320_v26  ;;  %v8410_v26 = vld [vmem:[%s9344_s16 + $0x1c0] ss:$24 sps:$4 sm:$0xff]  }
 0x138   : > { %2337 = vmatprep.subr.bf16.mxu0 %v8328_v27  ;;  %v8418_v27 = vld [vmem:[%s9344_s16 + $0x194] ss:$24 sps:$4 sm:$0xff]  }
 0x139   : > { %2325 = vmatpush2.bf16.msra.mxu1 %v8323_v28  ;;  %v8413_v28 = vld [vmem:[%s9344_s16 + $0x4c0] ss:$24 sps:$4 sm:$0xff]  }
 0x13a   : > { %2284 = vmatmul.mubr.bf16.vlgmr.msra.gmra.mxu0 %v9466_v14  ;;  %2380 = vmatprep.subr.bf16.mxu1 %v8331_v29  ;;  %v8421_v29 = vld [vmem:[%s9344_s16 + $0x494] ss:$24 sps:$4 sm:$0xff]  }
 0x13b   : > { %2338 = vmatpush1.bf16.msra.mxu0 %v8326_v30  ;;  %2369 = vmatprep.mubr.bf16.mxu0 %v9420_v49  ;;  %v8346_v49 = vld [vmem:[%s9344_s16 + $0xd4] ss:$24 sps:$4 sm:$0xff]   ;;  %v8416_v30 = vld [vmem:[%s9344_s16 + $0x190] ss:$24 sps:$4 sm:$0xff]  }
 0x13c   : > { %2327 = vmatmul.mubr.bf16.vlgmr.msra.gmra.mxu1 %v9548_v22  ;;  %2339 = vmatprep.subr.bf16.mxu0 %v8334_v31  ;;  %v8424_v31 = vld [vmem:[%s9344_s16 + $0x764] ss:$24 sps:$4 sm:$0xff]  }
 0x13d   : > { %2381 = vmatpush1.bf16.msra.mxu1 %v8329_v32  ;;  %2412 = vmatprep.mubr.bf16.mxu1 %v9432_v55  ;;  %v8352_v55 = vld [vmem:[%s9344_s16 + $0xa4] ss:$24 sps:$4 sm:$0xff]   ;;  %v8419_v32 = vld [vmem:[%s9344_s16 + $0x490] ss:$24 sps:$4 sm:$0xff]  }
 0x13e   : > { %2382 = vmatprep.subr.bf16.mxu1 %v8337_v33  ;;  %v8422_v33 = vld [vmem:[%s9344_s16 + $0x760] ss:$24 sps:$4 sm:$0xff]  }
 0x13f   : > { %2340 = vmatpush1.bf16.msra.mxu0 %v8332_v34  ;;  %v8427_v34 = vld [vmem:[%s9344_s16 + $0x734] ss:$24 sps:$4 sm:$0xff]  }
 0x140   : > { %2341 = vmatprep.subr.bf16.mxu0 %v8340_v35  ;;  %v8425_v35 = vld [vmem:[%s9344_s16 + $0x730] ss:$24 sps:$4 sm:$0xff]  }
 0x141   : > { %2383 = vmatpush1.bf16.msra.mxu1 %v8335_v36  ;;  %v8430_v36 = vld [vmem:[%s9344_s16 + $0x704] ss:$24 sps:$4 sm:$0xff]  }
 0x142   : > { %2384 = vmatprep.subr.bf16.mxu1 %v8343_v37  ;;  %v8428_v37 = vld [vmem:[%s9344_s16 + $0x700] ss:$24 sps:$4 sm:$0xff]  }
 0x143   : > { %2342 = vmatpush1.bf16.msra.mxu0 %v8338_v38  ;;  %v8433_v38 = vld [vmem:[%s9344_s16 + $0x6d4] ss:$24 sps:$4 sm:$0xff]  }
 0x144   : > { %2343 = vmatprep.subr.bf16.mxu0 %v8346_v49  ;;  %v8436_v49 = vld [vmem:[%s9344_s16 + $0x6a4] ss:$24 sps:$4 sm:$0xff]  }
 0x145   : > { %2385 = vmatpush1.bf16.msra.mxu1 %v8341_v39  ;;  %v8437_v39 = vld [vmem:[%s9344_s16 + $0x670] ss:$24 sps:$4 sm:$0xff]  }
 0x146   : > { %2386 = vmatprep.subr.bf16.mxu1 %v8349_v40  ;;  %v8442_v40 = vld [vmem:[%s9344_s16 + $0x644] ss:$24 sps:$4 sm:$0xff]  }
 0x147   : > { %2344 = vmatpush1.bf16.msra.mxu0 %v8344_v41  ;;  %v8440_v41 = vld [vmem:[%s9344_s16 + $0x640] ss:$24 sps:$4 sm:$0xff]  }
 0x148   : > { %2345 = vmatprep.subr.bf16.mxu0 %v8352_v55  ;;  %v8445_v55 = vld [vmem:[%s9344_s16 + $0x614] ss:$24 sps:$4 sm:$0xff]  }
 0x149   : > { %2387 = vmatpush1.bf16.msra.mxu1 %v8347_v42  ;;  %v8443_v42 = vld [vmem:[%s9344_s16 + $0x610] ss:$24 sps:$4 sm:$0xff]  }
 0x14a   : > { %2388 = vmatprep.subr.bf16.mxu1 %v8355_v44  ;;  %v8448_v44 = vld [vmem:[%s9344_s16 + $0x8e4] ss:$24 sps:$4 sm:$0xff]  }
 0x14b   : > { %2346 = vmatpush1.bf16.msra.mxu0 %v8350_v45  ;;  %v8446_v45 = vld [vmem:[%s9344_s16 + $0x8e0] ss:$24 sps:$4 sm:$0xff]  }
 0x14c   : > { %2347 = vmatprep.subr.bf16.mxu0 %v8358_v46  ;;  %v8451_v46 = vld [vmem:[%s9344_s16 + $0x8b4] ss:$24 sps:$4 sm:$0xff]  }
 0x14d   : > { %2389 = vmatpush1.bf16.msra.mxu1 %v8353_v47  ;;  %v8449_v47 = vld [vmem:[%s9344_s16 + $0x8b0] ss:$24 sps:$4 sm:$0xff]  }
 0x14e   : > { %2390 = vmatprep.subr.bf16.mxu1 %v8361_v48  ;;  %v8454_v48 = vld [vmem:[%s9344_s16 + $0x884] ss:$24 sps:$4 sm:$0xff]  }
 0x14f   : > { %2348 = vmatpush1.bf16.msra.mxu0 %v8356_v50  ;;  %v8452_v50 = vld [vmem:[%s9344_s16 + $0x880] ss:$24 sps:$4 sm:$0xff]  }
 0x150   : > { %2349 = vmatprep.subr.bf16.mxu0 %v8364_v51  ;;  %v8457_v51 = vld [vmem:[%s9344_s16 + $0x854] ss:$24 sps:$4 sm:$0xff]  }
 0x151   : > { %2391 = vmatpush1.bf16.msra.mxu1 %v8359_v52  ;;  %v8455_v52 = vld [vmem:[%s9344_s16 + $0x850] ss:$24 sps:$4 sm:$0xff]  }
 0x152   : > { %2392 = vmatprep.subr.bf16.mxu1 %v8367_v53  ;;  %v8460_v53 = vld [vmem:[%s9344_s16 + $0x824] ss:$24 sps:$4 sm:$0xff]  }
 0x153   : > { %2350 = vmatpush1.bf16.msra.mxu0 %v8362_v54  ;;  %v609_v54 = vlaneseq }
 0x154   : > { %2351 = vmatprep.subr.bf16.mxu0 %v8370_v56  ;;  %v8458_v56 = vld [vmem:[%s9344_s16 + $0x820] ss:$24 sps:$4 sm:$0xff]  }
 0x155   : > { %2393 = vmatpush1.bf16.msra.mxu1 %v8365_v57  ;;  %v8463_v57 = vld [vmem:[%s9344_s16 + $0x7f4] ss:$24 sps:$4 sm:$0xff]  }
 0x156   : > { %2394 = vmatprep.subr.bf16.mxu1 %v8373_v58  ;;  %v9715_v58 = vshrl.u32 %v609_v54, 7 }
 0x157   : > { %2352 = vmatpush1.bf16.msra.mxu0 %v8368_v59  ;;  %v8461_v59 = vld [vmem:[%s9344_s16 + $0x7f0] ss:$24 sps:$4 sm:$0xff]  }
 0x158   : > { %2353 = vmatprep.subr.bf16.mxu0 %v8376_v60 }
 0x159   : > { %2395 = vmatpush1.bf16.msra.mxu1 %v8371_v61  ;;  %v8466_v61 = vld [vmem:[%s9344_s16 + $0x7c4] ss:$24 sps:$4 sm:$0xff]  }
 0x15a   : > { %2396 = vmatprep.subr.bf16.mxu1 %v8379_v62  ;;  %v611_v62 = vsub.s32 0, %v9715_v58 }
 0x15b   : > { %2354 = vmatpush2.bf16.msra.mxu0 %v8374_v63  ;;  %v9721_v63 = vld [vmem:[%s9351_s25] sm:$0x3f] }
 0x15c   : > { %2355 = vmatprep.subr.bf16.mxu0 %v8382_v0  ;;  %v615_v0 = vsub.s32 1, %v9715_v58 }
 0x15d   : > { %2397 = vmatpush2.bf16.msra.mxu1 %v8377_v1  ;;  %v8464_v1 = vld [vmem:[%s9344_s16 + $0x7c0] ss:$24 sps:$4 sm:$0xff]  }
 0x15e   : > { %2398 = vmatprep.subr.bf16.mxu1 %v8385_v2 }
 0x15f   : > { %2356 = vmatpush2.bf16.msra.mxu0 %v8380_v3 }
 0x160   : > { %2357 = vmatprep.subr.bf16.mxu0 %v8388_v4  ;;  %v8469_v4 = vld [vmem:[%s9344_s16 + $0x794] ss:$24 sps:$4 sm:$0xff]  }
 0x161   : > { %2399 = vmatpush2.bf16.msra.mxu1 %v8383_v5  ;;  %v612_v5 = vrot.slane %v9721_v63, %v611_v62 }
 0x162   : > { %2400 = vmatprep.subr.bf16.mxu1 %v8391_v6  ;;  %v616_v6 = vrot.slane %v9721_v63, %v615_v0 }
 0x163   : > { %2358 = vmatpush2.bf16.msra.mxu0 %v8386_v7  ;;  %v8467_v7 = vld [vmem:[%s9344_s16 + $0x790] ss:$24 sps:$4 sm:$0xff]  }
 0x164   : > { %2359 = vmatprep.subr.bf16.mxu0 %v8394_v8 }
 0x165   : > { %2401 = vmatpush2.bf16.msra.mxu1 %v8389_v9 }
 0x166   : > { %2402 = vmatprep.subr.bf16.mxu1 %v8397_v10 }
 0x167   : > { %2360 = vmatpush2.bf16.msra.mxu0 %v8392_v12 }
 0x168   : > { %2361 = vmatprep.subr.bf16.mxu0 %v8400_v13 }
 0x169   : > { %2403 = vmatpush2.bf16.msra.mxu1 %v8395_v15 }
 0x16a   : > { %2404 = vmatprep.subr.bf16.mxu1 %v8403_v16 }
 0x16b   : > { %2362 = vmatpush2.bf16.msra.mxu0 %v8398_v17 }
 0x16c   : > { %2363 = vmatprep.subr.bf16.mxu0 %v8406_v18 }
 0x16d   : > { %2405 = vmatpush2.bf16.msra.mxu1 %v8401_v19 }
 0x16e   : > { %2406 = vmatprep.subr.bf16.mxu1 %v8409_v20 }
 0x16f   : > { %2364 = vmatpush2.bf16.msra.mxu0 %v8404_v21 }
 0x170   : > { %2365 = vmatprep.subr.bf16.mxu0 %v8412_v23 }
 0x171   : > { %2407 = vmatpush2.bf16.msra.mxu1 %v8407_v24 }
 0x172   : > { %2408 = vmatprep.subr.bf16.mxu1 %v8415_v25 }
 0x173   : > { %2366 = vmatpush2.bf16.msra.mxu0 %v8410_v26 }
 0x174   : > { %2367 = vmatprep.subr.bf16.mxu0 %v8418_v27 }
 0x175   : > { %2409 = vmatpush2.bf16.msra.mxu1 %v8413_v28 }
 0x176   : > { %2410 = vmatprep.subr.bf16.mxu1 %v8421_v29 }
 0x177   : > { %2368 = vmatpush2.bf16.msra.mxu0 %v8416_v30 }
 0x178   : > { %2423 = vmatprep.subr.bf16.mxu0 %v8424_v31 }
 0x179   : > { %2411 = vmatpush2.bf16.msra.mxu1 %v8419_v32 }
 0x17a   : > { %2370 = vmatmul.mubr.bf16.vlgmr.msra.gmra.mxu0 %v9462_v11  ;;  %v8431_v11 = vld [vmem:[%s9344_s16 + $0x6d0] ss:$24 sps:$4 sm:$0xff]   ;;  %v2113_v60 = vpop.f32.mrf.mxu0 }
 0x17b   : > { %2424 = vmatpush1.bf16.msra.mxu0 %v8422_v33  ;;  %2455 = vmatprep.mubr.bf16.mxu0 %v9503_v43  ;;  %v8434_v43 = vld [vmem:[%s9344_s16 + $0x6a0] ss:$24 sps:$4 sm:$0xff]   ;;  %v2156_v3 = vpop.f32.mrf.mxu1  ;;  %v2114_v10 = vadd.f32 %v2113_v60, %v612_v5 }
 0x17c   : > { %2413 = vmatmul.mubr.bf16.vlgmr.msra.gmra.mxu1 %v9466_v14  ;;  %2425 = vmatprep.subr.bf16.mxu0 %v8427_v34  ;;  %v8439_v14 = vld [vmem:[%s9344_s16 + $0x674] ss:$24 sps:$4 sm:$0xff]   ;;  %v2115_v2 = vpop.f32.mrf.mxu0 }
 0x17d   : > { %v2158_v9 = vpop.f32.mrf.mxu1  ;;  %v2116_v12 = vadd.f32 %v2115_v2, %v616_v6  ;;  %v2157_v16 = vadd.f32 %v2156_v3, %v2114_v10 }
 0x17e   : > { %v2117_v8 = vpop.f32.mrf.mxu0 }
 0x17f   : > { %2426 = vmatpush1.bf16.msra.mxu0 %v8425_v35  ;;  %v2160_v15 = vpop.f32.mrf.mxu1  ;;  %v2118_v17 = vadd.f32 %v2117_v8, %v612_v5  ;;  %v2159_v19 = vadd.f32 %v2158_v9, %v2116_v12  ;;  %v627_v8 = vsub.s32 4, %v9715_v58  ;;  %v631_v9 = vsub.s32 5, %v9715_v58 }
 0x180   : > { %2427 = vmatprep.subr.bf16.mxu0 %v8430_v36  ;;  %v2119_v13 = vpop.f32.mrf.mxu0 }
 0x181   : > { %v2120_v20 = vadd.f32 %v2119_v13, %v616_v6  ;;  %v2162_v23 = vpop.f32.mrf.mxu1  ;;  %v2161_v25 = vadd.f32 %v2160_v15, %v2118_v17  ;;  %v628_v13 = vrot.slane %v9721_v63, %v627_v8  ;;  %v632_v15 = vrot.slane %v9721_v63, %v631_v9 }
 0x183   : > { %2428 = vmatpush1.bf16.msra.mxu0 %v8428_v37  ;;  %v2163_v28 = vadd.f32 %v2162_v23, %v2120_v20 }
 0x184   : > { %2429 = vmatprep.subr.bf16.mxu0 %v8433_v38  ;;  %v619_v38 = vsub.s32 2, %v9715_v58 }
 0x187   : > { %2430 = vmatpush1.bf16.msra.mxu0 %v8431_v11 }
 0x188   : > { %2431 = vmatprep.subr.bf16.mxu0 %v8436_v49  ;;  %v623_v49 = vsub.s32 3, %v9715_v58 }
 0x18b   : > { %2432 = vmatpush1.bf16.msra.mxu0 %v8434_v43  ;;  %v620_v43 = vrot.slane %v9721_v63, %v619_v38 }
 0x18c   : > { %2433 = vmatprep.subr.bf16.mxu0 %v8439_v14 }
 0x18f   : > { %2434 = vmatpush1.bf16.msra.mxu0 %v8437_v39  ;;  %v624_v39 = vrot.slane %v9721_v63, %v623_v49 }
 0x190   : > { %2435 = vmatprep.subr.bf16.mxu0 %v8442_v40 }
 0x193   : > { %2436 = vmatpush1.bf16.msra.mxu0 %v8440_v41 }
 0x194   : > { %2437 = vmatprep.subr.bf16.mxu0 %v8445_v55 }
 0x197   : > { %2438 = vmatpush1.bf16.msra.mxu0 %v8443_v42 }
 0x198   : > { %2439 = vmatprep.subr.bf16.mxu0 %v8448_v44 }
 0x19b   : > { %2440 = vmatpush2.bf16.msra.mxu0 %v8446_v45 }
 0x19c   : > { %2441 = vmatprep.subr.bf16.mxu0 %v8451_v46 }
 0x19f   : > { %2442 = vmatpush2.bf16.msra.mxu0 %v8449_v47 }
 0x1a0   : > { %2443 = vmatprep.subr.bf16.mxu0 %v8454_v48 }
 0x1a3   : > { %2444 = vmatpush2.bf16.msra.mxu0 %v8452_v50 }
 0x1a4   : > { %2445 = vmatprep.subr.bf16.mxu0 %v8457_v51 }
 0x1a7   : > { %2446 = vmatpush2.bf16.msra.mxu0 %v8455_v52 }
 0x1a8   : > { %2447 = vmatprep.subr.bf16.mxu0 %v8460_v53 }
 0x1ab   : > { %2448 = vmatpush2.bf16.msra.mxu0 %v8458_v56 }
 0x1ac   : > { %2449 = vmatprep.subr.bf16.mxu0 %v8463_v57 }
 0x1af   : > { %2450 = vmatpush2.bf16.msra.mxu0 %v8461_v59 }
 0x1b0   : > { %2451 = vmatprep.subr.bf16.mxu0 %v8466_v61 }
 0x1b3   : > { %2452 = vmatpush2.bf16.msra.mxu0 %v8464_v1 }
 0x1b4   : > { %2453 = vmatprep.subr.bf16.mxu0 %v8469_v4 }
 0x1b7   : > { %2454 = vmatpush2.bf16.msra.mxu0 %v8467_v7 }
 0x1ba   : > { %v2199_v18 = vpop.f32.mrf.mxu0  ;;  %2456 = vmatmul.mubr.bf16.vlgmr.msra.gmra.mxu0 %v9548_v22 }
 0x1bb   : > { %v2200_v21 = vadd.f32 %v2199_v18, %v2157_v16 }
 0x1bc   : > { %v2201_v24 = vpop.f32.mrf.mxu0  ;;  %v2242_v22 = vpop.f32.mrf.mxu1 }
 0x1bd   : > { %v2202_v26 = vadd.f32 %v2201_v24, %v2159_v19  ;;  %v2466_v29 = vmax.f32 %v2200_v21, 0.0  ;;  %v2243_v40 = vadd.f32 %v2242_v22, %v620_v43 }
 0x1be   : > { %v2203_v27 = vpop.f32.mrf.mxu0  ;;  %v2244_v11 = vpop.f32.mrf.mxu1 }
 0x1bf   : > { %v2467_v30 = vmax.f32 %v2202_v26, 0.0  ;;  %v2204_v31 = vadd.f32 %v2203_v27, %v2161_v25  ;;  %v2245_v55 = vadd.f32 %v2244_v11, %v624_v39 }
 0x1c0   : > { %v2205_v32 = vpop.f32.mrf.mxu0  ;;  %v2246_v14 = vpop.f32.mrf.mxu1 }
 0x1c1   : > { %v7748_v33 = vpack.c.bf16 %v2467_v30, %v2466_v29  ;;  %v2206_v34 = vadd.f32 %v2205_v32, %v2163_v28  ;;  %v2472_v35 = vmax.f32 %v2204_v31, 0.0  ;;  %v2247_v47 = vadd.f32 %v2246_v14, %v620_v43 }
 0x1c2   : > { %v2248_v41 = vpop.f32.mrf.mxu1 }
 0x1c3   : > { %2514 = vst [vmem:[#allocation2 + $0x28] sm:$0xff] %v7748_v33  ;;  %v2473_v36 = vmax.f32 %v2206_v34, 0.0  ;;  %v2249_v53 = vadd.f32 %v2248_v41, %v624_v39 }
 0x1c5   : > { %v7751_v37 = vpack.c.bf16 %v2473_v36, %v2472_v35 }
 0x1c7   : > { %2517 = vst [vmem:[#allocation2] sm:$0xff] %v7751_v37 }
 0x1fa   : > { %v2285_v42 = vpop.f32.mrf.mxu0 }
 0x1fb   : > { %v2286_v44 = vadd.f32 %v2285_v42, %v2243_v40 }
 0x1fc   : > { %v2287_v45 = vpop.f32.mrf.mxu0  ;;  %v2328_v46 = vpop.f32.mrf.mxu1 }
 0x1fd   : > { %v2288_v48 = vadd.f32 %v2287_v45, %v2245_v55  ;;  %v2329_v50 = vadd.f32 %v2328_v46, %v2286_v44 }
 0x1fe   : > { %v2289_v51 = vpop.f32.mrf.mxu0  ;;  %v2330_v52 = vpop.f32.mrf.mxu1 }
 0x1ff   : > { %v2468_v54 = vmax.f32 %v2329_v50, 0.0  ;;  %v2290_v56 = vadd.f32 %v2289_v51, %v2247_v47  ;;  %v2331_v57 = vadd.f32 %v2330_v52, %v2288_v48 }
 0x200   : > { %v2291_v59 = vpop.f32.mrf.mxu0  ;;  %v2332_v60 = vpop.f32.mrf.mxu1 }
 0x201   : > { %v2469_v61 = vmax.f32 %v2331_v57, 0.0  ;;  %v2292_v62 = vadd.f32 %v2291_v59, %v2249_v53  ;;  %v2333_v0 = vadd.f32 %v2332_v60, %v2290_v56 }
 0x202   : > { %v2334_v1 = vpop.f32.mrf.mxu1 }
 0x203   : > { %v7749_v2 = vpack.c.bf16 %v2469_v61, %v2468_v54  ;;  %v2335_v3 = vadd.f32 %v2334_v1, %v2292_v62  ;;  %v2474_v4 = vmax.f32 %v2333_v0, 0.0 }
 0x205   : > { %2515 = vst [vmem:[#allocation2 + $0x10] sm:$0xff] %v7749_v2  ;;  %v2475_v5 = vmax.f32 %v2335_v3, 0.0 }
 0x207   : > { %v7752_v6 = vpack.c.bf16 %v2475_v5, %v2474_v4 }
 0x209   : > { %2518 = vst [vmem:[#allocation2 + $0x18] sm:$0xff] %v7752_v6 }
 0x23a   : > { %v2371_v7 = vpop.f32.mrf.mxu0 }
 0x23b   : > { %v2372_v18 = vadd.f32 %v2371_v7, %v628_v13 }
 0x23c   : > { %v2373_v10 = vpop.f32.mrf.mxu0  ;;  %v2414_v12 = vpop.f32.mrf.mxu1 }
 0x23d   : > { %v2374_v19 = vadd.f32 %v2373_v10, %v632_v15  ;;  %v2415_v23 = vadd.f32 %v2414_v12, %v2372_v18 }
 0x23e   : > { %v2375_v16 = vpop.f32.mrf.mxu0  ;;  %v2416_v17 = vpop.f32.mrf.mxu1 }
 0x23f   : > { %v2376_v24 = vadd.f32 %v2375_v16, %v628_v13  ;;  %v2417_v26 = vadd.f32 %v2416_v17, %v2374_v19 }
 0x240   : > { %v2377_v20 = vpop.f32.mrf.mxu0  ;;  %v2418_v21 = vpop.f32.mrf.mxu1 }
 0x241   : > { %v2378_v27 = vadd.f32 %v2377_v20, %v632_v15  ;;  %v2419_v30 = vadd.f32 %v2418_v21, %v2376_v24 }
 0x242   : > { %v2420_v29 = vpop.f32.mrf.mxu1 }
 0x243   : > { %v2421_v33 = vadd.f32 %v2420_v29, %v2378_v27 }
 0x27a   : > { %v2457_v25 = vpop.f32.mrf.mxu0 }
 0x27b   : > { %v2458_v28 = vadd.f32 %v2457_v25, %v2415_v23 }
 0x27c   : > { %v2459_v58 = vpop.f32.mrf.mxu0 }
 0x27d   : > { %v2460_v31 = vadd.f32 %v2459_v58, %v2417_v26  ;;  %v2470_v34 = vmax.f32 %v2458_v28, 0.0 }
 0x27e   : > { %v2461_v32 = vpop.f32.mrf.mxu0 }
 0x27f   : > { %v2471_v63 = vmax.f32 %v2460_v31, 0.0  ;;  %v2462_v35 = vadd.f32 %v2461_v32, %v2419_v30 }
 0x280   : > { %v2463_v36 = vpop.f32.mrf.mxu0 }
 0x281   : > { %v7750_v37 = vpack.c.bf16 %v2471_v63, %v2470_v34  ;;  %v2464_v22 = vadd.f32 %v2463_v36, %v2421_v33  ;;  %v2476_v38 = vmax.f32 %v2462_v35, 0.0 }
 0x283   : > { %2516 = vst [vmem:[#allocation2 + $0x8] sm:$0xff] %v7750_v37  ;;  %v2477_v11 = vmax.f32 %v2464_v22, 0.0 }
 0x285   : > { %v7753_v49 = vpack.c.bf16 %v2477_v11, %v2476_v38 }
 0x287   : > { %2519 = vst [vmem:[#allocation2 + $0x20] sm:$0xff] %v7753_v49 }
 0x288 PF: > { %p7090_p3 = scmp.le.s32.totalorder %s9216_s22, 0 }
 0x289   : > { %s7385_s7 = sadd.s32 (!%p7090_p3), 4294967295, %s9216_s22 }
 0x28a   : > { %2523 = sbr.rel (%p7090_p3) target bundleno = 1178 (0x49a), region = 64  ;;  %s7386_s8 = sshll.u32 (!%p7090_p3), %s7385_s7, 4 }
 0x28b   : > { %s4709_s29 = sshra.s32 (!%p7090_p3), %s7386_s8, 3 }
 0x28f   : > { %v8470_v43 = vld [vmem:[%s9344_s16 + $0x154] ss:$24 sps:$4 sm:$0xff]   ;;  %v8472_v14 = vld [vmem:[%s9344_s16 + $0x150] ss:$24 sps:$4 sm:$0xff]   ;;  %v8476_v41 = vld [vmem:[%s9344_s16 + $0x124] ss:$24 sps:$4 sm:$0xff]  }
 0x290   : > { %4320 = vmatprep.subr.bf16.mxu0 %v8470_v43  ;;  %v8473_v39 = vld [vmem:[%s9344_s16 + $0x454] ss:$24 sps:$4 sm:$0xff]   ;;  %v8475_v40 = vld [vmem:[%s9344_s16 + $0x450] ss:$24 sps:$4 sm:$0xff]   ;;  %v8478_v55 = vld [vmem:[%s9344_s16 + $0x120] ss:$24 sps:$4 sm:$0xff]  }
 0x291   : > { %4321 = vmatpush1.bf16.msra.mxu0 %v8472_v14  ;;  %4363 = vmatprep.subr.bf16.mxu1 %v8473_v39  ;;  %v8479_v42 = vld [vmem:[%s9344_s16 + $0x424] ss:$24 sps:$4 sm:$0xff]   ;;  %v8481_v44 = vld [vmem:[%s9344_s16 + $0x420] ss:$24 sps:$4 sm:$0xff]   ;;  %v8482_v45 = vld [vmem:[%s9344_s16 + $0xf4] ss:$24 sps:$4 sm:$0xff]  }
 0x292   : > { %4364 = vmatpush1.bf16.msra.mxu1 %v8475_v40  ;;  %4322 = vmatprep.subr.bf16.mxu0 %v8476_v41  ;;  %v8484_v46 = vld [vmem:[%s9344_s16 + $0xf0] ss:$24 sps:$4 sm:$0xff]   ;;  %v8485_v47 = vld [vmem:[%s9344_s16 + $0x3f4] ss:$24 sps:$4 sm:$0xff]   ;;  %v8488_v48 = vld [vmem:[%s9344_s16 + $0xc4] ss:$24 sps:$4 sm:$0xff]  }
 0x293   : > { %4365 = vmatprep.subr.bf16.mxu1 %v8479_v42  ;;  %v8487_v50 = vld [vmem:[%s9344_s16 + $0x3f0] ss:$24 sps:$4 sm:$0xff]   ;;  %v8491_v51 = vld [vmem:[%s9344_s16 + $0x3c4] ss:$24 sps:$4 sm:$0xff]   ;;  %v8490_v52 = vld [vmem:[%s9344_s16 + $0xc0] ss:$24 sps:$4 sm:$0xff]  }
 0x294   : > { %v8494_v53 = vld [vmem:[%s9344_s16 + $0x94] ss:$24 sps:$4 sm:$0xff]   ;;  %v8493_v54 = vld [vmem:[%s9344_s16 + $0x3c0] ss:$24 sps:$4 sm:$0xff]   ;;  %v8496_v57 = vld [vmem:[%s9344_s16 + $0x90] ss:$24 sps:$4 sm:$0xff]  }
 0x295   : > { %4323 = vmatpush1.bf16.msra.mxu0 %v8478_v55  ;;  %v8497_v56 = vld [vmem:[%s9344_s16 + $0x394] ss:$24 sps:$4 sm:$0xff]   ;;  %v8500_v59 = vld [vmem:[%s9344_s16 + $0x64] ss:$24 sps:$4 sm:$0xff]   ;;  %v8499_v60 = vld [vmem:[%s9344_s16 + $0x390] ss:$24 sps:$4 sm:$0xff]  }
 0x296   : > { %4324 = vmatprep.subr.bf16.mxu0 %v8482_v45  ;;  %4366 = vmatpush1.bf16.msra.mxu1 %v8481_v44  ;;  %v8503_v61 = vld [vmem:[%s9344_s16 + $0x364] ss:$24 sps:$4 sm:$0xff]   ;;  %v8502_v62 = vld [vmem:[%s9344_s16 + $0x60] ss:$24 sps:$4 sm:$0xff]   ;;  %v8506_v0 = vld [vmem:[%s9344_s16 + $0x34] ss:$24 sps:$4 sm:$0xff]  }
 0x297   : > { %4367 = vmatprep.subr.bf16.mxu1 %v8485_v47  ;;  %v8505_v1 = vld [vmem:[%s9344_s16 + $0x360] ss:$24 sps:$4 sm:$0xff]   ;;  %v8509_v2 = vld [vmem:[%s9344_s16 + $0x334] ss:$24 sps:$4 sm:$0xff]   ;;  %v8508_v3 = vld [vmem:[%s9344_s16 + $0x30] ss:$24 sps:$4 sm:$0xff]  }
 0x298   : > { %v8512_v4 = vld [vmem:[%s9344_s16 + $0x4] ss:$24 sps:$4 sm:$0xff]   ;;  %v8511_v5 = vld [vmem:[%s9344_s16 + $0x330] ss:$24 sps:$4 sm:$0xff]   ;;  %v8514_v7 = vld [vmem:[%s9344_s16] ss:$24 sps:$4 sm:$0xff]  }
 0x299   : > { %4325 = vmatpush1.bf16.msra.mxu0 %v8484_v46  ;;  %v8515_v6 = vld [vmem:[%s9344_s16 + $0x304] ss:$24 sps:$4 sm:$0xff]   ;;  %v8518_v8 = vld [vmem:[%s9344_s16 + $0x2d4] ss:$24 sps:$4 sm:$0xff]   ;;  %v8517_v9 = vld [vmem:[%s9344_s16 + $0x300] ss:$24 sps:$4 sm:$0xff]  }
 0x29a   : > { %4326 = vmatprep.subr.bf16.mxu0 %v8488_v48  ;;  %4368 = vmatpush1.bf16.msra.mxu1 %v8487_v50  ;;  %v8521_v10 = vld [vmem:[%s9344_s16 + $0x5d4] ss:$24 sps:$4 sm:$0xff]   ;;  %v8520_v12 = vld [vmem:[%s9344_s16 + $0x2d0] ss:$24 sps:$4 sm:$0xff]   ;;  %v8524_v13 = vld [vmem:[%s9344_s16 + $0x2a4] ss:$24 sps:$4 sm:$0xff]  }
 0x29b   : > { %4369 = vmatprep.subr.bf16.mxu1 %v8491_v51  ;;  %v8523_v15 = vld [vmem:[%s9344_s16 + $0x5d0] ss:$24 sps:$4 sm:$0xff]   ;;  %v8527_v16 = vld [vmem:[%s9344_s16 + $0x5a4] ss:$24 sps:$4 sm:$0xff]   ;;  %v8526_v17 = vld [vmem:[%s9344_s16 + $0x2a0] ss:$24 sps:$4 sm:$0xff]  }
 0x29c   : > { %v8530_v18 = vld [vmem:[%s9344_s16 + $0x274] ss:$24 sps:$4 sm:$0xff]   ;;  %v8529_v19 = vld [vmem:[%s9344_s16 + $0x5a0] ss:$24 sps:$4 sm:$0xff]   ;;  %v8532_v21 = vld [vmem:[%s9344_s16 + $0x270] ss:$24 sps:$4 sm:$0xff]  }
 0x29d   : > { %4327 = vmatpush1.bf16.msra.mxu0 %v8490_v52  ;;  %v8533_v20 = vld [vmem:[%s9344_s16 + $0x574] ss:$24 sps:$4 sm:$0xff]   ;;  %v8536_v23 = vld [vmem:[%s9344_s16 + $0x244] ss:$24 sps:$4 sm:$0xff]   ;;  %v8535_v24 = vld [vmem:[%s9344_s16 + $0x570] ss:$24 sps:$4 sm:$0xff]  }
 0x29e   : > { %4328 = vmatprep.subr.bf16.mxu0 %v8494_v53  ;;  %4370 = vmatpush1.bf16.msra.mxu1 %v8493_v54  ;;  %v8539_v25 = vld [vmem:[%s9344_s16 + $0x544] ss:$24 sps:$4 sm:$0xff]   ;;  %v8538_v26 = vld [vmem:[%s9344_s16 + $0x240] ss:$24 sps:$4 sm:$0xff]   ;;  %v8542_v28 = vld [vmem:[%s9344_s16 + $0x214] ss:$24 sps:$4 sm:$0xff]  }
 0x29f   : > { %4371 = vmatprep.subr.bf16.mxu1 %v8497_v56  ;;  %v8565_v27 = vld [vmem:[#allocation2 + $0x2c] ss:$-40 sps:$4 sm:$0xff]   ;;  %v8541_v29 = vld [vmem:[%s9344_s16 + $0x540] ss:$24 sps:$4 sm:$0xff]   ;;  %v9789_v30 = vld [vmem:[#allocation2 + $0x14] ss:$8 sps:$4 sm:$0xff]  }
 0x2a0   : > { %4352 = vmatprep.mubr.bf16.mxu0 %v8565_v27  ;;  %v8545_v58 = vld [vmem:[%s9344_s16 + $0x514] ss:$24 sps:$4 sm:$0xff]   ;;  %v8544_v31 = vld [vmem:[%s9344_s16 + $0x210] ss:$24 sps:$4 sm:$0xff]   ;;  %v8548_v32 = vld [vmem:[%s9344_s16 + $0x1e4] ss:$24 sps:$4 sm:$0xff]   ;;  %4395 = vmatprep.mubr.bf16.mxu1 %v9789_v30 }
 0x2a1   : > { %4329 = vmatpush1.bf16.msra.mxu0 %v8496_v57  ;;  %v8547_v33 = vld [vmem:[%s9344_s16 + $0x510] ss:$24 sps:$4 sm:$0xff]   ;;  %v8551_v34 = vld [vmem:[%s9344_s16 + $0x4e4] ss:$24 sps:$4 sm:$0xff]   ;;  %v8550_v63 = vld [vmem:[%s9344_s16 + $0x1e0] ss:$24 sps:$4 sm:$0xff]  }
 0x2a2   : > { %4330 = vmatprep.subr.bf16.mxu0 %v8500_v59  ;;  %4372 = vmatpush1.bf16.msra.mxu1 %v8499_v60  ;;  %v8554_v35 = vld [vmem:[%s9344_s16 + $0x1b4] ss:$24 sps:$4 sm:$0xff]   ;;  %v8553_v36 = vld [vmem:[%s9344_s16 + $0x4e0] ss:$24 sps:$4 sm:$0xff]   ;;  %v8556_v22 = vld [vmem:[%s9344_s16 + $0x1b0] ss:$24 sps:$4 sm:$0xff]  }
 0x2a3   : > { %4373 = vmatprep.subr.bf16.mxu1 %v8503_v61  ;;  %v8557_v37 = vld [vmem:[%s9344_s16 + $0x4b4] ss:$24 sps:$4 sm:$0xff]   ;;  %v8560_v38 = vld [vmem:[%s9344_s16 + $0x184] ss:$24 sps:$4 sm:$0xff]   ;;  %v8559_v11 = vld [vmem:[%s9344_s16 + $0x4b0] ss:$24 sps:$4 sm:$0xff]  }
 0x2a4   : > { %v8563_v49 = vld [vmem:[%s9344_s16 + $0x484] ss:$24 sps:$4 sm:$0xff]   ;;  %v8562_v43 = vld [vmem:[%s9344_s16 + $0x180] ss:$24 sps:$4 sm:$0xff]   ;;  %v8571_v14 = vld [vmem:[%s9344_s16 + $0x754] ss:$24 sps:$4 sm:$0xff]  }
 0x2a5   : > { %4331 = vmatpush1.bf16.msra.mxu0 %v8502_v62  ;;  %v8567_v39 = vld [vmem:[%s9344_s16 + $0x480] ss:$24 sps:$4 sm:$0xff]   ;;  %v8577_v41 = vld [vmem:[%s9344_s16 + $0x15c] ss:$24 sps:$4 sm:$0xff]   ;;  %v8569_v55 = vld [vmem:[%s9344_s16 + $0x750] ss:$24 sps:$4 sm:$0xff]  }
 0x2a6   : > { %4332 = vmatprep.subr.bf16.mxu0 %v8506_v0  ;;  %4374 = vmatpush1.bf16.msra.mxu1 %v8505_v1  ;;  %v9807_v40 = vld [vmem:[#allocation2 + $0x28] ss:$-40 sps:$4 sm:$0xff]   ;;  %v9811_v42 = vld [vmem:[#allocation2 + $0x10] ss:$8 sps:$4 sm:$0xff]   ;;  %v8580_v44 = vld [vmem:[%s9344_s16 + $0x724] ss:$24 sps:$4 sm:$0xff]  }
 0x2a7   : > { %4375 = vmatprep.subr.bf16.mxu1 %v8509_v2  ;;  %v8575_v45 = vld [vmem:[%s9344_s16 + $0x158] ss:$24 sps:$4 sm:$0xff]   ;;  %v8583_v46 = vld [vmem:[%s9344_s16 + $0x12c] ss:$24 sps:$4 sm:$0xff]   ;;  %v8581_v50 = vld [vmem:[%s9344_s16 + $0x128] ss:$24 sps:$4 sm:$0xff]  }
 0x2a8   : > { %v8578_v47 = vld [vmem:[%s9344_s16 + $0x720] ss:$24 sps:$4 sm:$0xff]   ;;  %v8586_v48 = vld [vmem:[%s9344_s16 + $0x6f4] ss:$24 sps:$4 sm:$0xff]   ;;  %v8584_v52 = vld [vmem:[%s9344_s16 + $0x6f0] ss:$24 sps:$4 sm:$0xff]  }
 0x2a9   : > { %4333 = vmatpush1.bf16.msra.mxu0 %v8508_v3  ;;  %v8589_v51 = vld [vmem:[%s9344_s16 + $0xfc] ss:$24 sps:$4 sm:$0xff]   ;;  %v8587_v54 = vld [vmem:[%s9344_s16 + $0xf8] ss:$24 sps:$4 sm:$0xff]   ;;  %v8595_v56 = vld [vmem:[%s9344_s16 + $0xcc] ss:$24 sps:$4 sm:$0xff]  }
 0x2aa   : > { %4334 = vmatprep.subr.bf16.mxu0 %v8512_v4  ;;  %4376 = vmatpush1.bf16.msra.mxu1 %v8511_v5  ;;  %v8592_v53 = vld [vmem:[%s9344_s16 + $0x6c4] ss:$24 sps:$4 sm:$0xff]   ;;  %v8590_v57 = vld [vmem:[%s9344_s16 + $0x6c0] ss:$24 sps:$4 sm:$0xff]   ;;  %v8598_v59 = vld [vmem:[%s9344_s16 + $0x694] ss:$24 sps:$4 sm:$0xff]  }
 0x2ab   : > { %4377 = vmatprep.subr.bf16.mxu1 %v8515_v6  ;;  %v8593_v60 = vld [vmem:[%s9344_s16 + $0xc8] ss:$24 sps:$4 sm:$0xff]   ;;  %v8601_v61 = vld [vmem:[%s9344_s16 + $0x9c] ss:$24 sps:$4 sm:$0xff]   ;;  %v8599_v1 = vld [vmem:[%s9344_s16 + $0x98] ss:$24 sps:$4 sm:$0xff]  }
 0x2ac   : > { %v8596_v62 = vld [vmem:[%s9344_s16 + $0x690] ss:$24 sps:$4 sm:$0xff]   ;;  %v8604_v0 = vld [vmem:[%s9344_s16 + $0x664] ss:$24 sps:$4 sm:$0xff]   ;;  %v8602_v3 = vld [vmem:[%s9344_s16 + $0x660] ss:$24 sps:$4 sm:$0xff]  }
 0x2ad   : > { %4335 = vmatpush1.bf16.msra.mxu0 %v8514_v7  ;;  %v8607_v2 = vld [vmem:[%s9344_s16 + $0x6c] ss:$24 sps:$4 sm:$0xff]   ;;  %v8605_v5 = vld [vmem:[%s9344_s16 + $0x68] ss:$24 sps:$4 sm:$0xff]   ;;  %v8613_v6 = vld [vmem:[%s9344_s16 + $0x3c] ss:$24 sps:$4 sm:$0xff]  }
 0x2ae   : > { %4336 = vmatprep.subr.bf16.mxu0 %v8518_v8  ;;  %4378 = vmatpush1.bf16.msra.mxu1 %v8517_v9  ;;  %v8610_v4 = vld [vmem:[%s9344_s16 + $0x634] ss:$24 sps:$4 sm:$0xff]   ;;  %v8608_v7 = vld [vmem:[%s9344_s16 + $0x630] ss:$24 sps:$4 sm:$0xff]   ;;  %v8616_v9 = vld [vmem:[%s9344_s16 + $0x604] ss:$24 sps:$4 sm:$0xff]  }
 0x2af   : > { %4379 = vmatprep.subr.bf16.mxu1 %v8521_v10  ;;  %v8611_v8 = vld [vmem:[%s9344_s16 + $0x38] ss:$24 sps:$4 sm:$0xff]   ;;  %v9841_v10 = vld [vmem:[#allocation2 + $0xc] ss:$24 sps:$4 sm:$0xff]  }
 0x2b1   : > { %4337 = vmatpush2.bf16.msra.mxu0 %v8520_v12  ;;  %v8619_v12 = vld [vmem:[%s9344_s16 + $0xc] ss:$24 sps:$4 sm:$0xff]  }
 0x2b2   : > { %4338 = vmatprep.subr.bf16.mxu0 %v8524_v13  ;;  %4380 = vmatpush2.bf16.msra.mxu1 %v8523_v15  ;;  %v8614_v13 = vld [vmem:[%s9344_s16 + $0x600] ss:$24 sps:$4 sm:$0xff]   ;;  %v8622_v15 = vld [vmem:[%s9344_s16 + $0x8d4] ss:$24 sps:$4 sm:$0xff]  }
 0x2b3   : > { %4381 = vmatprep.subr.bf16.mxu1 %v8527_v16  ;;  %v8617_v16 = vld [vmem:[%s9344_s16 + $0x8] ss:$24 sps:$4 sm:$0xff]  }
 0x2b5   : > { %4339 = vmatpush2.bf16.msra.mxu0 %v8526_v17  ;;  %v8625_v17 = vld [vmem:[%s9344_s16 + $0x2dc] ss:$24 sps:$4 sm:$0xff]  }
 0x2b6   : > { %4340 = vmatprep.subr.bf16.mxu0 %v8530_v18  ;;  %4382 = vmatpush2.bf16.msra.mxu1 %v8529_v19  ;;  %v8620_v18 = vld [vmem:[%s9344_s16 + $0x8d0] ss:$24 sps:$4 sm:$0xff]   ;;  %v8628_v19 = vld [vmem:[%s9344_s16 + $0x8a4] ss:$24 sps:$4 sm:$0xff]  }
 0x2b7   : > { %4383 = vmatprep.subr.bf16.mxu1 %v8533_v20  ;;  %v8623_v20 = vld [vmem:[%s9344_s16 + $0x2d8] ss:$24 sps:$4 sm:$0xff]  }
 0x2b9   : > { %4341 = vmatpush2.bf16.msra.mxu0 %v8532_v21  ;;  %v8631_v21 = vld [vmem:[%s9344_s16 + $0x2ac] ss:$24 sps:$4 sm:$0xff]  }
 0x2ba   : > { %4342 = vmatprep.subr.bf16.mxu0 %v8536_v23  ;;  %4384 = vmatpush2.bf16.msra.mxu1 %v8535_v24  ;;  %v8626_v23 = vld [vmem:[%s9344_s16 + $0x8a0] ss:$24 sps:$4 sm:$0xff]   ;;  %v8634_v24 = vld [vmem:[%s9344_s16 + $0x874] ss:$24 sps:$4 sm:$0xff]  }
 0x2bb   : > { %4385 = vmatprep.subr.bf16.mxu1 %v8539_v25  ;;  %v8629_v25 = vld [vmem:[%s9344_s16 + $0x2a8] ss:$24 sps:$4 sm:$0xff]  }
 0x2bd   : > { %4343 = vmatpush2.bf16.msra.mxu0 %v8538_v26  ;;  %v8637_v26 = vld [vmem:[%s9344_s16 + $0x27c] ss:$24 sps:$4 sm:$0xff]  }
 0x2be   : > { %4344 = vmatprep.subr.bf16.mxu0 %v8542_v28  ;;  %4386 = vmatpush2.bf16.msra.mxu1 %v8541_v29  ;;  %v8640_v28 = vld [vmem:[%s9344_s16 + $0x844] ss:$24 sps:$4 sm:$0xff]   ;;  %v8635_v29 = vld [vmem:[%s9344_s16 + $0x278] ss:$24 sps:$4 sm:$0xff]  }
 0x2bf   : > { %4387 = vmatprep.subr.bf16.mxu1 %v8545_v58  ;;  %v8643_v58 = vld [vmem:[%s9344_s16 + $0x24c] ss:$24 sps:$4 sm:$0xff]  }
 0x2c1   : > { %4345 = vmatpush2.bf16.msra.mxu0 %v8544_v31  ;;  %v8638_v31 = vld [vmem:[%s9344_s16 + $0x840] ss:$24 sps:$4 sm:$0xff]  }
 0x2c2   : > { %4346 = vmatprep.subr.bf16.mxu0 %v8548_v32  ;;  %4388 = vmatpush2.bf16.msra.mxu1 %v8547_v33  ;;  %v8646_v32 = vld [vmem:[%s9344_s16 + $0x814] ss:$24 sps:$4 sm:$0xff]   ;;  %v8641_v33 = vld [vmem:[%s9344_s16 + $0x248] ss:$24 sps:$4 sm:$0xff]  }
 0x2c3   : > { %4389 = vmatprep.subr.bf16.mxu1 %v8551_v34  ;;  %v8649_v34 = vld [vmem:[%s9344_s16 + $0x21c] ss:$24 sps:$4 sm:$0xff]  }
 0x2c5   : > { %4347 = vmatpush2.bf16.msra.mxu0 %v8550_v63  ;;  %v8644_v63 = vld [vmem:[%s9344_s16 + $0x810] ss:$24 sps:$4 sm:$0xff]  }
 0x2c6   : > { %4348 = vmatprep.subr.bf16.mxu0 %v8554_v35  ;;  %4390 = vmatpush2.bf16.msra.mxu1 %v8553_v36  ;;  %v8652_v35 = vld [vmem:[%s9344_s16 + $0x7e4] ss:$24 sps:$4 sm:$0xff]   ;;  %v8647_v36 = vld [vmem:[%s9344_s16 + $0x218] ss:$24 sps:$4 sm:$0xff]  }
 0x2c7   : > { %4391 = vmatprep.subr.bf16.mxu1 %v8557_v37  ;;  %v8655_v37 = vld [vmem:[%s9344_s16 + $0x1ec] ss:$24 sps:$4 sm:$0xff]  }
 0x2c9   : > { %4349 = vmatpush2.bf16.msra.mxu0 %v8556_v22  ;;  %v8650_v22 = vld [vmem:[%s9344_s16 + $0x7e0] ss:$24 sps:$4 sm:$0xff]  }
 0x2ca   : > { %4350 = vmatprep.subr.bf16.mxu0 %v8560_v38  ;;  %4392 = vmatpush2.bf16.msra.mxu1 %v8559_v11  ;;  %v8658_v38 = vld [vmem:[%s9344_s16 + $0x7b4] ss:$24 sps:$4 sm:$0xff]   ;;  %v8653_v11 = vld [vmem:[%s9344_s16 + $0x1e8] ss:$24 sps:$4 sm:$0xff]  }
 0x2cb   : > { %4393 = vmatprep.subr.bf16.mxu1 %v8563_v49  ;;  %v8661_v49 = vld [vmem:[%s9344_s16 + $0x1bc] ss:$24 sps:$4 sm:$0xff]  }
 0x2cd   : > { %4351 = vmatpush2.bf16.msra.mxu0 %v8562_v43  ;;  %v8656_v43 = vld [vmem:[%s9344_s16 + $0x7b0] ss:$24 sps:$4 sm:$0xff]  }
 0x2ce   : > { %4406 = vmatprep.subr.bf16.mxu0 %v8571_v14  ;;  %4394 = vmatpush2.bf16.msra.mxu1 %v8567_v39  ;;  %v8664_v14 = vld [vmem:[%s9344_s16 + $0x784] ss:$24 sps:$4 sm:$0xff]   ;;  %v8659_v39 = vld [vmem:[%s9344_s16 + $0x1b8] ss:$24 sps:$4 sm:$0xff]  }
 0x2cf   : > { %4449 = vmatprep.subr.bf16.mxu1 %v8577_v41  ;;  %v8667_v41 = vld [vmem:[%s9344_s16 + $0x18c] ss:$24 sps:$4 sm:$0xff]  }
 0x2d0   : > { %4353 = vmatmul.mubr.bf16.vlgmr.msra.gmra.mxu0 %v9807_v40 }
 0x2d1   : > { %4407 = vmatpush1.bf16.msra.mxu0 %v8569_v55  ;;  %4396 = vmatmul.mubr.bf16.vlgmr.msra.gmra.mxu1 %v9811_v42  ;;  %v8662_v55 = vld [vmem:[%s9344_s16 + $0x780] ss:$24 sps:$4 sm:$0xff]  }
 0x2d2   : > { %4408 = vmatprep.subr.bf16.mxu0 %v8580_v44  ;;  %4450 = vmatpush1.bf16.msra.mxu1 %v8575_v45  ;;  %v8673_v44 = vld [vmem:[%s9344_s16 + $0x45c] ss:$24 sps:$4 sm:$0xff]   ;;  %v8665_v45 = vld [vmem:[%s9344_s16 + $0x188] ss:$24 sps:$4 sm:$0xff]  }
 0x2d3   : > { %4481 = vmatprep.mubr.bf16.mxu1 %v8565_v27  ;;  %4451 = vmatprep.subr.bf16.mxu1 %v8583_v46  ;;  %v8632_v27 = vld [vmem:[%s9344_s16 + $0x870] ss:$24 sps:$4 sm:$0xff]  }
 0x2d4   : > { %4438 = vmatprep.mubr.bf16.mxu0 %v9841_v10  ;;  %v9880_v46 = vld [vmem:[#allocation2 + $0x8] ss:$24 sps:$4 sm:$0xff]  }
 0x2d5   : > { %4409 = vmatpush1.bf16.msra.mxu0 %v8578_v47  ;;  %v8676_v47 = vld [vmem:[%s9344_s16 + $0x75c] ss:$24 sps:$4 sm:$0xff]  }
 0x2d6   : > { %4410 = vmatprep.subr.bf16.mxu0 %v8586_v48  ;;  %4452 = vmatpush1.bf16.msra.mxu1 %v8581_v50  ;;  %v8671_v48 = vld [vmem:[%s9344_s16 + $0x458] ss:$24 sps:$4 sm:$0xff]   ;;  %v8679_v50 = vld [vmem:[%s9344_s16 + $0x42c] ss:$24 sps:$4 sm:$0xff]  }
 0x2d7   : > { %4453 = vmatprep.subr.bf16.mxu1 %v8589_v51  ;;  %v8674_v51 = vld [vmem:[%s9344_s16 + $0x758] ss:$24 sps:$4 sm:$0xff]  }
 0x2d9   : > { %4411 = vmatpush1.bf16.msra.mxu0 %v8584_v52  ;;  %v8682_v52 = vld [vmem:[%s9344_s16 + $0x72c] ss:$24 sps:$4 sm:$0xff]  }
 0x2da   : > { %4412 = vmatprep.subr.bf16.mxu0 %v8592_v53  ;;  %4454 = vmatpush1.bf16.msra.mxu1 %v8587_v54  ;;  %v8677_v53 = vld [vmem:[%s9344_s16 + $0x428] ss:$24 sps:$4 sm:$0xff]   ;;  %v8685_v54 = vld [vmem:[%s9344_s16 + $0x3fc] ss:$24 sps:$4 sm:$0xff]  }
 0x2db   : > { %4455 = vmatprep.subr.bf16.mxu1 %v8595_v56  ;;  %v8680_v56 = vld [vmem:[%s9344_s16 + $0x728] ss:$24 sps:$4 sm:$0xff]  }
 0x2dd   : > { %4413 = vmatpush1.bf16.msra.mxu0 %v8590_v57  ;;  %v8688_v57 = vld [vmem:[%s9344_s16 + $0x6fc] ss:$24 sps:$4 sm:$0xff]  }
 0x2de   : > { %4414 = vmatprep.subr.bf16.mxu0 %v8598_v59  ;;  %4456 = vmatpush1.bf16.msra.mxu1 %v8593_v60  ;;  %v8683_v59 = vld [vmem:[%s9344_s16 + $0x3f8] ss:$24 sps:$4 sm:$0xff]   ;;  %v8694_v60 = vld [vmem:[%s9344_s16 + $0x6cc] ss:$24 sps:$4 sm:$0xff]  }
 0x2df   : > { %4457 = vmatprep.subr.bf16.mxu1 %v8601_v61  ;;  %v8689_v61 = vld [vmem:[%s9344_s16 + $0x3c8] ss:$24 sps:$4 sm:$0xff]  }
 0x2e1   : > { %4415 = vmatpush1.bf16.msra.mxu0 %v8596_v62  ;;  %v8697_v62 = vld [vmem:[%s9344_s16 + $0x39c] ss:$24 sps:$4 sm:$0xff]  }
 0x2e2   : > { %4416 = vmatprep.subr.bf16.mxu0 %v8604_v0  ;;  %4458 = vmatpush1.bf16.msra.mxu1 %v8599_v1  ;;  %v8692_v0 = vld [vmem:[%s9344_s16 + $0x6c8] ss:$24 sps:$4 sm:$0xff]   ;;  %v8700_v1 = vld [vmem:[%s9344_s16 + $0x69c] ss:$24 sps:$4 sm:$0xff]  }
 0x2e3   : > { %4459 = vmatprep.subr.bf16.mxu1 %v8607_v2  ;;  %v8695_v2 = vld [vmem:[%s9344_s16 + $0x398] ss:$24 sps:$4 sm:$0xff]  }
 0x2e5   : > { %4417 = vmatpush1.bf16.msra.mxu0 %v8602_v3  ;;  %v8703_v3 = vld [vmem:[%s9344_s16 + $0x36c] ss:$24 sps:$4 sm:$0xff]  }
 0x2e6   : > { %4418 = vmatprep.subr.bf16.mxu0 %v8610_v4  ;;  %4460 = vmatpush1.bf16.msra.mxu1 %v8605_v5  ;;  %v8698_v4 = vld [vmem:[%s9344_s16 + $0x698] ss:$24 sps:$4 sm:$0xff]   ;;  %v8706_v5 = vld [vmem:[%s9344_s16 + $0x66c] ss:$24 sps:$4 sm:$0xff]  }
 0x2e7   : > { %4461 = vmatprep.subr.bf16.mxu1 %v8613_v6  ;;  %v8701_v6 = vld [vmem:[%s9344_s16 + $0x368] ss:$24 sps:$4 sm:$0xff]  }
 0x2e9   : > { %4419 = vmatpush1.bf16.msra.mxu0 %v8608_v7  ;;  %v8709_v7 = vld [vmem:[%s9344_s16 + $0x33c] ss:$24 sps:$4 sm:$0xff]  }
 0x2ea   : > { %4420 = vmatprep.subr.bf16.mxu0 %v8616_v9  ;;  %4462 = vmatpush1.bf16.msra.mxu1 %v8611_v8  ;;  %v8704_v8 = vld [vmem:[%s9344_s16 + $0x668] ss:$24 sps:$4 sm:$0xff]   ;;  %v8712_v9 = vld [vmem:[%s9344_s16 + $0x63c] ss:$24 sps:$4 sm:$0xff]  }
 0x2eb   : > { %4463 = vmatprep.subr.bf16.mxu1 %v8619_v12  ;;  %v8707_v12 = vld [vmem:[%s9344_s16 + $0x338] ss:$24 sps:$4 sm:$0xff]  }
 0x2ed   : > { %4421 = vmatpush1.bf16.msra.mxu0 %v8614_v13  ;;  %v8715_v13 = vld [vmem:[%s9344_s16 + $0x30c] ss:$24 sps:$4 sm:$0xff]  }
 0x2ee   : > { %4422 = vmatprep.subr.bf16.mxu0 %v8622_v15  ;;  %4464 = vmatpush1.bf16.msra.mxu1 %v8617_v16  ;;  %v8710_v15 = vld [vmem:[%s9344_s16 + $0x638] ss:$24 sps:$4 sm:$0xff]   ;;  %v8718_v16 = vld [vmem:[%s9344_s16 + $0x60c] ss:$24 sps:$4 sm:$0xff]  }
 0x2ef   : > { %4465 = vmatprep.subr.bf16.mxu1 %v8625_v17  ;;  %v8713_v17 = vld [vmem:[%s9344_s16 + $0x308] ss:$24 sps:$4 sm:$0xff]  }
 0x2f1   : > { %4423 = vmatpush2.bf16.msra.mxu0 %v8620_v18  ;;  %v8721_v18 = vld [vmem:[%s9344_s16 + $0x5dc] ss:$24 sps:$4 sm:$0xff]  }
 0x2f2   : > { %4424 = vmatprep.subr.bf16.mxu0 %v8628_v19  ;;  %4466 = vmatpush2.bf16.msra.mxu1 %v8623_v20  ;;  %v8716_v19 = vld [vmem:[%s9344_s16 + $0x608] ss:$24 sps:$4 sm:$0xff]   ;;  %v8724_v20 = vld [vmem:[%s9344_s16 + $0x8dc] ss:$24 sps:$4 sm:$0xff]  }
 0x2f3   : > { %4467 = vmatprep.subr.bf16.mxu1 %v8631_v21  ;;  %v8719_v21 = vld [vmem:[%s9344_s16 + $0x5d8] ss:$24 sps:$4 sm:$0xff]  }
 0x2f5   : > { %4425 = vmatpush2.bf16.msra.mxu0 %v8626_v23  ;;  %v8727_v23 = vld [vmem:[%s9344_s16 + $0x5ac] ss:$24 sps:$4 sm:$0xff]  }
 0x2f6   : > { %4426 = vmatprep.subr.bf16.mxu0 %v8634_v24  ;;  %4468 = vmatpush2.bf16.msra.mxu1 %v8629_v25  ;;  %v8722_v24 = vld [vmem:[%s9344_s16 + $0x8d8] ss:$24 sps:$4 sm:$0xff]   ;;  %v8730_v25 = vld [vmem:[%s9344_s16 + $0x8ac] ss:$24 sps:$4 sm:$0xff]  }
 0x2f7   : > { %4469 = vmatprep.subr.bf16.mxu1 %v8637_v26  ;;  %v8725_v26 = vld [vmem:[%s9344_s16 + $0x5a8] ss:$24 sps:$4 sm:$0xff]  }
 0x2f9   : > { %4427 = vmatpush2.bf16.msra.mxu0 %v8632_v27  ;;  %v8733_v27 = vld [vmem:[%s9344_s16 + $0x57c] ss:$24 sps:$4 sm:$0xff]  }
 0x2fa   : > { %4428 = vmatprep.subr.bf16.mxu0 %v8640_v28  ;;  %4470 = vmatpush2.bf16.msra.mxu1 %v8635_v29  ;;  %v8728_v28 = vld [vmem:[%s9344_s16 + $0x8a8] ss:$24 sps:$4 sm:$0xff]   ;;  %v8736_v29 = vld [vmem:[%s9344_s16 + $0x87c] ss:$24 sps:$4 sm:$0xff]  }
 0x2fb   : > { %4471 = vmatprep.subr.bf16.mxu1 %v8643_v58  ;;  %v8731_v58 = vld [vmem:[%s9344_s16 + $0x578] ss:$24 sps:$4 sm:$0xff]  }
 0x2fd   : > { %4429 = vmatpush2.bf16.msra.mxu0 %v8638_v31  ;;  %v8739_v31 = vld [vmem:[%s9344_s16 + $0x54c] ss:$24 sps:$4 sm:$0xff]  }
 0x2fe   : > { %4430 = vmatprep.subr.bf16.mxu0 %v8646_v32  ;;  %4472 = vmatpush2.bf16.msra.mxu1 %v8641_v33  ;;  %v8734_v32 = vld [vmem:[%s9344_s16 + $0x878] ss:$24 sps:$4 sm:$0xff]   ;;  %v8742_v33 = vld [vmem:[%s9344_s16 + $0x84c] ss:$24 sps:$4 sm:$0xff]  }
 0x2ff   : > { %4473 = vmatprep.subr.bf16.mxu1 %v8649_v34  ;;  %v8737_v34 = vld [vmem:[%s9344_s16 + $0x548] ss:$24 sps:$4 sm:$0xff]  }
 0x301   : > { %4431 = vmatpush2.bf16.msra.mxu0 %v8644_v63  ;;  %v8745_v63 = vld [vmem:[%s9344_s16 + $0x51c] ss:$24 sps:$4 sm:$0xff]  }
 0x302   : > { %4432 = vmatprep.subr.bf16.mxu0 %v8652_v35  ;;  %4474 = vmatpush2.bf16.msra.mxu1 %v8647_v36  ;;  %v8740_v35 = vld [vmem:[%s9344_s16 + $0x848] ss:$24 sps:$4 sm:$0xff]   ;;  %v8748_v36 = vld [vmem:[%s9344_s16 + $0x81c] ss:$24 sps:$4 sm:$0xff]  }
 0x303   : > { %4475 = vmatprep.subr.bf16.mxu1 %v8655_v37  ;;  %v8743_v37 = vld [vmem:[%s9344_s16 + $0x518] ss:$24 sps:$4 sm:$0xff]  }
 0x305   : > { %4433 = vmatpush2.bf16.msra.mxu0 %v8650_v22  ;;  %v8751_v22 = vld [vmem:[%s9344_s16 + $0x4ec] ss:$24 sps:$4 sm:$0xff]  }
 0x306   : > { %4434 = vmatprep.subr.bf16.mxu0 %v8658_v38  ;;  %4476 = vmatpush2.bf16.msra.mxu1 %v8653_v11  ;;  %v8746_v38 = vld [vmem:[%s9344_s16 + $0x818] ss:$24 sps:$4 sm:$0xff]   ;;  %v8754_v11 = vld [vmem:[%s9344_s16 + $0x7ec] ss:$24 sps:$4 sm:$0xff]  }
 0x307   : > { %4477 = vmatprep.subr.bf16.mxu1 %v8661_v49  ;;  %v8749_v49 = vld [vmem:[%s9344_s16 + $0x4e8] ss:$24 sps:$4 sm:$0xff]  }
 0x309   : > { %4435 = vmatpush2.bf16.msra.mxu0 %v8656_v43  ;;  %v8757_v43 = vld [vmem:[%s9344_s16 + $0x4bc] ss:$24 sps:$4 sm:$0xff]  }
 0x30a   : > { %4436 = vmatprep.subr.bf16.mxu0 %v8664_v14  ;;  %4478 = vmatpush2.bf16.msra.mxu1 %v8659_v39  ;;  %v8752_v14 = vld [vmem:[%s9344_s16 + $0x7e8] ss:$24 sps:$4 sm:$0xff]   ;;  %v8760_v39 = vld [vmem:[%s9344_s16 + $0x7bc] ss:$24 sps:$4 sm:$0xff]  }
 0x30b   : > { %4479 = vmatprep.subr.bf16.mxu1 %v8667_v41  ;;  %v8755_v41 = vld [vmem:[%s9344_s16 + $0x4b8] ss:$24 sps:$4 sm:$0xff]  }
 0x30d   : > { %4437 = vmatpush2.bf16.msra.mxu0 %v8662_v55  ;;  %v8763_v55 = vld [vmem:[%s9344_s16 + $0x48c] ss:$24 sps:$4 sm:$0xff]  }
 0x30e   : > { %4492 = vmatprep.subr.bf16.mxu0 %v8673_v44  ;;  %4480 = vmatpush2.bf16.msra.mxu1 %v8665_v45  ;;  %v8758_v44 = vld [vmem:[%s9344_s16 + $0x7b8] ss:$24 sps:$4 sm:$0xff]   ;;  %v8766_v45 = vld [vmem:[%s9344_s16 + $0x78c] ss:$24 sps:$4 sm:$0xff]  }
 0x30f   : > { %4535 = vmatprep.subr.bf16.mxu1 %v8676_v47  ;;  %v8761_v47 = vld [vmem:[%s9344_s16 + $0x488] ss:$24 sps:$4 sm:$0xff]  }
 0x310   : > { %4439 = vmatmul.mubr.bf16.vlgmr.msra.gmra.mxu0 %v9880_v46 }
 0x311   : > { %4493 = vmatpush1.bf16.msra.mxu0 %v8671_v48  ;;  %4524 = vmatprep.mubr.bf16.mxu0 %v9789_v30  ;;  %v8691_v30 = vld [vmem:[%s9344_s16 + $0x3cc] ss:$24 sps:$4 sm:$0xff]  }
 0x312   : > { %4482 = vmatmul.mubr.bf16.vlgmr.msra.gmra.mxu1 %v9807_v40  ;;  %4494 = vmatprep.subr.bf16.mxu0 %v8679_v50  ;;  %v8686_v40 = vld [vmem:[%s9344_s16 + $0x6f8] ss:$24 sps:$4 sm:$0xff]   ;;  %v8769_v48 = vld [vmem:[%s9344_s16 + $0x164] ss:$24 sps:$4 sm:$0xff]   ;;  %v8764_v50 = vld [vmem:[%s9344_s16 + $0x788] ss:$24 sps:$4 sm:$0xff]  }
 0x313   : > { %4536 = vmatpush1.bf16.msra.mxu1 %v8674_v51  ;;  %4567 = vmatprep.mubr.bf16.mxu1 %v9841_v10  ;;  %v8772_v51 = vld [vmem:[%s9344_s16 + $0x464] ss:$24 sps:$4 sm:$0xff]  }
 0x314   : > { %4537 = vmatprep.subr.bf16.mxu1 %v8682_v52  ;;  %v8767_v52 = vld [vmem:[%s9344_s16 + $0x160] ss:$24 sps:$4 sm:$0xff]  }
 0x315   : > { %4495 = vmatpush1.bf16.msra.mxu0 %v8677_v53  ;;  %v8775_v53 = vld [vmem:[%s9344_s16 + $0x134] ss:$24 sps:$4 sm:$0xff]  }
 0x316   : > { %4496 = vmatprep.subr.bf16.mxu0 %v8685_v54  ;;  %v8770_v54 = vld [vmem:[%s9344_s16 + $0x460] ss:$24 sps:$4 sm:$0xff]  }
 0x317   : > { %4538 = vmatpush1.bf16.msra.mxu1 %v8680_v56  ;;  %v8778_v56 = vld [vmem:[%s9344_s16 + $0x434] ss:$24 sps:$4 sm:$0xff]  }
 0x318   : > { %4539 = vmatprep.subr.bf16.mxu1 %v8688_v57  ;;  %v8773_v57 = vld [vmem:[%s9344_s16 + $0x130] ss:$24 sps:$4 sm:$0xff]  }
 0x319   : > { %4497 = vmatpush1.bf16.msra.mxu0 %v8683_v59  ;;  %v8911_v59 = vld [vmem:[#allocation2 + $0x2c] ss:$-40 sps:$4 sm:$0xff]  }
 0x31a   : > { %4498 = vmatprep.subr.bf16.mxu0 %v8691_v30  ;;  %v8781_v30 = vld [vmem:[%s9344_s16 + $0x104] ss:$24 sps:$4 sm:$0xff]  }
 0x31b   : > { %4540 = vmatpush1.bf16.msra.mxu1 %v8686_v40  ;;  %v8776_v40 = vld [vmem:[%s9344_s16 + $0x430] ss:$24 sps:$4 sm:$0xff]  }
 0x31c   : > { %4541 = vmatprep.subr.bf16.mxu1 %v8694_v60  ;;  %v8912_v60 = vld [vmem:[#allocation2 + $0x14] ss:$8 sps:$4 sm:$0xff]  }
 0x31d   : > { %4499 = vmatpush1.bf16.msra.mxu0 %v8689_v61  ;;  %v8779_v61 = vld [vmem:[%s9344_s16 + $0x100] ss:$24 sps:$4 sm:$0xff]  }
 0x31e   : > { %4500 = vmatprep.subr.bf16.mxu0 %v8697_v62  ;;  %v8787_v62 = vld [vmem:[%s9344_s16 + $0xd4] ss:$24 sps:$4 sm:$0xff]  }
 0x31f   : > { %4542 = vmatpush1.bf16.msra.mxu1 %v8692_v0  ;;  %v8782_v0 = vld [vmem:[%s9344_s16 + $0x400] ss:$24 sps:$4 sm:$0xff]  }
 0x320   : > { %4543 = vmatprep.subr.bf16.mxu1 %v8700_v1  ;;  %v8790_v1 = vld [vmem:[%s9344_s16 + $0x3d4] ss:$24 sps:$4 sm:$0xff]  }
 0x321   : > { %4501 = vmatpush1.bf16.msra.mxu0 %v8695_v2  ;;  %v8785_v2 = vld [vmem:[%s9344_s16 + $0xd0] ss:$24 sps:$4 sm:$0xff]  }
 0x322   : > { %4502 = vmatprep.subr.bf16.mxu0 %v8703_v3  ;;  %v8793_v3 = vld [vmem:[%s9344_s16 + $0xa4] ss:$24 sps:$4 sm:$0xff]  }
 0x323   : > { %4544 = vmatpush1.bf16.msra.mxu1 %v8698_v4  ;;  %v8788_v4 = vld [vmem:[%s9344_s16 + $0x3d0] ss:$24 sps:$4 sm:$0xff]  }
 0x324   : > { %4545 = vmatprep.subr.bf16.mxu1 %v8706_v5  ;;  %v8796_v5 = vld [vmem:[%s9344_s16 + $0x3a4] ss:$24 sps:$4 sm:$0xff]  }
 0x325   : > { %4503 = vmatpush1.bf16.msra.mxu0 %v8701_v6  ;;  %v8791_v6 = vld [vmem:[%s9344_s16 + $0xa0] ss:$24 sps:$4 sm:$0xff]  }
 0x326   : > { %4504 = vmatprep.subr.bf16.mxu0 %v8709_v7  ;;  %v8799_v7 = vld [vmem:[%s9344_s16 + $0x74] ss:$24 sps:$4 sm:$0xff]  }
 0x327   : > { %4546 = vmatpush1.bf16.msra.mxu1 %v8704_v8  ;;  %v8794_v8 = vld [vmem:[%s9344_s16 + $0x3a0] ss:$24 sps:$4 sm:$0xff]  }
 0x328   : > { %4547 = vmatprep.subr.bf16.mxu1 %v8712_v9  ;;  %v8802_v9 = vld [vmem:[%s9344_s16 + $0x374] ss:$24 sps:$4 sm:$0xff]  }
 0x329   : > { %4505 = vmatpush1.bf16.msra.mxu0 %v8707_v12  ;;  %v8797_v12 = vld [vmem:[%s9344_s16 + $0x70] ss:$24 sps:$4 sm:$0xff]  }
 0x32a   : > { %4506 = vmatprep.subr.bf16.mxu0 %v8715_v13  ;;  %v8805_v13 = vld [vmem:[%s9344_s16 + $0x44] ss:$24 sps:$4 sm:$0xff]  }
 0x32b   : > { %4548 = vmatpush1.bf16.msra.mxu1 %v8710_v15  ;;  %v8800_v15 = vld [vmem:[%s9344_s16 + $0x370] ss:$24 sps:$4 sm:$0xff]  }
 0x32c   : > { %4549 = vmatprep.subr.bf16.mxu1 %v8718_v16  ;;  %v8808_v16 = vld [vmem:[%s9344_s16 + $0x344] ss:$24 sps:$4 sm:$0xff]  }
 0x32d   : > { %4507 = vmatpush1.bf16.msra.mxu0 %v8713_v17  ;;  %v8803_v17 = vld [vmem:[%s9344_s16 + $0x40] ss:$24 sps:$4 sm:$0xff]  }
 0x32e   : > { %4508 = vmatprep.subr.bf16.mxu0 %v8721_v18  ;;  %v8811_v18 = vld [vmem:[%s9344_s16 + $0x14] ss:$24 sps:$4 sm:$0xff]  }
 0x32f   : > { %4550 = vmatpush1.bf16.msra.mxu1 %v8716_v19  ;;  %v8806_v19 = vld [vmem:[%s9344_s16 + $0x340] ss:$24 sps:$4 sm:$0xff]  }
 0x330   : > { %4551 = vmatprep.subr.bf16.mxu1 %v8724_v20  ;;  %v8814_v20 = vld [vmem:[%s9344_s16 + $0x314] ss:$24 sps:$4 sm:$0xff]  }
 0x331   : > { %4509 = vmatpush2.bf16.msra.mxu0 %v8719_v21  ;;  %v8809_v21 = vld [vmem:[%s9344_s16 + $0x10] ss:$24 sps:$4 sm:$0xff]  }
 0x332   : > { %4510 = vmatprep.subr.bf16.mxu0 %v8727_v23  ;;  %v8817_v23 = vld [vmem:[%s9344_s16 + $0x2e4] ss:$24 sps:$4 sm:$0xff]  }
 0x333   : > { %4552 = vmatpush2.bf16.msra.mxu1 %v8722_v24  ;;  %v8812_v24 = vld [vmem:[%s9344_s16 + $0x310] ss:$24 sps:$4 sm:$0xff]  }
 0x334   : > { %4553 = vmatprep.subr.bf16.mxu1 %v8730_v25  ;;  %v8820_v25 = vld [vmem:[%s9344_s16 + $0x5e4] ss:$24 sps:$4 sm:$0xff]  }
 0x335   : > { %4511 = vmatpush2.bf16.msra.mxu0 %v8725_v26  ;;  %v8815_v26 = vld [vmem:[%s9344_s16 + $0x2e0] ss:$24 sps:$4 sm:$0xff]  }
 0x336   : > { %4512 = vmatprep.subr.bf16.mxu0 %v8733_v27  ;;  %v8823_v27 = vld [vmem:[%s9344_s16 + $0x2b4] ss:$24 sps:$4 sm:$0xff]  }
 0x337   : > { %4554 = vmatpush2.bf16.msra.mxu1 %v8728_v28  ;;  %v8818_v28 = vld [vmem:[%s9344_s16 + $0x5e0] ss:$24 sps:$4 sm:$0xff]  }
 0x338   : > { %4555 = vmatprep.subr.bf16.mxu1 %v8736_v29  ;;  %v8826_v29 = vld [vmem:[%s9344_s16 + $0x5b4] ss:$24 sps:$4 sm:$0xff]  }
 0x339   : > { %4513 = vmatpush2.bf16.msra.mxu0 %v8731_v58  ;;  %v8821_v58 = vld [vmem:[%s9344_s16 + $0x2b0] ss:$24 sps:$4 sm:$0xff]  }
 0x33a   : > { %4514 = vmatprep.subr.bf16.mxu0 %v8739_v31  ;;  %v8829_v31 = vld [vmem:[%s9344_s16 + $0x284] ss:$24 sps:$4 sm:$0xff]  }
 0x33b   : > { %4556 = vmatpush2.bf16.msra.mxu1 %v8734_v32  ;;  %v8824_v32 = vld [vmem:[%s9344_s16 + $0x5b0] ss:$24 sps:$4 sm:$0xff]  }
 0x33c   : > { %4557 = vmatprep.subr.bf16.mxu1 %v8742_v33  ;;  %v8832_v33 = vld [vmem:[%s9344_s16 + $0x584] ss:$24 sps:$4 sm:$0xff]  }
 0x33d   : > { %4515 = vmatpush2.bf16.msra.mxu0 %v8737_v34  ;;  %v8827_v34 = vld [vmem:[%s9344_s16 + $0x280] ss:$24 sps:$4 sm:$0xff]  }
 0x33e   : > { %4516 = vmatprep.subr.bf16.mxu0 %v8745_v63  ;;  %v8835_v63 = vld [vmem:[%s9344_s16 + $0x254] ss:$24 sps:$4 sm:$0xff]  }
 0x33f   : > { %4558 = vmatpush2.bf16.msra.mxu1 %v8740_v35  ;;  %v8830_v35 = vld [vmem:[%s9344_s16 + $0x580] ss:$24 sps:$4 sm:$0xff]  }
 0x340   : > { %4559 = vmatprep.subr.bf16.mxu1 %v8748_v36  ;;  %v8838_v36 = vld [vmem:[%s9344_s16 + $0x554] ss:$24 sps:$4 sm:$0xff]  }
 0x341   : > { %4517 = vmatpush2.bf16.msra.mxu0 %v8743_v37  ;;  %v8833_v37 = vld [vmem:[%s9344_s16 + $0x250] ss:$24 sps:$4 sm:$0xff]  }
 0x342   : > { %4518 = vmatprep.subr.bf16.mxu0 %v8751_v22  ;;  %v8841_v22 = vld [vmem:[%s9344_s16 + $0x224] ss:$24 sps:$4 sm:$0xff]  }
 0x343   : > { %4560 = vmatpush2.bf16.msra.mxu1 %v8746_v38  ;;  %v8836_v38 = vld [vmem:[%s9344_s16 + $0x550] ss:$24 sps:$4 sm:$0xff]  }
 0x344   : > { %4561 = vmatprep.subr.bf16.mxu1 %v8754_v11  ;;  %v8844_v11 = vld [vmem:[%s9344_s16 + $0x524] ss:$24 sps:$4 sm:$0xff]  }
 0x345   : > { %4519 = vmatpush2.bf16.msra.mxu0 %v8749_v49  ;;  %v8839_v49 = vld [vmem:[%s9344_s16 + $0x220] ss:$24 sps:$4 sm:$0xff]  }
 0x346   : > { %4520 = vmatprep.subr.bf16.mxu0 %v8757_v43  ;;  %v8847_v43 = vld [vmem:[%s9344_s16 + $0x1f4] ss:$24 sps:$4 sm:$0xff]  }
 0x347   : > { %4562 = vmatpush2.bf16.msra.mxu1 %v8752_v14  ;;  %v8842_v14 = vld [vmem:[%s9344_s16 + $0x520] ss:$24 sps:$4 sm:$0xff]  }
 0x348   : > { %4563 = vmatprep.subr.bf16.mxu1 %v8760_v39  ;;  %v8850_v39 = vld [vmem:[%s9344_s16 + $0x4f4] ss:$24 sps:$4 sm:$0xff]  }
 0x349   : > { %4521 = vmatpush2.bf16.msra.mxu0 %v8755_v41  ;;  %v8845_v41 = vld [vmem:[%s9344_s16 + $0x1f0] ss:$24 sps:$4 sm:$0xff]  }
 0x34a   : > { %4522 = vmatprep.subr.bf16.mxu0 %v8763_v55  ;;  %v8853_v55 = vld [vmem:[%s9344_s16 + $0x1c4] ss:$24 sps:$4 sm:$0xff]  }
 0x34b   : > { %4564 = vmatpush2.bf16.msra.mxu1 %v8758_v44  ;;  %v8848_v44 = vld [vmem:[%s9344_s16 + $0x4f0] ss:$24 sps:$4 sm:$0xff]  }
 0x34c   : > { %4565 = vmatprep.subr.bf16.mxu1 %v8766_v45  ;;  %v8856_v45 = vld [vmem:[%s9344_s16 + $0x4c4] ss:$24 sps:$4 sm:$0xff]  }
 0x34d   : > { %4523 = vmatpush2.bf16.msra.mxu0 %v8761_v47  ;;  %v8851_v47 = vld [vmem:[%s9344_s16 + $0x1c0] ss:$24 sps:$4 sm:$0xff]  }
 0x34e   : > { %4578 = vmatprep.subr.bf16.mxu0 %v8769_v48  ;;  %v8859_v48 = vld [vmem:[%s9344_s16 + $0x194] ss:$24 sps:$4 sm:$0xff]  }
 0x34f   : > { %4566 = vmatpush2.bf16.msra.mxu1 %v8764_v50  ;;  %v8854_v50 = vld [vmem:[%s9344_s16 + $0x4c0] ss:$24 sps:$4 sm:$0xff]  }
 0x350   : > { %4525 = vmatmul.mubr.bf16.vlgmr.msra.gmra.mxu0 %v9811_v42  ;;  %4621 = vmatprep.subr.bf16.mxu1 %v8772_v51  ;;  %v8784_v42 = vld [vmem:[%s9344_s16 + $0x404] ss:$24 sps:$4 sm:$0xff]   ;;  %v8862_v51 = vld [vmem:[%s9344_s16 + $0x494] ss:$24 sps:$4 sm:$0xff]  }
 0x351   : > { %4579 = vmatpush1.bf16.msra.mxu0 %v8767_v52  ;;  %4610 = vmatprep.mubr.bf16.mxu0 %v8911_v59  ;;  %v8857_v52 = vld [vmem:[%s9344_s16 + $0x190] ss:$24 sps:$4 sm:$0xff]  }
 0x352   : > { %4568 = vmatmul.mubr.bf16.vlgmr.msra.gmra.mxu1 %v9880_v46  ;;  %4580 = vmatprep.subr.bf16.mxu0 %v8775_v53  ;;  %v8865_v53 = vld [vmem:[%s9344_s16 + $0x764] ss:$24 sps:$4 sm:$0xff]   ;;  %v8913_v59 = vld [vmem:[#allocation2 + $0x28] ss:$-40 sps:$4 sm:$0xff]  }
 0x353   : > { %4622 = vmatpush1.bf16.msra.mxu1 %v8770_v54  ;;  %4653 = vmatprep.mubr.bf16.mxu1 %v8912_v60  ;;  %v8860_v54 = vld [vmem:[%s9344_s16 + $0x490] ss:$24 sps:$4 sm:$0xff]   ;;  %v8871_v60 = vld [vmem:[%s9344_s16 + $0x704] ss:$24 sps:$4 sm:$0xff]  }
 0x354   : > { %4623 = vmatprep.subr.bf16.mxu1 %v8778_v56  ;;  %v8863_v56 = vld [vmem:[%s9344_s16 + $0x760] ss:$24 sps:$4 sm:$0xff]  }
 0x355   : > { %4581 = vmatpush1.bf16.msra.mxu0 %v8773_v57  ;;  %v8868_v57 = vld [vmem:[%s9344_s16 + $0x734] ss:$24 sps:$4 sm:$0xff]  }
 0x356   : > { %4582 = vmatprep.subr.bf16.mxu0 %v8781_v30  ;;  %v8866_v30 = vld [vmem:[%s9344_s16 + $0x730] ss:$24 sps:$4 sm:$0xff]  }
 0x357   : > { %4624 = vmatpush1.bf16.msra.mxu1 %v8776_v40  ;;  %v8914_v40 = vld [vmem:[#allocation2 + $0x10] ss:$8 sps:$4 sm:$0xff]  }
 0x358   : > { %4625 = vmatprep.subr.bf16.mxu1 %v8784_v42  ;;  %v8869_v42 = vld [vmem:[%s9344_s16 + $0x700] ss:$24 sps:$4 sm:$0xff]  }
 0x359   : > { %4583 = vmatpush1.bf16.msra.mxu0 %v8779_v61  ;;  %v8874_v61 = vld [vmem:[%s9344_s16 + $0x6d4] ss:$24 sps:$4 sm:$0xff]  }
 0x35a   : > { %4584 = vmatprep.subr.bf16.mxu0 %v8787_v62  ;;  %v8872_v62 = vld [vmem:[%s9344_s16 + $0x6d0] ss:$24 sps:$4 sm:$0xff]  }
 0x35b   : > { %4626 = vmatpush1.bf16.msra.mxu1 %v8782_v0  ;;  %v8877_v0 = vld [vmem:[%s9344_s16 + $0x6a4] ss:$24 sps:$4 sm:$0xff]  }
 0x35c   : > { %4627 = vmatprep.subr.bf16.mxu1 %v8790_v1  ;;  %v8880_v1 = vld [vmem:[%s9344_s16 + $0x674] ss:$24 sps:$4 sm:$0xff]  }
 0x35d   : > { %4585 = vmatpush1.bf16.msra.mxu0 %v8785_v2  ;;  %v8878_v2 = vld [vmem:[%s9344_s16 + $0x670] ss:$24 sps:$4 sm:$0xff]  }
 0x35e   : > { %4586 = vmatprep.subr.bf16.mxu0 %v8793_v3  ;;  %v8883_v3 = vld [vmem:[%s9344_s16 + $0x644] ss:$24 sps:$4 sm:$0xff]  }
 0x35f   : > { %4628 = vmatpush1.bf16.msra.mxu1 %v8788_v4  ;;  %v8881_v4 = vld [vmem:[%s9344_s16 + $0x640] ss:$24 sps:$4 sm:$0xff]  }
 0x360   : > { %4629 = vmatprep.subr.bf16.mxu1 %v8796_v5  ;;  %v8886_v5 = vld [vmem:[%s9344_s16 + $0x614] ss:$24 sps:$4 sm:$0xff]  }
 0x361   : > { %4587 = vmatpush1.bf16.msra.mxu0 %v8791_v6  ;;  %v8884_v6 = vld [vmem:[%s9344_s16 + $0x610] ss:$24 sps:$4 sm:$0xff]  }
 0x362   : > { %4588 = vmatprep.subr.bf16.mxu0 %v8799_v7  ;;  %v8889_v7 = vld [vmem:[%s9344_s16 + $0x8e4] ss:$24 sps:$4 sm:$0xff]  }
 0x363   : > { %4630 = vmatpush1.bf16.msra.mxu1 %v8794_v8  ;;  %v8887_v8 = vld [vmem:[%s9344_s16 + $0x8e0] ss:$24 sps:$4 sm:$0xff]  }
 0x364   : > { %4631 = vmatprep.subr.bf16.mxu1 %v8802_v9  ;;  %v8892_v9 = vld [vmem:[%s9344_s16 + $0x8b4] ss:$24 sps:$4 sm:$0xff]  }
 0x365   : > { %4589 = vmatpush1.bf16.msra.mxu0 %v8797_v12  ;;  %v8890_v12 = vld [vmem:[%s9344_s16 + $0x8b0] ss:$24 sps:$4 sm:$0xff]  }
 0x366   : > { %4590 = vmatprep.subr.bf16.mxu0 %v8805_v13  ;;  %v8895_v13 = vld [vmem:[%s9344_s16 + $0x884] ss:$24 sps:$4 sm:$0xff]  }
 0x367   : > { %4632 = vmatpush1.bf16.msra.mxu1 %v8800_v15  ;;  %v8893_v15 = vld [vmem:[%s9344_s16 + $0x880] ss:$24 sps:$4 sm:$0xff]  }
 0x368   : > { %4633 = vmatprep.subr.bf16.mxu1 %v8808_v16  ;;  %v8898_v16 = vld [vmem:[%s9344_s16 + $0x854] ss:$24 sps:$4 sm:$0xff]  }
 0x369   : > { %4591 = vmatpush1.bf16.msra.mxu0 %v8803_v17  ;;  %v8896_v17 = vld [vmem:[%s9344_s16 + $0x850] ss:$24 sps:$4 sm:$0xff]  }
 0x36a   : > { %4592 = vmatprep.subr.bf16.mxu0 %v8811_v18  ;;  %v8901_v18 = vld [vmem:[%s9344_s16 + $0x824] ss:$24 sps:$4 sm:$0xff]  }
 0x36b   : > { %4634 = vmatpush1.bf16.msra.mxu1 %v8806_v19  ;;  %v2820_v19 = vlaneseq }
 0x36c   : > { %4635 = vmatprep.subr.bf16.mxu1 %v8814_v20  ;;  %v8899_v20 = vld [vmem:[%s9344_s16 + $0x820] ss:$24 sps:$4 sm:$0xff]  }
 0x36d   : > { %4593 = vmatpush1.bf16.msra.mxu0 %v8809_v21  ;;  %v8904_v21 = vld [vmem:[%s9344_s16 + $0x7f4] ss:$24 sps:$4 sm:$0xff]  }
 0x36e   : > { %4594 = vmatprep.subr.bf16.mxu0 %v8817_v23  ;;  %v10043_v23 = vshrl.u32 %v2820_v19, 7 }
 0x36f   : > { %4636 = vmatpush1.bf16.msra.mxu1 %v8812_v24  ;;  %v8902_v24 = vld [vmem:[%s9344_s16 + $0x7f0] ss:$24 sps:$4 sm:$0xff]  }
 0x370   : > { %4637 = vmatprep.subr.bf16.mxu1 %v8820_v25 }
 0x371   : > { %4595 = vmatpush2.bf16.msra.mxu0 %v8815_v26  ;;  %v8907_v26 = vld [vmem:[%s9344_s16 + $0x7c4] ss:$24 sps:$4 sm:$0xff]  }
 0x372   : > { %4596 = vmatprep.subr.bf16.mxu0 %v8823_v27  ;;  %v2822_v27 = vsub.s32 0, %v10043_v23 }
 0x373   : > { %4638 = vmatpush2.bf16.msra.mxu1 %v8818_v28  ;;  %v10050_v28 = vld [vmem:[%s9351_s25] sm:$0x3f]  ;;  %s7754_s25 = smul.u32 48, %s4709_s29 }
 0x374   : > { %4639 = vmatprep.subr.bf16.mxu1 %v8826_v29  ;;  %v2826_v29 = vsub.s32 1, %v10043_v23 }
 0x375   : > { %4597 = vmatpush2.bf16.msra.mxu0 %v8821_v58  ;;  %v8905_v58 = vld [vmem:[%s9344_s16 + $0x7c0] ss:$24 sps:$4 sm:$0xff]  }
 0x376   : > { %4598 = vmatprep.subr.bf16.mxu0 %v8829_v31 }
 0x377   : > { %4640 = vmatpush2.bf16.msra.mxu1 %v8824_v32 }
 0x378   : > { %4641 = vmatprep.subr.bf16.mxu1 %v8832_v33  ;;  %v8910_v33 = vld [vmem:[%s9344_s16 + $0x794] ss:$24 sps:$4 sm:$0xff]  }
 0x379   : > { %4599 = vmatpush2.bf16.msra.mxu0 %v8827_v34  ;;  %v2823_v34 = vrot.slane %v10050_v28, %v2822_v27 }
 0x37a   : > { %4600 = vmatprep.subr.bf16.mxu0 %v8835_v63  ;;  %v2827_v63 = vrot.slane %v10050_v28, %v2826_v29 }
 0x37b   : > { %4642 = vmatpush2.bf16.msra.mxu1 %v8830_v35  ;;  %v8908_v35 = vld [vmem:[%s9344_s16 + $0x790] ss:$24 sps:$4 sm:$0xff]  }
 0x37c   : > { %4643 = vmatprep.subr.bf16.mxu1 %v8838_v36 }
 0x37d   : > { %4601 = vmatpush2.bf16.msra.mxu0 %v8833_v37 }
 0x37e   : > { %4602 = vmatprep.subr.bf16.mxu0 %v8841_v22 }
 0x37f   : > { %4644 = vmatpush2.bf16.msra.mxu1 %v8836_v38 }
 0x380   : > { %4645 = vmatprep.subr.bf16.mxu1 %v8844_v11 }
 0x381   : > { %4603 = vmatpush2.bf16.msra.mxu0 %v8839_v49 }
 0x382   : > { %4604 = vmatprep.subr.bf16.mxu0 %v8847_v43 }
 0x383   : > { %4646 = vmatpush2.bf16.msra.mxu1 %v8842_v14 }
 0x384   : > { %4647 = vmatprep.subr.bf16.mxu1 %v8850_v39 }
 0x385   : > { %4605 = vmatpush2.bf16.msra.mxu0 %v8845_v41 }
 0x386   : > { %4606 = vmatprep.subr.bf16.mxu0 %v8853_v55 }
 0x387   : > { %4648 = vmatpush2.bf16.msra.mxu1 %v8848_v44 }
 0x388   : > { %4649 = vmatprep.subr.bf16.mxu1 %v8856_v45 }
 0x389   : > { %4607 = vmatpush2.bf16.msra.mxu0 %v8851_v47 }
 0x38a   : > { %4608 = vmatprep.subr.bf16.mxu0 %v8859_v48 }
 0x38b   : > { %4650 = vmatpush2.bf16.msra.mxu1 %v8854_v50 }
 0x38c   : > { %4651 = vmatprep.subr.bf16.mxu1 %v8862_v51 }
 0x38d   : > { %4609 = vmatpush2.bf16.msra.mxu0 %v8857_v52 }
 0x38e   : > { %4664 = vmatprep.subr.bf16.mxu0 %v8865_v53 }
 0x38f   : > { %4652 = vmatpush2.bf16.msra.mxu1 %v8860_v54 }
 0x390   : > { %4611 = vmatmul.mubr.bf16.vlgmr.msra.gmra.mxu0 %v8913_v59  ;;  %v4354_v25 = vpop.f32.mrf.mxu0 }
 0x391   : > { %4665 = vmatpush1.bf16.msra.mxu0 %v8863_v56  ;;  %4696 = vmatprep.mubr.bf16.mxu0 %v9841_v10  ;;  %v8875_v10 = vld [vmem:[%s9344_s16 + $0x6a0] ss:$24 sps:$4 sm:$0xff]   ;;  %v4397_v32 = vpop.f32.mrf.mxu1  ;;  %v4355_v22 = vadd.f32 %v4354_v25, %v2823_v34  ;;  %s10059_s16 = scalar_lea.vmem [#allocation3], %s7754_s25  ;;  %v2842_v25 = vsub.s32 5, %v10043_v23 }
 0x392   : > { %4654 = vmatmul.mubr.bf16.vlgmr.msra.gmra.mxu1 %v8914_v40  ;;  %4666 = vmatprep.subr.bf16.mxu0 %v8868_v57  ;;  %v4356_v31 = vpop.f32.mrf.mxu0  ;;  %v2830_v57 = vsub.s32 2, %v10043_v23 }
 0x393   : > { %v4399_v37 = vpop.f32.mrf.mxu1  ;;  %v4357_v38 = vadd.f32 %v4356_v31, %v2827_v63  ;;  %v4398_v43 = vadd.f32 %v4397_v32, %v4355_v22 }
 0x394   : > { %v4358_v36 = vpop.f32.mrf.mxu0  ;;  %v2831_v40 = vrot.slane %v10050_v28, %v2830_v57 }
 0x395   : > { %4667 = vmatpush1.bf16.msra.mxu0 %v8866_v30  ;;  %v4401_v49 = vpop.f32.mrf.mxu1  ;;  %v4359_v14 = vadd.f32 %v4358_v36, %v2823_v34  ;;  %v4400_v41 = vadd.f32 %v4399_v37, %v4357_v38  ;;  %v2834_v30 = vsub.s32 3, %v10043_v23 }
 0x396   : > { %4668 = vmatprep.subr.bf16.mxu0 %v8871_v60  ;;  %v4360_v11 = vpop.f32.mrf.mxu0 }
 0x397   : > { %v4361_v55 = vadd.f32 %v4360_v11, %v2827_v63  ;;  %v4403_v45 = vpop.f32.mrf.mxu1  ;;  %v4402_v48 = vadd.f32 %v4401_v49, %v4359_v14 }
 0x399   : > { %4669 = vmatpush1.bf16.msra.mxu0 %v8869_v42  ;;  %v4404_v52 = vadd.f32 %v4403_v45, %v4361_v55  ;;  %v2835_v42 = vrot.slane %v10050_v28, %v2834_v30 }
 0x39a   : > { %4670 = vmatprep.subr.bf16.mxu0 %v8874_v61 }
 0x39d   : > { %4671 = vmatpush1.bf16.msra.mxu0 %v8872_v62 }
 0x39e   : > { %4672 = vmatprep.subr.bf16.mxu0 %v8877_v0 }
 0x3a1   : > { %4673 = vmatpush1.bf16.msra.mxu0 %v8875_v10 }
 0x3a2   : > { %4674 = vmatprep.subr.bf16.mxu0 %v8880_v1 }
 0x3a5   : > { %4675 = vmatpush1.bf16.msra.mxu0 %v8878_v2 }
 0x3a6   : > { %4676 = vmatprep.subr.bf16.mxu0 %v8883_v3 }
 0x3a9   : > { %4677 = vmatpush1.bf16.msra.mxu0 %v8881_v4 }
 0x3aa   : > { %4678 = vmatprep.subr.bf16.mxu0 %v8886_v5 }
 0x3ad   : > { %4679 = vmatpush1.bf16.msra.mxu0 %v8884_v6 }
 0x3ae   : > { %4680 = vmatprep.subr.bf16.mxu0 %v8889_v7 }
 0x3b1   : > { %4681 = vmatpush2.bf16.msra.mxu0 %v8887_v8 }
 0x3b2   : > { %4682 = vmatprep.subr.bf16.mxu0 %v8892_v9 }
 0x3b5   : > { %4683 = vmatpush2.bf16.msra.mxu0 %v8890_v12 }
 0x3b6   : > { %4684 = vmatprep.subr.bf16.mxu0 %v8895_v13 }
 0x3b9   : > { %4685 = vmatpush2.bf16.msra.mxu0 %v8893_v15 }
 0x3ba   : > { %4686 = vmatprep.subr.bf16.mxu0 %v8898_v16 }
 0x3bd   : > { %4687 = vmatpush2.bf16.msra.mxu0 %v8896_v17 }
 0x3be   : > { %4688 = vmatprep.subr.bf16.mxu0 %v8901_v18 }
 0x3c1   : > { %4689 = vmatpush2.bf16.msra.mxu0 %v8899_v20 }
 0x3c2   : > { %4690 = vmatprep.subr.bf16.mxu0 %v8904_v21 }
 0x3c5   : > { %4691 = vmatpush2.bf16.msra.mxu0 %v8902_v24  ;;  %v2838_v24 = vsub.s32 4, %v10043_v23 }
 0x3c6   : > { %4692 = vmatprep.subr.bf16.mxu0 %v8907_v26 }
 0x3c7   : > { %v2839_v29 = vrot.slane %v10050_v28, %v2838_v24 }
 0x3c9   : > { %4693 = vmatpush2.bf16.msra.mxu0 %v8905_v58  ;;  %v2843_v58 = vrot.slane %v10050_v28, %v2842_v25 }
 0x3ca   : > { %4694 = vmatprep.subr.bf16.mxu0 %v8910_v33 }
 0x3cd   : > { %4695 = vmatpush2.bf16.msra.mxu0 %v8908_v35 }
 0x3d0   : > { %v4440_v39 = vpop.f32.mrf.mxu0  ;;  %4697 = vmatmul.mubr.bf16.vlgmr.msra.gmra.mxu0 %v9880_v46 }
 0x3d1   : > { %v4441_v44 = vadd.f32 %v4440_v39, %v4398_v43 }
 0x3d2   : > { %v4442_v47 = vpop.f32.mrf.mxu0  ;;  %v4483_v56 = vpop.f32.mrf.mxu1 }
 0x3d3   : > { %4714 = vst [vmem:[%s10059_s16] sm:$0xff] %v4441_v44  ;;  %v4443_v50 = vadd.f32 %v4442_v47, %v4400_v41  ;;  %v4484_v61 = vadd.f32 %v4483_v56, %v2831_v40 }
 0x3d4   : > { %v4444_v51 = vpop.f32.mrf.mxu0  ;;  %v4485_v59 = vpop.f32.mrf.mxu1 }
 0x3d5   : > { %4715 = vst [vmem:[%s10059_s16 + $0x8] sm:$0xff] %v4443_v50  ;;  %v4445_v53 = vadd.f32 %v4444_v51, %v4402_v48  ;;  %v4486_v0 = vadd.f32 %v4485_v59, %v2835_v42 }
 0x3d6   : > { %v4446_v54 = vpop.f32.mrf.mxu0  ;;  %v4487_v60 = vpop.f32.mrf.mxu1 }
 0x3d7   : > { %4720 = vst [vmem:[%s10059_s16 + $0x30] sm:$0xff] %v4445_v53  ;;  %v4447_v46 = vadd.f32 %v4446_v54, %v4404_v52  ;;  %v4488_v4 = vadd.f32 %v4487_v60, %v2831_v40 }
 0x3d8   : > { %v4489_v62 = vpop.f32.mrf.mxu1 }
 0x3d9   : > { %4721 = vst [vmem:[%s10059_s16 + $0x38] sm:$0xff] %v4447_v46  ;;  %v4490_v9 = vadd.f32 %v4489_v62, %v2835_v42 }
 0x410   : > { %v4526_v10 = vpop.f32.mrf.mxu0 }
 0x411   : > { %v4527_v1 = vadd.f32 %v4526_v10, %v4484_v61 }
 0x412   : > { %v4528_v2 = vpop.f32.mrf.mxu0  ;;  %v4569_v3 = vpop.f32.mrf.mxu1 }
 0x413   : > { %v4529_v5 = vadd.f32 %v4528_v2, %v4486_v0  ;;  %v4570_v6 = vadd.f32 %v4569_v3, %v4527_v1 }
 0x414   : > { %v4530_v7 = vpop.f32.mrf.mxu0  ;;  %v4571_v8 = vpop.f32.mrf.mxu1 }
 0x415   : > { %4716 = vst [vmem:[%s10059_s16 + $0x10] sm:$0xff] %v4570_v6  ;;  %v4531_v12 = vadd.f32 %v4530_v7, %v4488_v4  ;;  %v4572_v13 = vadd.f32 %v4571_v8, %v4529_v5 }
 0x416   : > { %v4532_v15 = vpop.f32.mrf.mxu0  ;;  %v4573_v16 = vpop.f32.mrf.mxu1 }
 0x417   : > { %4717 = vst [vmem:[%s10059_s16 + $0x18] sm:$0xff] %v4572_v13  ;;  %v4533_v17 = vadd.f32 %v4532_v15, %v4490_v9  ;;  %v4574_v18 = vadd.f32 %v4573_v16, %v4531_v12 }
 0x418   : > { %v4575_v19 = vpop.f32.mrf.mxu1 }
 0x419   : > { %4722 = vst [vmem:[%s10059_s16 + $0x40] sm:$0xff] %v4574_v18  ;;  %v4576_v20 = vadd.f32 %v4575_v19, %v4533_v17 }
 0x41b   : > { %4723 = vst [vmem:[%s10059_s16 + $0x48] sm:$0xff] %v4576_v20 }
 0x450   : > { %v4612_v21 = vpop.f32.mrf.mxu0 }
 0x451   : > { %v4613_v33 = vadd.f32 %v4612_v21, %v2839_v29 }
 0x452   : > { %v4614_v26 = vpop.f32.mrf.mxu0  ;;  %v4655_v27 = vpop.f32.mrf.mxu1 }
 0x453   : > { %v4615_v34 = vadd.f32 %v4614_v26, %v2843_v58  ;;  %v4656_v36 = vadd.f32 %v4655_v27, %v4613_v33 }
 0x454   : > { %v4616_v31 = vpop.f32.mrf.mxu0  ;;  %v4657_v32 = vpop.f32.mrf.mxu1 }
 0x455   : > { %v4617_v37 = vadd.f32 %v4616_v31, %v2839_v29  ;;  %v4658_v23 = vadd.f32 %v4657_v32, %v4615_v34 }
 0x456   : > { %v4618_v63 = vpop.f32.mrf.mxu0  ;;  %v4659_v35 = vpop.f32.mrf.mxu1 }
 0x457   : > { %v4619_v38 = vadd.f32 %v4618_v63, %v2843_v58  ;;  %v4660_v14 = vadd.f32 %v4659_v35, %v4617_v37 }
 0x458   : > { %v4661_v49 = vpop.f32.mrf.mxu1 }
 0x459   : > { %v4662_v41 = vadd.f32 %v4661_v49, %v4619_v38 }
 0x490   : > { %v4698_v22 = vpop.f32.mrf.mxu0 }
 0x491   : > { %v4699_v11 = vadd.f32 %v4698_v22, %v4656_v36 }
 0x492   : > { %v4700_v43 = vpop.f32.mrf.mxu0 }
 0x493   : > { %4718 = vst [vmem:[%s10059_s16 + $0x20] sm:$0xff] %v4699_v11  ;;  %v4701_v28 = vadd.f32 %v4700_v43, %v4658_v23 }
 0x494   : > { %v4702_v39 = vpop.f32.mrf.mxu0 }
 0x495   : > { %4719 = vst [vmem:[%s10059_s16 + $0x28] sm:$0xff] %v4701_v28  ;;  %v4703_v55 = vadd.f32 %v4702_v39, %v4660_v14 }
 0x496   : > { %v4704_v44 = vpop.f32.mrf.mxu0 }
 0x497   : > { %4724 = vst [vmem:[%s10059_s16 + $0x50] sm:$0xff] %v4703_v55  ;;  %v4705_v45 = vadd.f32 %v4704_v44, %v4662_v41 }
 0x499   : > { %4725 = vst [vmem:[%s10059_s16 + $0x58] sm:$0xff] %v4705_v45 }
 0x49a PF: > { %p7388_p7 = scmp.ne.s32.totalorder %s9216_s22, 3 }
 0x49c   : > { %4729 = sbr.rel (%p7388_p7) target bundleno = 2388 (0x954), region = 68 }
 0x4a1   : > { %v4730_v47 = vlaneseq  ;;  %v11893_v30 = vmov 0  ;;  %v11895_v60 = vmov 0  ;;  %v11774_v61 = vmov 1.0|1.0  }
 0x4a2   : > { %v11901_v2 = vmov 0  ;;  %v11903_v4 = vmov 0  ;;  %v11905_v6 = vmov 0  ;;  %v11909_v12 = vmov 0 }
 0x4a3   : > { %v10082_v48 = vshrl.u32 %v4730_v47, 7  ;;  %v10084_v50 = vand.u32 127, %v4730_v47  ;;  %v11911_v15 = vmov 0  ;;  %v11913_v17 = vmov 0 }
 0x4a4   : > { %v11915_v19 = vmov 0  ;;  %v11917_v21 = vmov 0  ;;  %v11919_v25 = vmov 0  ;;  %v11921_v27 = vmov 0 }
 0x4a5   : > { %v4761_v51 = vadd.s32 240, %v10082_v48  ;;  %v4762_v52 = vadd.s32 248, %v10082_v48  ;;  %v10089_v53 = vmul.u32 96, %v10084_v50  ;;  %v4926_v54 = vadd.s32 1, %v10084_v50 }
 0x4a6   : > { %v4793_v46 = vadd.s32 496, %v10082_v48  ;;  %v4794_v56 = vadd.s32 504, %v10082_v48  ;;  %v4745_v59 = vadd.s32 112, %v10082_v48  ;;  %v4746_v40 = vadd.s32 120, %v10082_v48 }
 0x4a7   : > { %vm4860_vm0 = vcmp.ge.s32.totalorder %v4761_v51, %v10089_v53  ;;  %v10095_v57 = vmul.u32 96, %v4926_v54  ;;  %vm4861_vm1 = vcmp.ge.s32.totalorder %v4762_v52, %v10089_v53  ;;  %v4777_v42 = vadd.s32 368, %v10082_v48  ;;  %v5404_v28 = vld [vmem:[#allocation3] ss:$8 sm:$0xf] }
 0x4a8   : > { %vm4892_vm5 = vcmp.ge.s32.totalorder %v4793_v46, %v10089_v53  ;;  %vm4893_vm8 = vcmp.ge.s32.totalorder %v4794_v56, %v10089_v53  ;;  %vm4844_vm12 = vcmp.ge.s32.totalorder %v4745_v59, %v10089_v53  ;;  %v4778_v0 = vadd.s32 376, %v10082_v48  ;;  %v5405_v39 = vld [vmem:[#allocation3] ss:$8 sm:$0x30] }
 0x4a9   : > { %vm4958_vm2 = vcmp.lt.s32.totalorder %v4761_v51, %v10095_v57  ;;  %vm4959_vm3 = vcmp.lt.s32.totalorder %v4762_v52, %v10095_v57  ;;  %vm4990_vm6 = vcmp.lt.s32.totalorder %v4793_v46, %v10095_v57  ;;  %vm4991_vm9 = vcmp.lt.s32.totalorder %v4794_v56, %v10095_v57 }
 0x4aa   : > { %vm10101_vm4 = vmand %vm4860_vm0, %vm4958_vm2  ;;  %vm4942_vm13 = vcmp.lt.s32.totalorder %v4745_v59, %v10095_v57  ;;  %vm4845_vm15 = vcmp.ge.s32.totalorder %v4746_v40, %v10089_v53  ;;  %vm4943_vm0 = vcmp.lt.s32.totalorder %v4746_v40, %v10095_v57  ;;  %v4759_v1 = vadd.s32 224, %v10082_v48 }
 0x4ab   : > { %v11894_v30 = vsel %vm10101_vm4, 4294967295, %v11893_v30  ;;  %vm10108_vm7 = vmand %vm4861_vm1, %vm4959_vm3  ;;  %vm4876_vm3 = vcmp.ge.s32.totalorder %v4777_v42, %v10089_v53  ;;  %v4760_v3 = vadd.s32 232, %v10082_v48  ;;  %v4791_v5 = vadd.s32 480, %v10082_v48 }
 0x4ac   : > { %v11896_v60 = vsel %vm10108_vm7, 4294967295, %v11895_v60  ;;  %vm11700_vm10 = vmpackc.low %vm10108_vm7, %vm10101_vm4  ;;  %v4792_v7 = vadd.s32 488, %v10082_v48  ;;  %v4743_v9 = vadd.s32 96, %v10082_v48  ;;  %v4744_v13 = vadd.s32 104, %v10082_v48 }
 0x4ad   : > { %7755 = vmatprep.subr.msk.bf16.mxu0 %vm11700_vm10, %v11774_v61  ;;  %vm10125_vm11 = vmand %vm4892_vm5, %vm4990_vm6  ;;  %vm4974_vm5 = vcmp.lt.s32.totalorder %v4777_v42, %v10095_v57  ;;  %vm4957_vm4 = vcmp.lt.s32.totalorder %v4760_v3, %v10095_v57  ;;  %v4775_v16 = vadd.s32 352, %v10082_v48  ;;  %v4776_v18 = vadd.s32 360, %v10082_v48 }
 0x4ae   : > { %vm10132_vm14 = vmand %vm4893_vm8, %vm4991_vm9  ;;  %vm4877_vm8 = vcmp.ge.s32.totalorder %v4778_v0, %v10089_v53  ;;  %vm4975_vm9 = vcmp.lt.s32.totalorder %v4778_v0, %v10095_v57  ;;  %vm4843_vm7 = vcmp.ge.s32.totalorder %v4744_v13, %v10089_v53  ;;  %v4757_v20 = vadd.s32 208, %v10082_v48 }
 0x4af   : > { %vm11701_vm1 = vmpackc.low %vm10132_vm14, %vm10125_vm11  ;;  %v4758_v24 = vadd.s32 216, %v10082_v48  ;;  %v4789_v26 = vadd.s32 464, %v10082_v48  ;;  %v4790_v29 = vadd.s32 472, %v10082_v48  ;;  %v11923_v58 = vmov 0 }
 0x4b0   : > { %7777 = vmatprep.subr.msk.bf16.mxu1 %vm11701_vm1, %v11774_v61  ;;  %vm10149_vm2 = vmand %vm4844_vm12, %vm4942_vm13  ;;  %vm4859_vm1 = vcmp.ge.s32.totalorder %v4760_v3, %v10089_v53  ;;  %v4741_v31 = vadd.s32 80, %v10082_v48  ;;  %v11925_v32 = vmov 0  ;;  %v4742_v33 = vadd.s32 88, %v10082_v48 }
 0x4b1   : > { %v11902_v2 = vsel %vm10149_vm2, 4294967295, %v11901_v2  ;;  %vm10156_vm6 = vmand %vm4845_vm15, %vm4943_vm0  ;;  %vm4858_vm15 = vcmp.ge.s32.totalorder %v4759_v1, %v10089_v53  ;;  %vm4956_vm0 = vcmp.lt.s32.totalorder %v4759_v1, %v10095_v57  ;;  %v11927_v34 = vmov 0  ;;  %v5409_v1 = vld [vmem:[#allocation3 + $0x68] sm:$0xff] }
 0x4b2   : > { %v11904_v4 = vsel %vm10156_vm6, 4294967295, %v11903_v4  ;;  %vm11703_vm12 = vmpackc.low %vm10156_vm6, %vm10149_vm2  ;;  %vm4891_vm2 = vcmp.ge.s32.totalorder %v4792_v7, %v10089_v53  ;;  %vm4989_vm6 = vcmp.lt.s32.totalorder %v4792_v7, %v10095_v57  ;;  %v4773_v63 = vadd.s32 336, %v10082_v48  ;;  %v5411_v7 = vld [vmem:[#allocation3 + $0x78] sm:$0xff] }
 0x4b3   : > { %7756 = vmatpush3.bf16.msk.msra.mxu0 %vm11703_vm12, %v11774_v61  ;;  %vm10173_vm13 = vmand %vm4876_vm3, %vm4974_vm5  ;;  %v11929_v35 = vmov 0  ;;  %v4774_v36 = vadd.s32 344, %v10082_v48  ;;  %v11931_v37 = vmov 0  ;;  %v4755_v22 = vadd.s32 192, %v10082_v48 }
 0x4b4   : > { %v11906_v6 = vsel %vm10173_vm13, 4294967295, %v11905_v6  ;;  %vm10180_vm10 = vmand %vm4877_vm8, %vm4975_vm9  ;;  %vm4890_vm8 = vcmp.ge.s32.totalorder %v4791_v5, %v10089_v53  ;;  %vm4988_vm9 = vcmp.lt.s32.totalorder %v4791_v5, %v10095_v57  ;;  %v11933_v23 = vmov 0 }
 0x4b5   : > { %vm11706_vm3 = vmpackc.low %vm10180_vm10, %vm10173_vm13  ;;  %vm4941_vm13 = vcmp.lt.s32.totalorder %v4744_v13, %v10095_v57  ;;  %v4756_v38 = vadd.s32 200, %v10082_v48  ;;  %v11935_v11 = vmov 0  ;;  %v4787_v49 = vadd.s32 448, %v10082_v48 }
 0x4b6   : > { %7778 = vmatpush3.bf16.msk.msra.mxu1 %vm11706_vm3, %v11774_v61  ;;  %vm10197_vm5 = vmand %vm4858_vm15, %vm4956_vm0  ;;  %vm4940_vm0 = vcmp.lt.s32.totalorder %v4743_v9, %v10095_v57  ;;  %v11937_v43 = vmov 0  ;;  %v4788_v14 = vadd.s32 456, %v10082_v48  ;;  %v11939_v41 = vmov 0 }
 0x4b7   : > { %v11910_v12 = vsel %vm10197_vm5, 4294967295, %v11909_v12  ;;  %vm10204_vm12 = vmand %vm4859_vm1, %vm4957_vm4  ;;  %vm4842_vm1 = vcmp.ge.s32.totalorder %v4743_v9, %v10089_v53  ;;  %v4739_v55 = vadd.s32 64, %v10082_v48  ;;  %v11941_v44 = vmov 0 }
 0x4b8   : > { %v11912_v15 = vsel %vm10204_vm12, 4294967295, %v11911_v15  ;;  %vm11709_vm15 = vmpackc.low %vm10204_vm12, %vm10197_vm5  ;;  %vm4875_vm5 = vcmp.ge.s32.totalorder %v4776_v18, %v10089_v53  ;;  %vm4973_vm12 = vcmp.lt.s32.totalorder %v4776_v18, %v10095_v57  ;;  %v4740_v45 = vadd.s32 72, %v10082_v48 }
 0x4b9   : > { %7757 = vmatprep.subr.msk.bf16.mxu0 %vm11709_vm15, %v11774_v61  ;;  %vm10221_vm4 = vmand %vm4890_vm8, %vm4988_vm9  ;;  %vm4972_vm9 = vcmp.lt.s32.totalorder %v4775_v16, %v10095_v57  ;;  %v11943_v47 = vmov 0  ;;  %v4771_v51 = vadd.s32 320, %v10082_v48  ;;  %v5406_v52 = vor.u32 %v5405_v39, %v5404_v28 }
 0x4ba   : > { %v11914_v17 = vsel %vm10221_vm4, 4294967295, %v11913_v17  ;;  %vm10228_vm3 = vmand %vm4891_vm2, %vm4989_vm6  ;;  %vm4874_vm6 = vcmp.ge.s32.totalorder %v4775_v16, %v10089_v53  ;;  %v11945_v54 = vmov 0  ;;  %v4772_v46 = vadd.s32 328, %v10082_v48 }
 0x4bb   : > { %v11916_v19 = vsel %vm10228_vm3, 4294967295, %v11915_v19  ;;  %vm11712_vm8 = vmpackc.low %vm10228_vm3, %vm10221_vm4  ;;  %vm4857_vm4 = vcmp.ge.s32.totalorder %v4758_v24, %v10089_v53  ;;  %vm4955_vm3 = vcmp.lt.s32.totalorder %v4758_v24, %v10095_v57  ;;  %v11947_v56 = vmov 0 }
 0x4bc   : > { %7779 = vmatprep.subr.msk.bf16.mxu1 %vm11712_vm8, %v11774_v61  ;;  %vm10245_vm2 = vmand %vm4842_vm1, %vm4940_vm0  ;;  %vm4954_vm0 = vcmp.lt.s32.totalorder %v4757_v20, %v10095_v57  ;;  %v4753_v59 = vadd.s32 176, %v10082_v48  ;;  %v11949_v40 = vmov 0  ;;  %v4754_v42 = vadd.s32 184, %v10082_v48 }
 0x4bd   : > { %v11918_v21 = vsel %vm10245_vm2, 4294967295, %v11917_v21  ;;  %vm10252_vm15 = vmand %vm4843_vm7, %vm4941_vm13  ;;  %vm4856_vm13 = vcmp.ge.s32.totalorder %v4757_v20, %v10089_v53  ;;  %v10444_v0 = vmul.f32 0.10206208, %v5406_v52  ;;  %v11769_v3 = vsub.s32 1, %v10082_v48 }
 0x4be   : > { %v11920_v25 = vsel %vm10252_vm15, 4294967295, %v11919_v25  ;;  %vm11715_vm1 = vmpackc.low %vm10252_vm15, %vm10245_vm2  ;;  %vm4889_vm2 = vcmp.ge.s32.totalorder %v4790_v29, %v10089_v53  ;;  %vm4987_vm15 = vcmp.lt.s32.totalorder %v4790_v29, %v10095_v57  ;;  %v11952_v5 = vmov 0 }
 0x4bf   : > { %7758 = vmatpush3.bf16.msk.msra.mxu0 %vm11715_vm1, %v11774_v61  ;;  %vm10269_vm7 = vmand %vm4874_vm6, %vm4972_vm9  ;;  %vm4986_vm9 = vcmp.lt.s32.totalorder %v4789_v26, %v10095_v57  ;;  %v11771_v9 = vsub.s32 3, %v10082_v48  ;;  %v4785_v13 = vadd.s32 432, %v10082_v48  ;;  %v4786_v16 = vadd.s32 440, %v10082_v48 }
 0x4c0   : > { %v11922_v27 = vsel %vm10269_vm7, 4294967295, %v11921_v27  ;;  %vm10276_vm8 = vmand %vm4875_vm5, %vm4973_vm12  ;;  %vm4888_vm5 = vcmp.ge.s32.totalorder %v4789_v26, %v10089_v53  ;;  %v11955_v18 = vmov 0  ;;  %v5428_v20 = vrot.slane %v10444_v0, %v11769_v3 }
 0x4c1   : > { %v11924_v58 = vsel %vm10276_vm8, 4294967295, %v11923_v58  ;;  %vm11718_vm6 = vmpackc.low %vm10276_vm8, %vm10269_vm7  ;;  %vm4841_vm7 = vcmp.ge.s32.totalorder %v4742_v33, %v10089_v53  ;;  %vm4939_vm8 = vcmp.lt.s32.totalorder %v4742_v33, %v10095_v57  ;;  %v5436_v24 = vrot.slane %v10444_v0, %v11771_v9 }
 0x4c2   : > { %7780 = vmatpush3.bf16.msk.msra.mxu1 %vm11718_vm6, %v11774_v61  ;;  %vm10293_vm12 = vmand %vm4856_vm13, %vm4954_vm0  ;;  %vm4938_vm0 = vcmp.lt.s32.totalorder %v4741_v31, %v10095_v57  ;;  %v11957_v26 = vmov 0  ;;  %v4737_v29 = vadd.s32 48, %v10082_v48  ;;  %v11965_v28 = vmov 0 }
 0x4c3   : > { %v11926_v32 = vsel %vm10293_vm12, 4294967295, %v11925_v32  ;;  %vm10300_vm1 = vmand %vm4857_vm4, %vm4955_vm3  ;;  %vm4840_vm4 = vcmp.ge.s32.totalorder %v4741_v31, %v10089_v53  ;;  %v5452_v31 = vmul.f32 %v5428_v20, %v5409_v1  ;;  %v5454_v33 = vmul.f32 %v5436_v24, %v5411_v7 }
 0x4c4   : > { %v11928_v34 = vsel %vm10300_vm1, 4294967295, %v11927_v34  ;;  %vm11721_vm13 = vmpackc.low %vm10300_vm1, %vm10293_vm12  ;;  %vm4873_vm12 = vcmp.ge.s32.totalorder %v4774_v36, %v10089_v53  ;;  %vm4971_vm1 = vcmp.lt.s32.totalorder %v4774_v36, %v10095_v57  ;;  %v4738_v36 = vadd.s32 56, %v10082_v48 }
 0x4c5   : > { %7759 = vmatprep.subr.msk.bf16.mxu0 %vm11721_vm13, %v11774_v61  ;;  %vm10317_vm3 = vmand %vm4888_vm5, %vm4986_vm9  ;;  %vm4970_vm9 = vcmp.lt.s32.totalorder %v4773_v63, %v10095_v57  ;;  %v4770_v39 = vadd.s32 312, %v10082_v48  ;;  %v4752_v52 = vadd.s32 168, %v10082_v48  ;;  %v4784_v1 = vadd.s32 424, %v10082_v48 }
 0x4c6   : > { %v11930_v35 = vsel %vm10317_vm3, 4294967295, %v11929_v35  ;;  %vm10324_vm6 = vmand %vm4889_vm2, %vm4987_vm15  ;;  %vm4872_vm2 = vcmp.ge.s32.totalorder %v4773_v63, %v10089_v53  ;;  %v11959_v63 = vmov 0  ;;  %v11977_v7 = vmov 0 }
 0x4c7   : > { %v11932_v37 = vsel %vm10324_vm6, 4294967295, %v11931_v37  ;;  %vm11724_vm5 = vmpackc.low %vm10324_vm6, %vm10317_vm3  ;;  %vm4855_vm3 = vcmp.ge.s32.totalorder %v4756_v38, %v10089_v53  ;;  %vm4985_vm6 = vcmp.lt.s32.totalorder %v4788_v14, %v10095_v57  ;;  %v4736_v20 = vadd.s32 40, %v10082_v48 }
 0x4c8   : > { %7781 = vmatprep.subr.msk.bf16.mxu1 %vm11724_vm5, %v11774_v61  ;;  %vm10341_vm15 = vmand %vm4840_vm4, %vm4938_vm0  ;;  %vm4952_vm0 = vcmp.lt.s32.totalorder %v4755_v22, %v10095_v57  ;;  %v11982_v24 = vmov 0  ;;  %v4747_v3 = vadd.s32 128, %v10082_v48  ;;  %v12012_v9 = vmov 0 }
 0x4c9   : > { %v11934_v23 = vsel %vm10341_vm15, 4294967295, %v11933_v23  ;;  %vm10348_vm13 = vmand %vm4841_vm7, %vm4939_vm8  ;;  %vm4854_vm7 = vcmp.ge.s32.totalorder %v4755_v22, %v10089_v53  ;;  %v11962_v22 = vmov 0  ;;  %v5360_v62 = vadd.s32 128, %v10084_v50 }
 0x4ca   : > { %v11936_v11 = vsel %vm10348_vm13, 4294967295, %v11935_v11  ;;  %vm11726_vm4 = vmpackc.low %vm10348_vm13, %vm10341_vm15  ;;  %vm4887_vm13 = vcmp.ge.s32.totalorder %v4788_v14, %v10089_v53  ;;  %v4769_v14 = vadd.s32 304, %v10082_v48  ;;  %v5365_v10 = vmul.u32 96, %v10082_v48 }
 0x4cb   : > { %7760 = vmatpush3.bf16.msk.msra.mxu0 %vm11726_vm4, %v11774_v61  ;;  %vm10365_vm8 = vmand %vm4872_vm2, %vm4970_vm9  ;;  %vm4953_vm4 = vcmp.lt.s32.totalorder %v4756_v38, %v10095_v57  ;;  %vm4984_vm9 = vcmp.lt.s32.totalorder %v4787_v49, %v10095_v57  ;;  %v5458_v38 = vpack.c.bf16 %v5452_v31, %v5452_v31  ;;  %v11985_v31 = vmov 0 }
 0x4cc   : > { %v11938_v43 = vsel %vm10365_vm8, 4294967295, %v11937_v43  ;;  %vm10372_vm5 = vmand %vm4873_vm12, %vm4971_vm1  ;;  %vm4886_vm12 = vcmp.ge.s32.totalorder %v4787_v49, %v10089_v53  ;;  %v5460_v49 = vpack.c.bf16 %v5454_v33, %v5454_v33  ;;  %v4768_v33 = vadd.s32 296, %v10082_v48 }
 0x4cd   : > { %v11940_v41 = vsel %vm10372_vm5, 4294967295, %v11939_v41  ;;  %vm11730_vm2 = vmpackc.low %vm10372_vm5, %vm10365_vm8  ;;  %vm4839_vm8 = vcmp.ge.s32.totalorder %v4740_v45, %v10089_v53  ;;  %vm4937_vm5 = vcmp.lt.s32.totalorder %v4740_v45, %v10095_v57  ;;  %5495 = vmatprep.mubr.bf16.mxu0 %v5458_v38  ;;  %v4751_v45 = vadd.s32 160, %v10082_v48 }
 0x4ce   : > { %7782 = vmatpush3.bf16.msk.msra.mxu1 %vm11730_vm2, %v11774_v61  ;;  %vm10389_vm1 = vmand %vm4854_vm7, %vm4952_vm0  ;;  %vm4936_vm0 = vcmp.lt.s32.totalorder %v4739_v55, %v10095_v57  ;;  %5535 = vmatprep.mubr.bf16.mxu1 %v5460_v49  ;;  %v4749_v38 = vadd.s32 144, %v10082_v48  ;;  %v11989_v49 = vmov 0  ;;  %v5362_v8 = vadd.s32 384, %v10084_v50 }
 0x4cf   : > { %v11942_v44 = vsel %vm10389_vm1, 4294967295, %v11941_v44  ;;  %vm10396_vm15 = vmand %vm4855_vm3, %vm4953_vm4  ;;  %vm4838_vm4 = vcmp.ge.s32.totalorder %v4739_v55, %v10089_v53  ;;  %v11967_v55 = vmov 0 }
 0x4d0   : > { %v11944_v47 = vsel %vm10396_vm15, 4294967295, %v11943_v47  ;;  %vm11733_vm7 = vmpackc.low %vm10396_vm15, %vm10389_vm1  ;;  %vm4950_vm1 = vcmp.lt.s32.totalorder %v4753_v59, %v10095_v57 }
 0x4d1   : > { %7761 = vmatprep.subr.msk.bf16.mxu0 %vm11733_vm7, %v11774_v61  ;;  %vm10413_vm3 = vmand %vm4886_vm12, %vm4984_vm9  ;;  %vm4871_vm9 = vcmp.ge.s32.totalorder %v4772_v46, %v10089_v53 }
 0x4d2   : > { %v11946_v54 = vsel %vm10413_vm3, 4294967295, %v11945_v54  ;;  %vm10420_vm2 = vmand %vm4887_vm13, %vm4985_vm6  ;;  %vm4968_vm13 = vcmp.lt.s32.totalorder %v4771_v51, %v10095_v57 }
 0x4d3   : > { %v11948_v56 = vsel %vm10420_vm2, 4294967295, %v11947_v56  ;;  %vm11734_vm12 = vmpackc.low %vm10420_vm2, %vm10413_vm3  ;;  %vm4885_vm3 = vcmp.ge.s32.totalorder %v4786_v16, %v10089_v53  ;;  %vm4983_vm2 = vcmp.lt.s32.totalorder %v4786_v16, %v10095_v57  ;;  %v11979_v16 = vmov 0 }
 0x4d4   : > { %7783 = vmatprep.subr.msk.bf16.mxu1 %vm11734_vm12, %v11774_v61  ;;  %vm10438_vm6 = vmand %vm4838_vm4, %vm4936_vm0  ;;  %vm4969_vm4 = vcmp.lt.s32.totalorder %v4772_v46, %v10095_v57  ;;  %vm4852_vm12 = vcmp.ge.s32.totalorder %v4753_v59, %v10089_v53  ;;  %v11972_v46 = vmov 0  ;;  %v4783_v59 = vadd.s32 416, %v10082_v48 }
 0x4d5   : > { %v11950_v40 = vsel %vm10438_vm6, 4294967295, %v11949_v40  ;;  %vm10447_vm7 = vmand %vm4839_vm8, %vm4937_vm5  ;;  %vm11954_vm5 = vcmp.ge.s32.totalorder %v4771_v51, %v10089_v53  ;;  %v11969_v51 = vmov 0 }
 0x4d6   : > { %11951 = vst [vmem:[#allocation18_spill] sm:$0xff] %v11950_v40  ;;  %v11953_v5 = vsel %vm10447_vm7, 4294967295, %v11952_v5  ;;  %vm11737_vm0 = vmpackc.low %vm10447_vm7, %vm10438_vm6  ;;  %vm4982_vm7 = vcmp.lt.s32.totalorder %v4785_v13, %v10095_v57 }
 0x4d7   : > { %7762 = vmatpush3.bf16.msk.msra.mxu0 %vm11737_vm0, %v11774_v61  ;;  %vm10468_vm8 = vmand %vm11954_vm5, %vm4968_vm13  ;;  %vm4853_vm13 = vcmp.ge.s32.totalorder %v4754_v42, %v10089_v53  ;;  %vm4951_vm5 = vcmp.lt.s32.totalorder %v4754_v42, %v10095_v57  ;;  %v11975_v42 = vmov 0 }
 0x4d8   : > { %v11956_v18 = vsel %vm10468_vm8, 4294967295, %v11955_v18  ;;  %vm10480_vm6 = vmand %vm4871_vm9, %vm4969_vm4  ;;  %vm4884_vm4 = vcmp.ge.s32.totalorder %v4785_v13, %v10089_v53  ;;  %v4735_v13 = vadd.s32 32, %v10082_v48 }
 0x4d9   : > { %v11958_v26 = vsel %vm10480_vm6, 4294967295, %v11957_v26  ;;  %vm11742_vm0 = vmpackc.low %vm10480_vm6, %vm10468_vm8  ;;  %vm4837_vm8 = vcmp.ge.s32.totalorder %v4738_v36, %v10089_v53  ;;  %vm4967_vm6 = vcmp.lt.s32.totalorder %v4770_v39, %v10095_v57 }
 0x4da   : > { %7784 = vmatpush3.bf16.msk.msra.mxu1 %vm11742_vm0, %v11774_v61  ;;  %vm10497_vm9 = vmand %vm4852_vm12, %vm4950_vm1 }
 0x4db   : > { %v11960_v63 = vsel %vm10497_vm9, 4294967295, %v11959_v63  ;;  %vm10504_vm15 = vmand %vm4853_vm13, %vm4951_vm5  ;;  %vm4836_vm13 = vcmp.ge.s32.totalorder %v4737_v29, %v10089_v53  ;;  %vm4934_vm5 = vcmp.lt.s32.totalorder %v4737_v29, %v10095_v57  ;;  %v4767_v29 = vadd.s32 288, %v10082_v48 }
 0x4dc   : > { %11961 = vst [vmem:[#allocation19_spill] sm:$0xff] %v11960_v63  ;;  %v11963_v22 = vsel %vm10504_vm15, 4294967295, %v11962_v22  ;;  %vm11745_vm1 = vmpackc.low %vm10504_vm15, %vm10497_vm9  ;;  %vm4935_vm9 = vcmp.lt.s32.totalorder %v4738_v36, %v10095_v57  ;;  %vm4869_vm15 = vcmp.ge.s32.totalorder %v4770_v39, %v10089_v53  ;;  %v11987_v36 = vmov 0  ;;  %v5410_v63 = vld [vmem:[#allocation3 + $0x70] sm:$0xff] }
 0x4dd   : > { %11964 = vst [vmem:[#allocation20_spill] sm:$0xff] %v11963_v22  ;;  %7763 = vmatprep.subr.msk.bf16.mxu0 %vm11745_vm1, %v11774_v61  ;;  %vm10521_vm12 = vmand %vm4884_vm4, %vm4982_vm7  ;;  %vm4966_vm4 = vcmp.lt.s32.totalorder %v4769_v14, %v10095_v57  ;;  %v11992_v39 = vmov 0  ;;  %v4825_v22 = vadd.s32 752, %v10082_v48 }
 0x4de   : > { %v11966_v28 = vsel %vm10521_vm12, 4294967295, %v11965_v28  ;;  %vm10528_vm0 = vmand %vm4885_vm3, %vm4983_vm2  ;;  %vm4868_vm3 = vcmp.ge.s32.totalorder %v4769_v14, %v10089_v53  ;;  %v4750_v14 = vadd.s32 152, %v10082_v48 }
 0x4df   : > { %v11968_v55 = vsel %vm10528_vm0, 4294967295, %v11967_v55  ;;  %vm11748_vm7 = vmpackc.low %vm10528_vm0, %vm10521_vm12  ;;  %vm4851_vm12 = vcmp.ge.s32.totalorder %v4752_v52, %v10089_v53  ;;  %vm4949_vm0 = vcmp.lt.s32.totalorder %v4752_v52, %v10095_v57  ;;  %v11995_v52 = vmov 0 }
 0x4e0   : > { %7785 = vmatprep.subr.msk.bf16.mxu1 %vm11748_vm7, %v11774_v61  ;;  %vm10545_vm2 = vmand %vm4836_vm13, %vm4934_vm5  ;;  %vm4948_vm5 = vcmp.lt.s32.totalorder %v4751_v45, %v10095_v57 }
 0x4e1   : > { %v11970_v51 = vsel %vm10545_vm2, 4294967295, %v11969_v51  ;;  %vm10552_vm1 = vmand %vm4837_vm8, %vm4935_vm9  ;;  %vm4850_vm9 = vcmp.ge.s32.totalorder %v4751_v45, %v10089_v53  ;;  %v4781_v45 = vadd.s32 400, %v10082_v48 }
 0x4e2   : > { %11971 = vst [vmem:[#allocation21_spill] sm:$0xff] %v11970_v51  ;;  %v11973_v46 = vsel %vm10552_vm1, 4294967295, %v11972_v46  ;;  %vm11751_vm13 = vmpackc.low %vm10552_vm1, %vm10545_vm2  ;;  %vm4883_vm2 = vcmp.ge.s32.totalorder %v4784_v1, %v10089_v53  ;;  %vm4981_vm1 = vcmp.lt.s32.totalorder %v4784_v1, %v10095_v57  ;;  %v11997_v1 = vmov 0 }
 0x4e3   : > { %11974 = vst [vmem:[#allocation22_spill] sm:$0xff] %v11973_v46  ;;  %7764 = vmatpush3.bf16.msk.msra.mxu0 %vm11751_vm13, %v11774_v61  ;;  %vm10569_vm8 = vmand %vm4868_vm3, %vm4966_vm4  ;;  %vm4980_vm4 = vcmp.lt.s32.totalorder %v4783_v59, %v10095_v57  ;;  %v12030_v51 = vsub.s32 2, %v10082_v48 }
 0x4e4   : > { %v11976_v42 = vsel %vm10569_vm8, 4294967295, %v11975_v42  ;;  %vm10576_vm7 = vmand %vm4869_vm15, %vm4967_vm6  ;;  %vm4882_vm6 = vcmp.ge.s32.totalorder %v4783_v59, %v10089_v53  ;;  %v4782_v59 = vadd.s32 408, %v10082_v48 }
 0x4e5   : > { %v11978_v7 = vsel %vm10576_vm7, 4294967295, %v11977_v7  ;;  %vm11754_vm3 = vmpackc.low %vm10576_vm7, %vm10569_vm8  ;;  %vm4835_vm8 = vcmp.ge.s32.totalorder %v4736_v20, %v10089_v53  ;;  %vm4933_vm7 = vcmp.lt.s32.totalorder %v4736_v20, %v10095_v57  ;;  %v11999_v20 = vmov 0 }
 0x4e6   : > { %7786 = vmatpush3.bf16.msk.msra.mxu1 %vm11754_vm3, %v11774_v61  ;;  %vm10593_vm15 = vmand %vm4850_vm9, %vm4948_vm5  ;;  %vm4932_vm5 = vcmp.lt.s32.totalorder %v4735_v13, %v10095_v57 }
 0x4e7   : > { %v11980_v16 = vsel %vm10593_vm15, 4294967295, %v11979_v16  ;;  %vm10600_vm13 = vmand %vm4851_vm12, %vm4949_vm0  ;;  %vm4834_vm12 = vcmp.ge.s32.totalorder %v4735_v13, %v10089_v53  ;;  %v4733_v13 = vadd.s32 16, %v10082_v48 }
 0x4e8   : > { %11981 = vst [vmem:[#allocation23_spill] sm:$0xff] %v11980_v16  ;;  %v11983_v24 = vsel %vm10600_vm13, 4294967295, %v11982_v24  ;;  %vm11757_vm9 = vmpackc.low %vm10600_vm13, %vm10593_vm15  ;;  %vm4867_vm15 = vcmp.ge.s32.totalorder %v4768_v33, %v10089_v53  ;;  %vm4965_vm13 = vcmp.lt.s32.totalorder %v4768_v33, %v10095_v57  ;;  %v12002_v33 = vmov 0 }
 0x4e9   : > { %11984 = vst [vmem:[#allocation24_spill] sm:$0xff] %v11983_v24  ;;  %7765 = vmatprep.subr.msk.bf16.mxu0 %vm11757_vm9, %v11774_v61  ;;  %vm10617_vm0 = vmand %vm4882_vm6, %vm4980_vm4  ;;  %vm4964_vm4 = vcmp.lt.s32.totalorder %v4767_v29, %v10095_v57  ;;  %v12027_v16 = vsub.s32 5, %v10082_v48 }
 0x4ea   : > { %v11986_v31 = vsel %vm10617_vm0, 4294967295, %v11985_v31  ;;  %vm10624_vm3 = vmand %vm4883_vm2, %vm4981_vm1  ;;  %vm4866_vm2 = vcmp.ge.s32.totalorder %v4767_v29, %v10089_v53  ;;  %v4734_v29 = vadd.s32 24, %v10082_v48 }
 0x4eb   : > { %v11988_v36 = vsel %vm10624_vm3, 4294967295, %v11987_v36  ;;  %vm11760_vm6 = vmpackc.low %vm10624_vm3, %vm10617_vm0  ;;  %vm4849_vm0 = vcmp.ge.s32.totalorder %v4750_v14, %v10089_v53  ;;  %vm4947_vm3 = vcmp.lt.s32.totalorder %v4750_v14, %v10095_v57  ;;  %v12005_v14 = vmov 0 }
 0x4ec   : > { %7787 = vmatprep.subr.msk.bf16.mxu1 %vm11760_vm6, %v11774_v61  ;;  %vm10641_vm1 = vmand %vm4834_vm12, %vm4932_vm5  ;;  %vm4946_vm5 = vcmp.lt.s32.totalorder %v4749_v38, %v10095_v57  ;;  %v5444_v24 = vrot.slane %v10444_v0, %v12027_v16  ;;  %v4764_v16 = vadd.s32 264, %v10082_v48 }
 0x4ed   : > { %v11990_v49 = vsel %vm10641_vm1, 4294967295, %v11989_v49  ;;  %vm10648_vm9 = vmand %vm4835_vm8, %vm4933_vm7  ;;  %vm4848_vm8 = vcmp.ge.s32.totalorder %v4749_v38, %v10089_v53  ;;  %v4765_v38 = vadd.s32 272, %v10082_v48 }
 0x4ee   : > { %11991 = vst [vmem:[#allocation25_spill] sm:$0xff] %v11990_v49  ;;  %v11993_v39 = vsel %vm10648_vm9, 4294967295, %v11992_v39  ;;  %vm11763_vm12 = vmpackc.low %vm10648_vm9, %vm10641_vm1  ;;  %vm4881_vm1 = vcmp.ge.s32.totalorder %v4782_v59, %v10089_v53  ;;  %vm4979_vm9 = vcmp.lt.s32.totalorder %v4782_v59, %v10095_v57  ;;  %v12007_v59 = vmov 0 }
 0x4ef   : > { %11994 = vst [vmem:[#allocation26_spill] sm:$0xff] %v11993_v39  ;;  %7766 = vmatpush3.bf16.msk.msra.mxu0 %vm11763_vm12, %v11774_v61  ;;  %vm10665_vm7 = vmand %vm4866_vm2, %vm4964_vm4  ;;  %vm4978_vm4 = vcmp.lt.s32.totalorder %v4781_v45, %v10095_v57  ;;  %v12023_v49 = vsub.s32 0, %v10082_v48  ;;  %v5408_v39 = vld [vmem:[#allocation3 + $0x60] sm:$0xff] }
 0x4f0   : > { %v11996_v52 = vsel %vm10665_vm7, 4294967295, %v11995_v52  ;;  %vm10672_vm6 = vmand %vm4867_vm15, %vm4965_vm13  ;;  %vm4880_vm15 = vcmp.ge.s32.totalorder %v4781_v45, %v10089_v53  ;;  %v4766_v45 = vadd.s32 280, %v10082_v48 }
 0x4f1   : > { %v11998_v1 = vsel %vm10672_vm6, 4294967295, %v11997_v1  ;;  %vm11766_vm2 = vmpackc.low %vm10672_vm6, %vm10665_vm7  ;;  %vm4833_vm7 = vcmp.ge.s32.totalorder %v4734_v29, %v10089_v53  ;;  %vm4931_vm6 = vcmp.lt.s32.totalorder %v4734_v29, %v10095_v57  ;;  %v4748_v29 = vadd.s32 136, %v10082_v48 }
 0x4f2   : > { %7788 = vmatpush3.bf16.msk.msra.mxu1 %vm11766_vm2, %v11774_v61  ;;  %vm10689_vm13 = vmand %vm4848_vm8, %vm4946_vm5  ;;  %vm4930_vm5 = vcmp.lt.s32.totalorder %v4733_v13, %v10095_v57 }
 0x4f3   : > { %v12000_v20 = vsel %vm10689_vm13, 4294967295, %v11999_v20  ;;  %vm10696_vm12 = vmand %vm4849_vm0, %vm4947_vm3  ;;  %vm4832_vm0 = vcmp.ge.s32.totalorder %v4733_v13, %v10089_v53  ;;  %v12009_v13 = vmov 0 }
 0x4f4   : > { %12001 = vst [vmem:[#allocation27_spill] sm:$0xff] %v12000_v20  ;;  %v12003_v33 = vsel %vm10696_vm12, 4294967295, %v12002_v33  ;;  %vm11770_vm8 = vmpackc.low %vm10696_vm12, %vm10689_vm13  ;;  %vm4865_vm13 = vcmp.ge.s32.totalorder %v4766_v45, %v10089_v53  ;;  %vm4963_vm12 = vcmp.lt.s32.totalorder %v4766_v45, %v10095_v57  ;;  %v4780_v45 = vadd.s32 392, %v10082_v48 }
 0x4f5   : > { %12004 = vst [vmem:[#allocation28_spill] sm:$0xff] %v12003_v33  ;;  %7767 = vmatprep.subr.msk.bf16.mxu0 %vm11770_vm8, %v11774_v61  ;;  %vm10713_vm3 = vmand %vm4880_vm15, %vm4978_vm4  ;;  %vm4962_vm4 = vcmp.lt.s32.totalorder %v4765_v38, %v10095_v57  ;;  %v12016_v33 = vmov 0  ;;  %v12018_v20 = vmov 0 }
 0x4f6   : > { %v12006_v14 = vsel %vm10713_vm3, 4294967295, %v12005_v14  ;;  %vm10720_vm2 = vmand %vm4881_vm1, %vm4979_vm9  ;;  %vm4864_vm1 = vcmp.ge.s32.totalorder %v4765_v38, %v10089_v53  ;;  %v12015_v38 = vmov 1.0|1.0  }
 0x4f7   : > { %v12008_v59 = vsel %vm10720_vm2, 4294967295, %v12007_v59  ;;  %vm11779_vm15 = vmpackc.low %vm10720_vm2, %vm10713_vm3  ;;  %vm4847_vm3 = vcmp.ge.s32.totalorder %v4748_v29, %v10089_v53  ;;  %vm4961_vm2 = vcmp.lt.s32.totalorder %v4764_v16, %v10095_v57 }
 0x4f8   : > { %7789 = vmatprep.subr.msk.bf16.mxu1 %vm11779_vm15, %v11774_v61  ;;  %vm10737_vm9 = vmand %vm4832_vm0, %vm4930_vm5  ;;  %v4779_v61 = vadd.s32 384, %v10082_v48  ;;  %vm4944_vm5 = vcmp.lt.s32.totalorder %v4747_v3, %v10095_v57 }
 0x4f9   : > { %v12010_v13 = vsel %vm10737_vm9, 4294967295, %v12009_v13  ;;  %vm10744_vm8 = vmand %vm4833_vm7, %vm4931_vm6  ;;  %vm4846_vm7 = vcmp.ge.s32.totalorder %v4747_v3, %v10089_v53  ;;  %v12020_v3 = vmov 0 }
 0x4fa   : > { %12011 = vst [vmem:[#allocation29_spill] sm:$0xff] %v12010_v13  ;;  %v12013_v9 = vsel %vm10744_vm8, 4294967295, %v12012_v9  ;;  %vm11781_vm0 = vmpackc.low %vm10744_vm8, %vm10737_vm9  ;;  %v5424_v13 = vrot.slane %v10444_v0, %v12023_v49  ;;  %v5413_v49 = vld [vmem:[#allocation3 + $0x88] sm:$0xff]  ;;  %vm4928_vm8 = vcmp.lt.s32.totalorder %v10082_v48, %v10095_v57 }
 0x4fb   : > { %12014 = vst [vmem:[#allocation30_spill] sm:$0xff] %v12013_v9  ;;  %7768 = vmatpush3.bf16.msk.msra.mxu0 %vm11781_vm0, %v12015_v38  ;;  %vm10762_vm6 = vmand %vm4864_vm1, %vm4962_vm4  ;;  %vm4945_vm0 = vcmp.lt.s32.totalorder %v4748_v29, %v10095_v57  ;;  %vm4976_vm4 = vcmp.lt.s32.totalorder %v4779_v61, %v10095_v57  ;;  %v4732_v29 = vadd.s32 8, %v10082_v48  ;;  %v12024_v9 = vmov 0 }
 0x4fc   : > { %v12017_v33 = vsel %vm10762_vm6, 4294967295, %v12016_v33  ;;  %vm10770_vm15 = vmand %vm4865_vm13, %vm4963_vm12  ;;  %vm4878_vm13 = vcmp.ge.s32.totalorder %v4779_v61, %v10089_v53  ;;  %v4763_v61 = vadd.s32 256, %v10082_v48  ;;  %v5451_v46 = vmul.f32 %v5424_v13, %v5408_v39 }
 0x4fd   : > { %v12019_v20 = vsel %vm10770_vm15, 4294967295, %v12018_v20  ;;  %vm11785_vm1 = vmpackc.low %vm10770_vm15, %vm10762_vm6  ;;  %v5456_v40 = vmul.f32 %v5444_v24, %v5413_v49  ;;  %v4826_v39 = vadd.s32 760, %v10082_v48  ;;  %v12036_v13 = vmov 0 }
 0x4fe   : > { %7790 = vmatpush3.bf16.msk.msra.mxu1 %vm11785_vm1, %v12015_v38  ;;  %vm10787_vm12 = vmand %vm4846_vm7, %vm4944_vm5  ;;  %vm4879_vm1 = vcmp.ge.s32.totalorder %v4780_v45, %v10089_v53  ;;  %vm4977_vm7 = vcmp.lt.s32.totalorder %v4780_v45, %v10095_v57  ;;  %v12028_v45 = vmov 0  ;;  %vm4863_vm15 = vcmp.ge.s32.totalorder %v4764_v16, %v10089_v53 }
 0x4ff   : > { %v12021_v3 = vsel %vm10787_vm12, 4294967295, %v12020_v3  ;;  %vm10797_vm9 = vmand %vm4847_vm3, %vm4945_vm0  ;;  %vm4830_vm0 = vcmp.ge.s32.totalorder %v10082_v48, %v10089_v53  ;;  %v4809_v49 = vadd.s32 624, %v10082_v48 }
 0x500   : > { %12022 = vst [vmem:[#allocation31_spill] sm:$0xff] %v12021_v3  ;;  %v12025_v9 = vsel %vm10797_vm9, 4294967295, %v12024_v9  ;;  %vm11796_vm5 = vmpackc.low %vm10797_vm9, %vm10787_vm12  ;;  %v12031_v3 = vmov 0  ;;  %vm4960_vm12 = vcmp.lt.s32.totalorder %v4763_v61, %v10095_v57 }
 0x501   : > { %12026 = vst [vmem:[#allocation32_spill] sm:$0xff] %v12025_v9  ;;  %7769 = vmatprep.subr.msk.bf16.mxu0 %vm11796_vm5, %v12015_v38  ;;  %vm10817_vm3 = vmand %vm4878_vm13, %vm4976_vm4  ;;  %v5432_v9 = vrot.slane %v10444_v0, %v12030_v51  ;;  %vm4831_vm13 = vcmp.ge.s32.totalorder %v4732_v29, %v10089_v53  ;;  %vm4929_vm4 = vcmp.lt.s32.totalorder %v4732_v29, %v10095_v57  ;;  %v12033_v51 = vmov 0 }
 0x502   : > { %v12029_v45 = vsel %vm10817_vm3, 4294967295, %v12028_v45  ;;  %vm10829_vm6 = vmand %vm4879_vm1, %vm4977_vm7  ;;  %vm4862_vm7 = vcmp.ge.s32.totalorder %v4763_v61, %v10089_v53  ;;  %v5457_v29 = vpack.c.bf16 %v5451_v46, %v5451_v46  ;;  %v12038_v61 = vmov 0 }
 0x503   : > { %v12032_v3 = vsel %vm10829_vm6, 4294967295, %v12031_v3  ;;  %vm11803_vm5 = vmpackc.low %vm10829_vm6, %vm10817_vm3  ;;  %v5453_v24 = vmul.f32 %v5432_v9, %v5410_v63  ;;  %v4810_v9 = vadd.s32 632, %v10082_v48  ;;  %v5462_v63 = vpack.c.bf16 %v5456_v40, %v5456_v40 }
 0x504   : > { %7791 = vmatprep.subr.msk.bf16.mxu1 %vm11803_vm5, %v12015_v38  ;;  %vm10846_vm1 = vmand %vm4830_vm0, %vm4928_vm8  ;;  %v12040_v46 = vmov 0  ;;  %vm4925_vm3 = vcmp.ge.s32.totalorder %v4826_v39, %v10089_v53  ;;  %v12042_v40 = vmov 0 }
 0x505   : > { %v12034_v51 = vsel %vm10846_vm1, 4294967295, %v12033_v51  ;;  %vm10853_vm9 = vmand %vm4831_vm13, %vm4929_vm4  ;;  %vm4924_vm13 = vcmp.ge.s32.totalorder %v4825_v22, %v10089_v53  ;;  %vm5022_vm4 = vcmp.lt.s32.totalorder %v4825_v22, %v10095_v57  ;;  %v5459_v16 = vpack.c.bf16 %v5453_v24, %v5453_v24 }
 0x506   : > { %12035 = vst [vmem:[#allocation33_spill] sm:$0xff] %v12034_v51  ;;  %v12037_v13 = vsel %vm10853_vm9, 4294967295, %v12036_v13  ;;  %vm11807_vm8 = vmpackc.low %vm10853_vm9, %vm10846_vm1  ;;  %vm5023_vm1 = vcmp.lt.s32.totalorder %v4826_v39, %v10095_v57  ;;  %v4823_v51 = vadd.s32 736, %v10082_v48  ;;  %v4824_v22 = vadd.s32 744, %v10082_v48 }
 0x507   : > { %7770 = vmatpush3.bf16.msk.msra.mxu0 %vm11807_vm8, %v12015_v38  ;;  %vm10870_vm0 = vmand %vm4862_vm7, %vm4960_vm12  ;;  %vm5006_vm7 = vcmp.lt.s32.totalorder %v4809_v49, %v10095_v57  ;;  %v12045_v39 = vmov 0  ;;  %vm4909_vm9 = vcmp.ge.s32.totalorder %v4810_v9, %v10089_v53  ;;  %v4807_v24 = vadd.s32 608, %v10082_v48 }
 0x508   : > { %v12039_v61 = vsel %vm10870_vm0, 4294967295, %v12038_v61  ;;  %vm10877_vm5 = vmand %vm4863_vm15, %vm4961_vm2  ;;  %vm4908_vm15 = vcmp.ge.s32.totalorder %v4809_v49, %v10089_v53  ;;  %v4808_v49 = vadd.s32 616, %v10082_v48  ;;  %vm5021_vm6 = vcmp.lt.s32.totalorder %v4824_v22, %v10095_v57 }
 0x509   : > { %v12041_v46 = vsel %vm10877_vm5, 4294967295, %v12040_v46  ;;  %vm11810_vm12 = vmpackc.low %vm10877_vm5, %vm10870_vm0  ;;  %vm5007_vm0 = vcmp.lt.s32.totalorder %v4810_v9, %v10095_v57  ;;  %v12050_v9 = vmov 0  ;;  %vm4923_vm5 = vcmp.ge.s32.totalorder %v4824_v22, %v10089_v53 }
 0x50a   : > { %7792 = vmatpush3.bf16.msk.msra.mxu1 %vm11810_vm12, %v12015_v38  ;;  %5496 = vmatmul.mubr.bf16.vlgmr.msra.gmra.mxu0 %v5457_v29  ;;  %vm10894_vm2 = vmand %vm4924_vm13, %vm5022_vm4  ;;  %v12047_v29 = vmov 0  ;;  %vm5020_vm4 = vcmp.lt.s32.totalorder %v4823_v51, %v10095_v57  ;;  %v12056_v22 = vmov 0 }
 0x50b   : > { %v12043_v40 = vsel %vm10894_vm2, 4294967295, %v12042_v40  ;;  %vm10901_vm8 = vmand %vm4925_vm3, %vm5023_vm1  ;;  %5575 = vmatprep.mubr.bf16.mxu0 %v5462_v63  ;;  %vm4922_vm1 = vcmp.ge.s32.totalorder %v4823_v51, %v10089_v53  ;;  %v4821_v63 = vadd.s32 720, %v10082_v48  ;;  %v12053_v51 = vmov 0 }
 0x50c   : > { %12044 = vst [vmem:[#allocation34_spill] sm:$0xff] %v12043_v40  ;;  %v12046_v39 = vsel %vm10901_vm8, 4294967295, %v12045_v39  ;;  %vm11813_vm13 = vmpackc.low %vm10901_vm8, %vm10894_vm2  ;;  %vm4907_vm2 = vcmp.ge.s32.totalorder %v4808_v49, %v10089_v53  ;;  %vm5005_vm8 = vcmp.lt.s32.totalorder %v4808_v49, %v10095_v57  ;;  %v4806_v49 = vadd.s32 600, %v10082_v48 }
 0x50d   : > { %5536 = vmatmul.mubr.bf16.vlgmr.msra.gmra.mxu1 %v5459_v16  ;;  %7799 = vmatprep.subr.msk.bf16.mxu0 %vm11813_vm13, %v12015_v38  ;;  %vm10918_vm3 = vmand %vm4908_vm15, %vm5006_vm7  ;;  %vm5004_vm7 = vcmp.lt.s32.totalorder %v4807_v24, %v10095_v57  ;;  %v4822_v16 = vadd.s32 728, %v10082_v48  ;;  %v12116_v40 = vmov 0 }
 0x50e   : > { %v12048_v29 = vsel %vm10918_vm3, 4294967295, %v12047_v29  ;;  %vm10925_vm12 = vmand %vm4909_vm9, %vm5007_vm0  ;;  %vm4906_vm0 = vcmp.ge.s32.totalorder %v4807_v24, %v10089_v53  ;;  %v12059_v24 = vmov 0 }
 0x50f   : > { %12049 = vst [vmem:[#allocation35_spill] sm:$0xff] %v12048_v29  ;;  %v12051_v9 = vsel %vm10925_vm12, 4294967295, %v12050_v9  ;;  %vm11817_vm15 = vmpackc.low %vm10925_vm12, %vm10918_vm3  ;;  %v4805_v29 = vadd.s32 592, %v10082_v48  ;;  %vm4921_vm3 = vcmp.ge.s32.totalorder %v4822_v16, %v10089_v53  ;;  %vm5019_vm12 = vcmp.lt.s32.totalorder %v4822_v16, %v10095_v57 }
 0x510   : > { %12052 = vst [vmem:[#allocation36_spill] sm:$0xff] %v12051_v9  ;;  %7800 = vmatpush3.bf16.msk.msra.mxu0 %vm11817_vm15, %v12015_v38  ;;  %vm10942_vm9 = vmand %vm4922_vm1, %vm5020_vm4  ;;  %vm5018_vm4 = vcmp.lt.s32.totalorder %v4821_v63, %v10095_v57  ;;  %v12062_v9 = vmov 0  ;;  %v4820_v16 = vadd.s32 712, %v10082_v48 }
 0x511   : > { %v12054_v51 = vsel %vm10942_vm9, 4294967295, %v12053_v51  ;;  %vm10949_vm13 = vmand %vm4923_vm5, %vm5021_vm6  ;;  %vm4920_vm5 = vcmp.ge.s32.totalorder %v4821_v63, %v10089_v53  ;;  %v12065_v63 = vmov 0 }
 0x512   : > { %12055 = vst [vmem:[#allocation37_spill] sm:$0xff] %v12054_v51  ;;  %v12057_v22 = vsel %vm10949_vm13, 4294967295, %v12056_v22  ;;  %vm11822_vm1 = vmpackc.low %vm10949_vm13, %vm10942_vm9  ;;  %v4819_v51 = vadd.s32 704, %v10082_v48  ;;  %vm4905_vm9 = vcmp.ge.s32.totalorder %v4806_v49, %v10089_v53  ;;  %vm5003_vm13 = vcmp.lt.s32.totalorder %v4806_v49, %v10095_v57 }
 0x513   : > { %12058 = vst [vmem:[#allocation38_spill] sm:$0xff] %v12057_v22  ;;  %7801 = vmatprep.subr.msk.bf16.mxu0 %vm11822_vm1, %v12015_v38  ;;  %vm10966_vm6 = vmand %vm4906_vm0, %vm5004_vm7  ;;  %vm5002_vm7 = vcmp.lt.s32.totalorder %v4805_v29, %v10095_v57  ;;  %v12068_v22 = vmov 0  ;;  %v4804_v49 = vadd.s32 584, %v10082_v48 }
 0x514   : > { %v12060_v24 = vsel %vm10966_vm6, 4294967295, %v12059_v24  ;;  %vm10973_vm15 = vmand %vm4907_vm2, %vm5005_vm8  ;;  %vm4904_vm2 = vcmp.ge.s32.totalorder %v4805_v29, %v10089_v53  ;;  %v12071_v29 = vmov 0 }
 0x515   : > { %12061 = vst [vmem:[#allocation39_spill] sm:$0xff] %v12060_v24  ;;  %v12063_v9 = vsel %vm10973_vm15, 4294967295, %v12062_v9  ;;  %vm11827_vm0 = vmpackc.low %vm10973_vm15, %vm10966_vm6  ;;  %v4803_v24 = vadd.s32 576, %v10082_v48  ;;  %vm4919_vm6 = vcmp.ge.s32.totalorder %v4820_v16, %v10089_v53  ;;  %vm5017_vm15 = vcmp.lt.s32.totalorder %v4820_v16, %v10095_v57 }
 0x516   : > { %12064 = vst [vmem:[#allocation40_spill] sm:$0xff] %v12063_v9  ;;  %7802 = vmatpush3.bf16.msk.msra.mxu0 %vm11827_vm0, %v12015_v38  ;;  %vm10990_vm8 = vmand %vm4920_vm5, %vm5018_vm4  ;;  %vm5016_vm4 = vcmp.lt.s32.totalorder %v4819_v51, %v10095_v57  ;;  %v12074_v9 = vmov 0  ;;  %v4818_v16 = vadd.s32 696, %v10082_v48 }
 0x517   : > { %v12066_v63 = vsel %vm10990_vm8, 4294967295, %v12065_v63  ;;  %vm10997_vm1 = vmand %vm4921_vm3, %vm5019_vm12  ;;  %vm4918_vm3 = vcmp.ge.s32.totalorder %v4819_v51, %v10089_v53  ;;  %v12077_v51 = vmov 0 }
 0x518   : > { %12067 = vst [vmem:[#allocation41_spill] sm:$0xff] %v12066_v63  ;;  %v12069_v22 = vsel %vm10997_vm1, 4294967295, %v12068_v22  ;;  %vm11832_vm5 = vmpackc.low %vm10997_vm1, %vm10990_vm8  ;;  %v4817_v63 = vadd.s32 688, %v10082_v48  ;;  %vm4903_vm8 = vcmp.ge.s32.totalorder %v4804_v49, %v10089_v53  ;;  %vm5001_vm1 = vcmp.lt.s32.totalorder %v4804_v49, %v10095_v57 }
 0x519   : > { %12070 = vst [vmem:[#allocation42_spill] sm:$0xff] %v12069_v22  ;;  %7803 = vmatprep.subr.msk.bf16.mxu0 %vm11832_vm5, %v12015_v38  ;;  %vm11014_vm12 = vmand %vm4904_vm2, %vm5002_vm7  ;;  %vm5000_vm7 = vcmp.lt.s32.totalorder %v4803_v24, %v10095_v57  ;;  %v12080_v22 = vmov 0  ;;  %v4802_v49 = vadd.s32 568, %v10082_v48 }
 0x51a   : > { %v12072_v29 = vsel %vm11014_vm12, 4294967295, %v12071_v29  ;;  %vm11021_vm0 = vmand %vm4905_vm9, %vm5003_vm13  ;;  %vm4902_vm9 = vcmp.ge.s32.totalorder %v4803_v24, %v10089_v53  ;;  %v12083_v24 = vmov 0 }
 0x51b   : > { %12073 = vst [vmem:[#allocation43_spill] sm:$0xff] %v12072_v29  ;;  %v12075_v9 = vsel %vm11021_vm0, 4294967295, %v12074_v9  ;;  %vm11837_vm2 = vmpackc.low %vm11021_vm0, %vm11014_vm12  ;;  %v4801_v29 = vadd.s32 560, %v10082_v48  ;;  %vm4917_vm12 = vcmp.ge.s32.totalorder %v4818_v16, %v10089_v53  ;;  %vm5015_vm0 = vcmp.lt.s32.totalorder %v4818_v16, %v10095_v57 }
 0x51c   : > { %12076 = vst [vmem:[#allocation44_spill] sm:$0xff] %v12075_v9  ;;  %7804 = vmatpush3.bf16.msk.msra.mxu0 %vm11837_vm2, %v12015_v38  ;;  %vm11038_vm13 = vmand %vm4918_vm3, %vm5016_vm4  ;;  %vm5014_vm4 = vcmp.lt.s32.totalorder %v4817_v63, %v10095_v57  ;;  %v12086_v9 = vmov 0  ;;  %v4816_v16 = vadd.s32 680, %v10082_v48 }
 0x51d   : > { %v12078_v51 = vsel %vm11038_vm13, 4294967295, %v12077_v51  ;;  %vm11045_vm5 = vmand %vm4919_vm6, %vm5017_vm15  ;;  %vm4916_vm6 = vcmp.ge.s32.totalorder %v4817_v63, %v10089_v53  ;;  %v12089_v63 = vmov 0 }
 0x51e   : > { %12079 = vst [vmem:[#allocation45_spill] sm:$0xff] %v12078_v51  ;;  %v12081_v22 = vsel %vm11045_vm5, 4294967295, %v12080_v22  ;;  %vm11842_vm3 = vmpackc.low %vm11045_vm5, %vm11038_vm13  ;;  %v4815_v51 = vadd.s32 672, %v10082_v48  ;;  %vm4901_vm13 = vcmp.ge.s32.totalorder %v4802_v49, %v10089_v53  ;;  %vm4999_vm5 = vcmp.lt.s32.totalorder %v4802_v49, %v10095_v57 }
 0x51f   : > { %12082 = vst [vmem:[#allocation46_spill] sm:$0xff] %v12081_v22  ;;  %7805 = vmatprep.subr.msk.bf16.mxu0 %vm11842_vm3, %v12015_v38  ;;  %vm11062_vm15 = vmand %vm4902_vm9, %vm5000_vm7  ;;  %vm4998_vm7 = vcmp.lt.s32.totalorder %v4801_v29, %v10095_v57  ;;  %v12092_v22 = vmov 0  ;;  %v4800_v49 = vadd.s32 552, %v10082_v48 }
 0x520   : > { %v12084_v24 = vsel %vm11062_vm15, 4294967295, %v12083_v24  ;;  %vm11069_vm2 = vmand %vm4903_vm8, %vm5001_vm1  ;;  %vm4900_vm8 = vcmp.ge.s32.totalorder %v4801_v29, %v10089_v53  ;;  %v12095_v29 = vmov 0 }
 0x521   : > { %12085 = vst [vmem:[#allocation47_spill] sm:$0xff] %v12084_v24  ;;  %v12087_v9 = vsel %vm11069_vm2, 4294967295, %v12086_v9  ;;  %vm11847_vm9 = vmpackc.low %vm11069_vm2, %vm11062_vm15  ;;  %v4799_v24 = vadd.s32 544, %v10082_v48  ;;  %vm4915_vm15 = vcmp.ge.s32.totalorder %v4816_v16, %v10089_v53  ;;  %vm5013_vm2 = vcmp.lt.s32.totalorder %v4816_v16, %v10095_v57 }
 0x522   : > { %12088 = vst [vmem:[#allocation48_spill] sm:$0xff] %v12087_v9  ;;  %7806 = vmatpush3.bf16.msk.msra.mxu0 %vm11847_vm9, %v12015_v38  ;;  %vm11086_vm1 = vmand %vm4916_vm6, %vm5014_vm4  ;;  %vm5012_vm4 = vcmp.lt.s32.totalorder %v4815_v51, %v10095_v57  ;;  %v12098_v9 = vmov 0  ;;  %v4814_v16 = vadd.s32 664, %v10082_v48 }
 0x523   : > { %v12090_v63 = vsel %vm11086_vm1, 4294967295, %v12089_v63  ;;  %vm11093_vm3 = vmand %vm4917_vm12, %vm5015_vm0  ;;  %vm4914_vm12 = vcmp.ge.s32.totalorder %v4815_v51, %v10089_v53  ;;  %v12101_v51 = vmov 0 }
 0x524   : > { %12091 = vst [vmem:[#allocation49_spill] sm:$0xff] %v12090_v63  ;;  %v12093_v22 = vsel %vm11093_vm3, 4294967295, %v12092_v22  ;;  %vm11852_vm6 = vmpackc.low %vm11093_vm3, %vm11086_vm1  ;;  %v4813_v63 = vadd.s32 656, %v10082_v48  ;;  %vm4899_vm1 = vcmp.ge.s32.totalorder %v4800_v49, %v10089_v53  ;;  %vm4997_vm3 = vcmp.lt.s32.totalorder %v4800_v49, %v10095_v57 }
 0x525   : > { %12094 = vst [vmem:[#allocation50_spill] sm:$0xff] %v12093_v22  ;;  %7807 = vmatprep.subr.msk.bf16.mxu0 %vm11852_vm6, %v12015_v38  ;;  %vm11110_vm0 = vmand %vm4900_vm8, %vm4998_vm7  ;;  %vm4996_vm7 = vcmp.lt.s32.totalorder %v4799_v24, %v10095_v57  ;;  %v12104_v22 = vmov 0  ;;  %v4798_v49 = vadd.s32 536, %v10082_v48 }
 0x526   : > { %v12096_v29 = vsel %vm11110_vm0, 4294967295, %v12095_v29  ;;  %vm11117_vm9 = vmand %vm4901_vm13, %vm4999_vm5  ;;  %vm4898_vm13 = vcmp.ge.s32.totalorder %v4799_v24, %v10089_v53  ;;  %v12107_v24 = vmov 0 }
 0x527   : > { %12097 = vst [vmem:[#allocation51_spill] sm:$0xff] %v12096_v29  ;;  %v12099_v9 = vsel %vm11117_vm9, 4294967295, %v12098_v9  ;;  %vm11857_vm8 = vmpackc.low %vm11117_vm9, %vm11110_vm0  ;;  %v4797_v29 = vadd.s32 528, %v10082_v48  ;;  %vm4913_vm0 = vcmp.ge.s32.totalorder %v4814_v16, %v10089_v53  ;;  %vm5011_vm9 = vcmp.lt.s32.totalorder %v4814_v16, %v10095_v57 }
 0x528   : > { %12100 = vst [vmem:[#allocation52_spill] sm:$0xff] %v12099_v9  ;;  %7808 = vmatpush3.bf16.msk.msra.mxu0 %vm11857_vm8, %v12015_v38  ;;  %vm11134_vm5 = vmand %vm4914_vm12, %vm5012_vm4  ;;  %vm5010_vm4 = vcmp.lt.s32.totalorder %v4813_v63, %v10095_v57  ;;  %v12110_v9 = vmov 0  ;;  %v4812_v16 = vadd.s32 648, %v10082_v48 }
 0x529   : > { %v12102_v51 = vsel %vm11134_vm5, 4294967295, %v12101_v51  ;;  %vm11141_vm6 = vmand %vm4915_vm15, %vm5013_vm2  ;;  %vm4912_vm15 = vcmp.ge.s32.totalorder %v4813_v63, %v10089_v53  ;;  %v12113_v63 = vmov 0 }
 0x52a   : > { %12103 = vst [vmem:[#allocation53_spill] sm:$0xff] %v12102_v51  ;;  %v12105_v22 = vsel %vm11141_vm6, 4294967295, %v12104_v22  ;;  %vm11863_vm12 = vmpackc.low %vm11141_vm6, %vm11134_vm5  ;;  %v4811_v51 = vadd.s32 640, %v10082_v48  ;;  %vm4897_vm5 = vcmp.ge.s32.totalorder %v4798_v49, %v10089_v53  ;;  %vm4995_vm6 = vcmp.lt.s32.totalorder %v4798_v49, %v10095_v57 }
 0x52b   : > { %12106 = vst [vmem:[#allocation54_spill] sm:$0xff] %v12105_v22  ;;  %7809 = vmatprep.subr.msk.bf16.mxu0 %vm11863_vm12, %v12015_v38  ;;  %vm11158_vm2 = vmand %vm4898_vm13, %vm4996_vm7  ;;  %vm4994_vm7 = vcmp.lt.s32.totalorder %v4797_v29, %v10095_v57  ;;  %v4795_v22 = vadd.s32 512, %v10082_v48  ;;  %v4796_v49 = vadd.s32 520, %v10082_v48 }
 0x52c   : > { %v12108_v24 = vsel %vm11158_vm2, 4294967295, %v12107_v24  ;;  %vm11165_vm8 = vmand %vm4899_vm1, %vm4997_vm3  ;;  %vm4896_vm1 = vcmp.ge.s32.totalorder %v4797_v29, %v10089_v53 }
 0x52d   : > { %12109 = vst [vmem:[#allocation55_spill] sm:$0xff] %v12108_v24  ;;  %v12111_v9 = vsel %vm11165_vm8, 4294967295, %v12110_v9  ;;  %vm11869_vm13 = vmpackc.low %vm11165_vm8, %vm11158_vm2  ;;  %v12121_v24 = vsub.s32 4, %v10082_v48  ;;  %vm4895_vm2 = vcmp.ge.s32.totalorder %v4796_v49, %v10089_v53  ;;  %vm4993_vm8 = vcmp.lt.s32.totalorder %v4796_v49, %v10095_v57  ;;  %v5799_v49 = vld [vmem:[#allocation3 + $0xa8] sm:$0xff] }
 0x52e   : > { %12112 = vst [vmem:[#allocation56_spill] sm:$0xff] %v12111_v9  ;;  %7810 = vmatpush3.bf16.msk.msra.mxu0 %vm11869_vm13, %v12015_v38  ;;  %vm11183_vm3 = vmand %vm4912_vm15, %vm5010_vm4  ;;  %vm5008_vm4 = vcmp.lt.s32.totalorder %v4811_v51, %v10095_v57 }
 0x52f   : > { %v12114_v63 = vsel %vm11183_vm3, 4294967295, %v12113_v63  ;;  %vm11190_vm12 = vmand %vm4913_vm0, %vm5011_vm9  ;;  %vm4910_vm0 = vcmp.ge.s32.totalorder %v4811_v51, %v10089_v53  ;;  %v5440_v9 = vrot.slane %v10444_v0, %v12121_v24 }
 0x530   : > { %12115 = vst [vmem:[#allocation57_spill] sm:$0xff] %v12114_v63  ;;  %v12117_v40 = vsel %vm11190_vm12, 4294967295, %v12116_v40  ;;  %vm11871_vm15 = vmpackc.low %vm11190_vm12, %vm11183_vm3  ;;  %v5412_v63 = vld [vmem:[#allocation3 + $0x80] sm:$0xff]  ;;  %vm4992_vm3 = vcmp.lt.s32.totalorder %v4795_v22, %v10095_v57 }
 0x531   : > { %12118 = vst [vmem:[#allocation58_spill] sm:$0xff] %v12117_v40  ;;  %7811 = vmatprep.subr.msk.bf16.mxu0 %vm11871_vm15, %v12015_v38  ;;  %vm11207_vm9 = vmand %vm4896_vm1, %vm4994_vm7  ;;  %vm4911_vm15 = vcmp.ge.s32.totalorder %v4812_v16, %v10089_v53  ;;  %vm5009_vm1 = vcmp.lt.s32.totalorder %v4812_v16, %v10095_v57  ;;  %v5455_v24 = vmul.f32 %v5440_v9, %v5412_v63  ;;  %v12177_v63 = vsub.s32 3, %v10082_v48 }
 0x532   : > { %vm11217_vm13 = vmand %vm4897_vm5, %vm4995_vm6  ;;  %vm4894_vm5 = vcmp.ge.s32.totalorder %v4795_v22, %v10089_v53 }
 0x533   : > { %vm11879_vm7 = vmpackc.low %vm11217_vm13, %vm11207_vm9  ;;  %v5461_v57 = vpack.c.bf16 %v5455_v24, %v5455_v24  ;;  %v12178_v24 = vsub.s32 2, %v10082_v48 }
 0x534   : > { %7812 = vmatpush3.bf16.msk.msra.mxu0 %vm11879_vm7, %v12015_v38  ;;  %vm11233_vm6 = vmand %vm4910_vm0, %vm5008_vm4  ;;  %vm12138_vm7 = vnez %v11924_v58 }
 0x535   : > { %vm11239_vm12 = vmand %vm4911_vm15, %vm5009_vm1 }
 0x536   : > { %vm11878_vm0 = vmpackc.low %vm11239_vm12, %vm11233_vm6 }
 0x537   : > { %7813 = vmatprep.subr.msk.bf16.mxu0 %vm11878_vm0, %v12015_v38  ;;  %vm11255_vm15 = vmand %vm4894_vm5, %vm4992_vm3  ;;  %vm12135_vm5 = vnez %v11916_v19  ;;  %v9164_v19 = vmov 0  }
 0x538   : > { %vm11259_vm4 = vmand %vm4895_vm2, %vm4993_vm8  ;;  %vm12133_vm2 = vnez %v11906_v6  ;;  %v5372_v6 = vadd.s32 1, %v10082_v48  ;;  %5658 = vmatprep.mubr.bf16.mxu1 %v9164_v19 }
 0x539   : > { %vm11877_vm1 = vmpackc.low %vm11259_vm4, %vm11255_vm15 }
 0x53a   : > { %7814 = vmatpush3.bf16.msk.msra.mxu0 %vm11877_vm1, %v12015_v38  ;;  %vm12132_vm8 = vmpackc.low %vm10132_vm14, %vm10125_vm11  ;;  %vm12136_vm1 = vnez %v11914_v17  ;;  %vm12139_vm11 = vnez %v11922_v27  ;;  %v5373_v17 = vmul.u32 96, %v5372_v6  ;;  %v9165_v27 = vmov 0.0  }
 0x53b   : > { %7843 = vmatprep.subr.msk.bf16.mxu0 %vm12132_vm8, %v12015_v38  ;;  %vm12134_vm3 = vmpackc.low %vm10180_vm10, %vm12133_vm2  ;;  %vm12141_vm8 = vnez %v11932_v37  ;;  %vm12142_vm10 = vnez %v11930_v35 }
 0x53c   : > { %vm12137_vm0 = vmpackc.low %vm12135_vm5, %vm12136_vm1  ;;  %vm12145_vm1 = vnez %v11938_v43  ;;  %vm12147_vm5 = vnez %v11948_v56 }
 0x53d   : > { %5576 = vmatmul.mubr.bf16.vlgmr.msra.gmra.mxu0 %v5461_v57  ;;  %vm12140_vm14 = vmpackc.low %vm12138_vm7, %vm12139_vm11  ;;  %vm12148_vm7 = vnez %v11946_v54 }
 0x53e   : > { %7844 = vmatpush3.bf16.msk.msra.mxu0 %vm12134_vm3, %v12015_v38  ;;  %vm12143_vm2 = vmpackc.low %vm12141_vm8, %vm12142_vm10  ;;  %vm12144_vm3 = vnez %v11940_v41  ;;  %vm12151_vm8 = vnez %v11956_v18  ;;  %v5361_v18 = vadd.s32 256, %v10084_v50 }
 0x53f   : > { %7845 = vmatprep.subr.msk.bf16.mxu0 %vm12137_vm0, %v12015_v38  ;;  %vm12146_vm0 = vmpackc.low %vm12144_vm3, %vm12145_vm1  ;;  %vm12154_vm3 = vnez %v11966_v28  ;;  %v5364_v28 = vadd.s32 640, %v10084_v50 }
 0x540   : > { %vm12149_vm11 = vmpackc.low %vm12147_vm5, %vm12148_vm7  ;;  %vm12157_vm5 = vnez %v11976_v42 }
 0x542   : > { %7846 = vmatpush3.bf16.msk.msra.mxu0 %vm12140_vm14, %v12015_v38  ;;  %vm12150_vm14 = vnez %v11958_v26 }
 0x543   : > { %7847 = vmatprep.subr.msk.bf16.mxu0 %vm12143_vm2, %v12015_v38  ;;  %vm12152_vm10 = vmpackc.low %vm12150_vm14, %vm12151_vm8  ;;  %vm12153_vm2 = vnez %v11968_v55  ;;  %vm12160_vm14 = vnez %v11986_v31 }
 0x544   : > { %vm12155_vm1 = vmpackc.low %vm12153_vm2, %vm12154_vm3  ;;  %vm12163_vm2 = vnez %v11996_v52 }
 0x546   : > { %7848 = vmatpush3.bf16.msk.msra.mxu0 %vm12146_vm0, %v12015_v38  ;;  %vm12156_vm0 = vnez %v11978_v7 }
 0x547   : > { %7849 = vmatprep.subr.msk.bf16.mxu0 %vm12149_vm11, %v12015_v38  ;;  %vm12158_vm7 = vmpackc.low %vm12156_vm0, %vm12157_vm5  ;;  %vm12159_vm11 = vnez %v11988_v36  ;;  %vm12166_vm0 = vnez %v12006_v14 }
 0x548   : > { %vm12161_vm8 = vmpackc.low %vm12159_vm11, %vm12160_vm14  ;;  %vm12169_vm11 = vnez %v12017_v33 }
 0x54a   : > { %7850 = vmatpush3.bf16.msk.msra.mxu0 %vm12152_vm10, %v12015_v38  ;;  %vm12162_vm10 = vnez %v11998_v1 }
 0x54b   : > { %7851 = vmatprep.subr.msk.bf16.mxu0 %vm12155_vm1, %v12015_v38  ;;  %vm12164_vm3 = vmpackc.low %vm12162_vm10, %vm12163_vm2  ;;  %vm12165_vm1 = vnez %v12008_v59  ;;  %vm12172_vm10 = vnez %v12029_v45  ;;  %v5363_v59 = vadd.s32 512, %v10084_v50  ;;  %v5793_v45 = vld [vmem:[#allocation3 + $0x30] ss:$8 sm:$0x30] }
 0x54c   : > { %vm12167_vm5 = vmpackc.low %vm12165_vm1, %vm12166_vm0  ;;  %vm12175_vm1 = vnez %v12039_v61 }
 0x54e   : > { %7852 = vmatpush3.bf16.msk.msra.mxu0 %vm12158_vm7, %v12015_v38  ;;  %vm12168_vm7 = vnez %v12019_v20 }
 0x54f   : > { %7853 = vmatprep.subr.msk.bf16.mxu0 %vm12161_vm8, %v12015_v38  ;;  %vm12170_vm14 = vmpackc.low %vm12168_vm7, %vm12169_vm11  ;;  %vm12171_vm8 = vnez %v12032_v3  ;;  %vm5366_vm7 = vcmp.ge.s32.totalorder %v10084_v50, %v5365_v10  ;;  %vm5375_vm11 = vcmp.lt.s32.totalorder %v5360_v62, %v5373_v17  ;;  %v5792_v3 = vld [vmem:[#allocation3 + $0x30] ss:$8 sm:$0xf] }
 0x550   : > { %vm12173_vm2 = vmpackc.low %vm12171_vm8, %vm12172_vm10  ;;  %vm5369_vm8 = vcmp.ge.s32.totalorder %v5362_v8, %v5365_v10  ;;  %vm5377_vm10 = vcmp.lt.s32.totalorder %v5362_v8, %v5373_v17  ;;  %v5794_v61 = vor.u32 %v5793_v45, %v5792_v3 }
 0x552   : > { %7854 = vmatpush3.bf16.msk.msra.mxu0 %vm12164_vm3, %v12015_v38  ;;  %vm12174_vm3 = vnez %v12041_v46  ;;  %v11397_v46 = vmul.f32 0.10206208, %v5794_v61 }
 0x553   : > { %7855 = vmatprep.subr.msk.bf16.mxu0 %vm12167_vm5, %v12015_v38  ;;  %vm12176_vm0 = vmpackc.low %vm12174_vm3, %vm12175_vm1  ;;  %vm5367_vm5 = vcmp.ge.s32.totalorder %v5360_v62, %v5365_v10  ;;  %vm11880_vm3 = vcmask 1043456  }
 0x554   : > { %v5824_v16 = vrot.slane %v11397_v46, %v12177_v63  ;;  %v5820_v57 = vrot.slane %v11397_v46, %v12178_v24 }
 0x556   : > { %7856 = vmatpush3.bf16.msk.msra.mxu0 %vm12170_vm14, %v12015_v38  ;;  %vm5374_vm14 = vcmp.lt.s32.totalorder %v10084_v50, %v5373_v17  ;;  %v5842_v62 = vmul.f32 %v5824_v16, %v5799_v49  ;;  %v5798_v50 = vld [vmem:[#allocation3 + $0xa0] sm:$0xff] }
 0x557   : > { %7857 = vmatprep.subr.msk.bf16.mxu0 %vm12173_vm2, %v12015_v38  ;;  %vm5381_vm2 = vmand %vm5367_vm5, %vm5375_vm11  ;;  %vm5368_vm5 = vcmp.ge.s32.totalorder %v5361_v18, %v5365_v10  ;;  %v5841_v6 = vmul.f32 %v5820_v57, %v5798_v50 }
 0x558   : > { %v7486_v58 = vsel %vm5381_vm2, 1.0, %v9165_v27  ;;  %vm5380_vm1 = vmand %vm5366_vm7, %vm5374_vm14  ;;  %vm5376_vm7 = vcmp.lt.s32.totalorder %v5361_v18, %v5373_v17  ;;  %vm5371_vm14 = vcmp.ge.s32.totalorder %v5364_v28, %v5365_v10  ;;  %vm5370_vm2 = vcmp.ge.s32.totalorder %v5363_v59, %v5365_v10 }
 0x559   : > { %v11376_v35 = vpack.c.bf16 %v7486_v58, %v7486_v58  ;;  %v7485_v37 = vsel %vm5380_vm1, 1.0, %v9165_v27  ;;  %vm5382_vm11 = vmand %vm5368_vm5, %vm5376_vm7  ;;  %vm5378_vm1 = vcmp.lt.s32.totalorder %v5363_v59, %v5373_v17  ;;  %v5848_v8 = vpack.c.bf16 %v5842_v62, %v5842_v62 }
 0x55a   : > { %7858 = vmatpush3.bf16.msk.msra.mxu0 %vm12176_vm0, %v12015_v38  ;;  %vm5383_vm0 = vmand %vm5369_vm8, %vm5377_vm10  ;;  %v5398_v43 = vpack.c.bf16 %v7485_v37, %v7485_v37  ;;  %v11389_v26 = vsel %vm5382_vm11, 1.0, %v9165_v27  ;;  %vm5379_vm8 = vcmp.lt.s32.totalorder %v5364_v28, %v5373_v17  ;;  %v5847_v17 = vpack.c.bf16 %v5841_v6, %v5841_v6 }
 0x55b   : > { %v7488_v41 = vsel %vm5383_vm0, 1.0, %v9165_v27  ;;  %7587 = vmatprep.subr.msk.bf16.mxu1 %vm11880_vm3, %v11376_v35  ;;  %vm5385_vm10 = vmand %vm5371_vm14, %vm5379_vm8  ;;  %5923 = vmatprep.mubr.bf16.mxu0 %v5848_v8  ;;  %vm11881_vm5 = vcmask 64512   ;;  %v5400_v50 = vpack.c.bf16 %v11389_v26, %v11389_v26  ;;  %v5797_v26 = vld [vmem:[#allocation3 + $0x98] sm:$0xff]  ;;  %vm12180_vm7 = vnez %v11896_v60  ;;  %v12205_v60 = vld [vmem:[#allocation20_spill] sm:$0xff] }
 0x55c   : > { %v11380_v54 = vpack.c.bf16 %v7488_v41, %v7488_v41  ;;  %v11383_v56 = vsel %vm11880_vm3, %v5398_v43, 0  ;;  %v7490_v55 = vsel %vm5385_vm10, 1.0, %v9165_v27  ;;  %vm5384_vm0 = vmand %vm5370_vm2, %vm5378_vm1  ;;  %vm12181_vm11 = vnez %v11894_v30  ;;  %v12202_v30 = vld [vmem:[#allocation18_spill] sm:$0xff] }
 0x55d   : > { %5641 = vmatpush1.bf16.msra.mxu1 %v11383_v56  ;;  %v11392_v42 = vpack.c.bf16 %v7490_v55, %v7490_v55  ;;  %v7489_v9 = vsel %vm5384_vm0, 1.0, %v9165_v27  ;;  %5924 = vmatmul.mubr.bf16.vlgmr.msra.gmra.mxu0 %v5847_v17  ;;  %v11412_v17 = vsel %vm11880_vm3, %v5400_v50, 0  ;;  %vm12182_vm14 = vmpackc.low %vm12180_vm7, %vm12181_vm11  ;;  %vm12183_vm8 = vnez %v11904_v4  ;;  %v12210_v4 = vld [vmem:[#allocation22_spill] sm:$0xff] }
 0x55e   : > { %7589 = vmatprep.subr.msk.bf16.mxu1 %vm11880_vm3, %v11380_v54  ;;  %v5402_v10 = vpack.c.bf16 %v7489_v9, %v7489_v9  ;;  %6108 = vmatprep.mubr.bf16.mxu0 %v9164_v19  ;;  %vm12184_vm10 = vnez %v11902_v2  ;;  %vm12186_vm1 = vnez %v11912_v15  ;;  %vm12187_vm0 = vnez %v11910_v12  ;;  %v12207_v2 = vld [vmem:[#allocation19_spill] sm:$0xff]  ;;  %v12212_v12 = vld [vmem:[#allocation21_spill] sm:$0xff]  ;;  %v12215_v15 = vld [vmem:[#allocation24_spill] sm:$0xff] }
 0x55f   : > { %7693 = vmatprep.subr.msk.bf16.mxu0 %vm11880_vm3, %v11392_v42  ;;  %vm12185_vm2 = vmpackc.low %vm12183_vm8, %vm12184_vm10  ;;  %vm12189_vm7 = vnez %v11920_v25  ;;  %vm12190_vm11 = vnez %v11918_v21  ;;  %vm12193_vm8 = vnez %v11926_v32  ;;  %v12217_v21 = vld [vmem:[#allocation23_spill] sm:$0xff]  ;;  %v12220_v25 = vsub.s32 0, %v10082_v48  ;;  %v12285_v50 = vld [vmem:[#allocation50_spill] sm:$0xff] }
 0x560   : > { %v5621_v58 = vsel %vm11880_vm3, %v5402_v10, 0 }
 0x561   : > { %6091 = vmatpush1.bf16.msra.mxu0 %v5621_v58  ;;  %v5812_v32 = vrot.slane %v11397_v46, %v12220_v25 }
 0x5ca   : > { %v7771_v7 = vpop.f32.mrf.mxu0 }
 0x5cc   : > { %v7772_v31 = vpop.f32.mrf.mxu0 }
 0x5cd   : > { %v7793_v36 = vpop.f32.mrf.mxu1  ;;  %v7773_v27 = vadd.f32 %v7772_v31, %v7771_v7 }
 0x5ce   : > { %v7774_v52 = vpop.f32.mrf.mxu0 }
 0x5cf   : > { %v7794_v1 = vpop.f32.mrf.mxu1 }
 0x5d0   : > { %v7775_v20 = vpop.f32.mrf.mxu0  ;;  %v7795_v37 = vadd.f32 %v7794_v1, %v7793_v36 }
 0x5d1   : > { %v7796_v33 = vpop.f32.mrf.mxu1 }
 0x5d2   : > { %v5538_v18 = vadd.f32 %v7795_v37, %v7773_v27  ;;  %v12179_v27 = vsub.s32 1, %v10082_v48 }
 0x5d3   : > { %v7797_v14 = vpop.f32.mrf.mxu1 }
 0x5d4   : > { %v5816_v37 = vrot.slane %v11397_v46, %v12179_v27  ;;  %v12295_v27 = vld [vmem:[#allocation54_spill] sm:$0xff] }
 0x5fd   : > { %v7815_v43 = vpop.f32.mrf.mxu0 }
 0x5ff   : > { %v7816_v41 = vpop.f32.mrf.mxu0 }
 0x600   : > { %v7817_v28 = vadd.f32 %v7816_v41, %v7815_v43  ;;  %v5840_v43 = vmul.f32 %v5816_v37, %v5797_v26  ;;  %v12297_v37 = vld [vmem:[#allocation53_spill] sm:$0xff]  ;;  %v12300_v26 = vsub.s32 4, %v10082_v48 }
 0x601   : > { %v7818_v55 = vpop.f32.mrf.mxu0 }
 0x602   : > { %v5578_v52 = vadd.f32 %v7817_v28, %v5538_v18  ;;  %v5846_v41 = vpack.c.bf16 %v5840_v43, %v5840_v43  ;;  %v12232_v28 = vld [vmem:[#allocation30_spill] sm:$0xff]  ;;  %v12234_v55 = vld [vmem:[#allocation29_spill] sm:$0xff]  ;;  %v5828_v43 = vrot.slane %v11397_v46, %v12300_v26  ;;  %v8918_v26 = vld [vmem:[#allocation9 + $0x30] sm:$0xff]  }
 0x603   : > { %v7819_v20 = vpop.f32.mrf.mxu0 }
 0x604   : > { %v5584_v33 = vsel %vm11881_vm5, %v5578_v52, -inf  ;;  %v12237_v20 = vld [vmem:[#allocation32_spill] sm:$0xff] }
 0x605   : > { %v5585_v14 = vrot.slane %v5584_v33, 4 }
 0x607   : > { %v5586_v59 = vmax.f32 %v5584_v33, %v5585_v14  ;;  %v12239_v33 = vld [vmem:[#allocation31_spill] sm:$0xff] }
 0x609   : > { %v5587_v3 = vrot.slane %v5586_v59, 2 }
 0x60b   : > { %v5588_v45 = vmax.f32 %v5586_v59, %v5587_v3  ;;  %v12243_v59 = vld [vmem:[#allocation33_spill] sm:$0xff] }
 0x60d   : > { %v5589_v61 = vrot.slane %v5588_v45, 1 }
 0x60f   : > { %v5590_v9 = vmax.f32 %v5588_v45, %v5589_v61  ;;  %v12247_v45 = vld [vmem:[#allocation34_spill] sm:$0xff]  ;;  %v12250_v61 = vld [vmem:[#allocation36_spill] sm:$0xff] }
 0x611   : > { %v5591_v63 = vsub.f32 %v5578_v52, %v5590_v9  ;;  %v12252_v9 = vld [vmem:[#allocation35_spill] sm:$0xff] }
 0x613   : > { %v5592_v16 = vmul.f32 1.442695, %v5591_v63  ;;  %v12257_v63 = vld [vmem:[#allocation37_spill] sm:$0xff] }
 0x615   : > { %8963 = vpow2.f32 %v5592_v16  ;;  %v12262_v16 = vld [vmem:[#allocation39_spill] sm:$0xff] }
 0x61d   : > { %v7859_v40 = vpop.f32.mrf.mxu0 }
 0x61f   : > { %v7860_v29 = vpop.f32.mrf.mxu0 }
 0x620   : > { %v7861_v0 = vadd.f32 %v7860_v29, %v7859_v40  ;;  %v8930_v40 = vld [vmem:[#allocation9 + $0xa8] sm:$0xff]   ;;  %v8931_v29 = vld [vmem:[#allocation9 + $0x50] sm:$0xff]  }
 0x621   : > { %v7862_v51 = vpop.f32.mrf.mxu0 }
 0x622   : > { %v8964_v7 = vpop.eup %8963  ;;  %v8933_v51 = vld [vmem:[#allocation9 + $0xe0] sm:$0xff]  }
 0x623   : > { %v5594_v31 = vsel %vm11881_vm5, %v8964_v7, 0.0  ;;  %v7863_v53 = vpop.f32.mrf.mxu0 }
 0x624   : > { %v5595_v36 = vrot.slane %v5594_v31, 4  ;;  %v8934_v53 = vld [vmem:[#allocation9 + $0xa0] sm:$0xff]  }
 0x626   : > { %v5596_v1 = vadd.f32 %v5595_v36, %v5594_v31  ;;  %v12267_v31 = vld [vmem:[#allocation41_spill] sm:$0xff]  ;;  %v12270_v36 = vld [vmem:[#allocation44_spill] sm:$0xff] }
 0x628   : > { %v5597_v49 = vrot.slane %v5596_v1, 2 }
 0x62a   : > { %v5598_v24 = vadd.f32 %v5597_v49, %v5596_v1  ;;  %v12272_v1 = vld [vmem:[#allocation43_spill] sm:$0xff]  ;;  %v12275_v49 = vld [vmem:[#allocation46_spill] sm:$0xff] }
 0x62c   : > { %v5599_v57 = vrot.slane %v5598_v24, 1 }
 0x62e   : > { %v5600_v62 = vadd.f32 %v5599_v57, %v5598_v24  ;;  %v12277_v24 = vld [vmem:[#allocation45_spill] sm:$0xff]  ;;  %v12280_v57 = vld [vmem:[#allocation48_spill] sm:$0xff] }
 0x630   : > { %8965 = vrcp.f32 %v5600_v62  ;;  %v12282_v62 = vld [vmem:[#allocation47_spill] sm:$0xff] }
 0x63d   : > { %v8966_v10 = vpop.eup %8965 }
 0x63e   : > { %v5602_v6 = vmul.f32 %v8966_v10, %v8964_v7  ;;  %v12265_v7 = vld [vmem:[#allocation42_spill] sm:$0xff]  ;;  %v12287_v10 = vld [vmem:[#allocation49_spill] sm:$0xff] }
 0x640   : > { %v5603_v8 = vpack.c.bf16 %v5602_v6, %v5602_v6  ;;  %v12290_v6 = vld [vmem:[#allocation52_spill] sm:$0xff] }
 0x642   : > { %7588 = vmatmul.mubr.msk.bf16.vlgmr.msra.gmra.mxu1 %vm11881_vm5, %v5603_v8 }
 0x643   : > { %5682 = vmatpush1.bf16.msra.mxu1 %v11412_v17  ;;  %5699 = vmatprep.mubr.bf16.mxu1 %v9164_v19 }
 0x644   : > { %7591 = vmatprep.subr.msk.bf16.mxu1 %vm11880_vm3, %v11392_v42  ;;  %vm12188_vm3 = vmpackc.low %vm12186_vm1, %vm12187_vm0  ;;  %vm12196_vm1 = vnez %v11934_v23  ;;  %vm12198_vm0 = vnez %v11944_v47  ;;  %v12223_v23 = vld [vmem:[#allocation25_spill] sm:$0xff]  ;;  %v12229_v42 = vld [vmem:[#allocation27_spill] sm:$0xff] }
 0x64a   : > { %7590 = vmatmul.mubr.msk.bf16.vlgmr.msra.gmra.mxu1 %vm11881_vm5, %v5603_v8 }
 0x64b   : > { %5723 = vmatpush1.bf16.msra.mxu1 %v5621_v58  ;;  %5740 = vmatprep.mubr.bf16.mxu1 %v9164_v19  ;;  %v5801_v58 = vld [vmem:[#allocation3 + $0xb8] sm:$0xff] }
 0x64c   : > { %7821 = vmatprep.subr.msk.bf16.mxu1 %vm12182_vm14, %v12015_v38  ;;  %vm12191_vm14 = vmpackc.low %vm12189_vm7, %vm12190_vm11  ;;  %vm12199_vm7 = vnez %v11942_v44  ;;  %v12226_v44 = vsub.s32 5, %v10082_v48 }
 0x64d   : > { %vm12200_vm11 = vmpackc.low %vm12198_vm0, %vm12199_vm7  ;;  %vm12213_vm0 = vnez %v12212_v12 }
 0x64e   : > { %v5832_v47 = vrot.slane %v11397_v46, %v12226_v44 }
 0x650   : > { %v5844_v52 = vmul.f32 %v5832_v47, %v5801_v58 }
 0x652   : > { %7592 = vmatmul.mubr.msk.bf16.vlgmr.msra.gmra.mxu1 %vm11881_vm5, %v5603_v8  ;;  %vm12192_vm5 = vnez %v11928_v34  ;;  %v12221_v34 = vld [vmem:[#allocation26_spill] sm:$0xff]  ;;  %v5850_v3 = vpack.c.bf16 %v5844_v52, %v5844_v52  ;;  %v12292_v8 = vld [vmem:[#allocation51_spill] sm:$0xff] }
 0x653   : > { %7822 = vmatpush3.bf16.msk.msra.mxu1 %vm12185_vm2, %v12015_v38  ;;  %5883 = vmatprep.mubr.bf16.mxu1 %v5846_v41  ;;  %vm12194_vm10 = vmpackc.low %vm12192_vm5, %vm12193_vm8  ;;  %vm12195_vm2 = vnez %v11936_v11  ;;  %vm12203_vm5 = vnez %v12202_v30  ;;  %v5796_v11 = vld [vmem:[#allocation3 + $0x90] sm:$0xff]  ;;  %v12301_v41 = vld [vmem:[#allocation56_spill] sm:$0xff] }
 0x654   : > { %7823 = vmatprep.subr.msk.bf16.mxu1 %vm12188_vm3, %v12015_v38  ;;  %vm12197_vm3 = vmpackc.low %vm12195_vm2, %vm12196_vm1  ;;  %vm12208_vm2 = vnez %v12207_v2  ;;  %v5839_v18 = vmul.f32 %v5812_v32, %v5796_v11  ;;  %v12303_v30 = vld [vmem:[#allocation55_spill] sm:$0xff]  ;;  %v12306_v2 = vld [vmem:[#allocation58_spill] sm:$0xff] }
 0x655   : > { %v8915_v11 = vld [vmem:[#allocation9 + $0x78] sm:$0xff]  }
 0x656   : > { %v5845_v14 = vpack.c.bf16 %v5839_v18, %v5839_v18  ;;  %7887 = vmatprep.subr.bf16.mxu0 %v8915_v11  ;;  %v8941_v11 = vld [vmem:[#allocation9 + $0xd0] sm:$0xff]  }
 0x657   : > { %7824 = vmatpush3.bf16.msk.msra.mxu1 %vm12191_vm14, %v12015_v38  ;;  %vm12201_vm14 = vnez %v11953_v5  ;;  %v12227_v5 = vld [vmem:[#allocation28_spill] sm:$0xff] }
 0x658   : > { %7825 = vmatprep.subr.msk.bf16.mxu1 %vm12194_vm10, %v12015_v38  ;;  %vm12204_vm8 = vmpackc.low %vm12201_vm14, %vm12203_vm5  ;;  %vm12206_vm10 = vnez %v12205_v60  ;;  %vm12218_vm14 = vnez %v12217_v21  ;;  %v5800_v60 = vld [vmem:[#allocation3 + $0xb0] sm:$0xff] }
 0x659   : > { %vm12209_vm1 = vmpackc.low %vm12206_vm10, %vm12208_vm2  ;;  %vm12224_vm10 = vnez %v12223_v23  ;;  %v5843_v12 = vmul.f32 %v5828_v43, %v5800_v60  ;;  %v8919_v43 = vld [vmem:[#allocation9 + $0x68] sm:$0xff]   ;;  %v8923_v60 = vld [vmem:[#allocation9 + $0x60] sm:$0xff]  }
 0x65b   : > { %7826 = vmatpush3.bf16.msk.msra.mxu1 %vm12197_vm3, %v12015_v38  ;;  %vm12211_vm3 = vnez %v12210_v4  ;;  %v12308_v4 = vld [vmem:[#allocation57_spill] sm:$0xff]  ;;  %v5849_v48 = vpack.c.bf16 %v5843_v12, %v5843_v12 }
 0x65c   : > { %7827 = vmatprep.subr.msk.bf16.mxu1 %vm12200_vm11, %v12015_v38  ;;  %vm12214_vm7 = vmpackc.low %vm12211_vm3, %vm12213_vm0  ;;  %vm12216_vm11 = vnez %v12215_v15  ;;  %vm12230_vm3 = vnez %v12229_v42  ;;  %v8928_v12 = vld [vmem:[#allocation9 + $0x18] sm:$0xff]  }
 0x65d   : > { %vm12219_vm5 = vmpackc.low %vm12216_vm11, %vm12218_vm14  ;;  %vm12235_vm11 = vnez %v12234_v55 }
 0x65f   : > { %7828 = vmatpush3.bf16.msk.msra.mxu1 %vm12204_vm8, %v12015_v38  ;;  %vm12222_vm8 = vnez %v12221_v34 }
 0x660   : > { %7829 = vmatprep.subr.msk.bf16.mxu1 %vm12209_vm1, %v12015_v38  ;;  %vm12225_vm2 = vmpackc.low %vm12222_vm8, %vm12224_vm10  ;;  %vm12228_vm1 = vnez %v12227_v5  ;;  %vm12240_vm8 = vnez %v12239_v33 }
 0x661   : > { %vm12231_vm0 = vmpackc.low %vm12228_vm1, %vm12230_vm3  ;;  %vm12244_vm1 = vnez %v12243_v59 }
 0x663   : > { %7830 = vmatpush3.bf16.msk.msra.mxu1 %vm12214_vm7, %v12015_v38  ;;  %vm12233_vm7 = vnez %v12232_v28 }
 0x664   : > { %7831 = vmatprep.subr.msk.bf16.mxu1 %vm12219_vm5, %v12015_v38  ;;  %vm12236_vm14 = vmpackc.low %vm12233_vm7, %vm12235_vm11  ;;  %vm12238_vm5 = vnez %v12237_v20  ;;  %vm12248_vm7 = vnez %v12247_v45 }
 0x665   : > { %vm12241_vm10 = vmpackc.low %vm12238_vm5, %vm12240_vm8  ;;  %vm12253_vm5 = vnez %v12252_v9 }
 0x667   : > { %7832 = vmatpush3.bf16.msk.msra.mxu1 %vm12225_vm2, %v12015_v38  ;;  %vm12242_vm2 = vnez %v12037_v13  ;;  %v12255_v13 = vld [vmem:[#allocation38_spill] sm:$0xff] }
 0x668   : > { %7833 = vmatprep.subr.msk.bf16.mxu1 %vm12231_vm0, %v12015_v38  ;;  %vm12245_vm3 = vmpackc.low %vm12242_vm2, %vm12244_vm1  ;;  %vm12246_vm0 = vnez %v12046_v39  ;;  %vm12258_vm2 = vnez %v12257_v63  ;;  %v12260_v39 = vld [vmem:[#allocation40_spill] sm:$0xff] }
 0x669   : > { %vm12249_vm11 = vmpackc.low %vm12246_vm0, %vm12248_vm7  ;;  %vm12263_vm0 = vnez %v12262_v16 }
 0x66b   : > { %7834 = vmatpush3.bf16.msk.msra.mxu1 %vm12236_vm14, %v12015_v38  ;;  %vm12251_vm14 = vnez %v12250_v61 }
 0x66c   : > { %7835 = vmatprep.subr.msk.bf16.mxu1 %vm12241_vm10, %v12015_v38  ;;  %vm12254_vm8 = vmpackc.low %vm12251_vm14, %vm12253_vm5  ;;  %vm12256_vm10 = vnez %v12255_v13  ;;  %vm12268_vm14 = vnez %v12267_v31 }
 0x66d   : > { %vm12259_vm1 = vmpackc.low %vm12256_vm10, %vm12258_vm2  ;;  %vm12273_vm10 = vnez %v12272_v1 }
 0x66f   : > { %7836 = vmatpush3.bf16.msk.msra.mxu1 %vm12245_vm3, %v12015_v38  ;;  %vm12261_vm3 = vnez %v12260_v39 }
 0x670   : > { %7865 = vmatprep.subr.msk.bf16.mxu1 %vm12249_vm11, %v12015_v38  ;;  %vm12264_vm7 = vmpackc.low %vm12261_vm3, %vm12263_vm0  ;;  %vm12266_vm11 = vnez %v12265_v7  ;;  %vm12278_vm3 = vnez %v12277_v24 }
 0x671   : > { %vm12269_vm5 = vmpackc.low %vm12266_vm11, %vm12268_vm14  ;;  %vm12283_vm11 = vnez %v12282_v62 }
 0x672   : > { %5884 = vmatmul.mubr.bf16.vlgmr.msra.gmra.mxu1 %v5845_v14 }
 0x673   : > { %7866 = vmatpush3.bf16.msk.msra.mxu1 %vm12254_vm8, %v12015_v38  ;;  %5963 = vmatprep.mubr.bf16.mxu1 %v5850_v3  ;;  %vm12271_vm8 = vnez %v12270_v36 }
 0x674   : > { %7867 = vmatprep.subr.msk.bf16.mxu1 %vm12259_vm1, %v12015_v38  ;;  %vm12274_vm2 = vmpackc.low %vm12271_vm8, %vm12273_vm10  ;;  %vm12276_vm1 = vnez %v12275_v49  ;;  %vm12288_vm8 = vnez %v12287_v10 }
 0x675   : > { %vm12279_vm0 = vmpackc.low %vm12276_vm1, %vm12278_vm3  ;;  %vm12293_vm1 = vnez %v12292_v8  ;;  %v8916_v8 = vld [vmem:[#allocation9 + $0x38] sm:$0xff]  }
 0x677   : > { %7868 = vmatpush3.bf16.msk.msra.mxu1 %vm12264_vm7, %v12015_v38  ;;  %vm12281_vm7 = vnez %v12280_v57 }
 0x678   : > { %7869 = vmatprep.subr.msk.bf16.mxu1 %vm12269_vm5, %v12015_v38  ;;  %vm12284_vm14 = vmpackc.low %vm12281_vm7, %vm12283_vm11  ;;  %vm12286_vm5 = vnez %v12285_v50  ;;  %vm12298_vm7 = vnez %v12297_v37  ;;  %v8917_v37 = vld [vmem:[#allocation9 + $0x70] sm:$0xff]  }
 0x679   : > { %vm12289_vm10 = vmpackc.low %vm12286_vm5, %vm12288_vm8  ;;  %vm12304_vm5 = vnez %v12303_v30  ;;  %v8920_v30 = vld [vmem:[#allocation9 + $0x28] sm:$0xff]  }
 0x67b   : > { %7870 = vmatpush3.bf16.msk.msra.mxu1 %vm12274_vm2, %v12015_v38  ;;  %vm12291_vm2 = vnez %v12290_v6 }
 0x67c   : > { %7871 = vmatprep.subr.msk.bf16.mxu1 %vm12279_vm0, %v12015_v38  ;;  %vm12294_vm3 = vmpackc.low %vm12291_vm2, %vm12293_vm1  ;;  %vm12296_vm0 = vnez %v12295_v27  ;;  %vm12309_vm2 = vnez %v12308_v4  ;;  %v8921_v27 = vld [vmem:[#allocation9 + $0xf8] sm:$0xff]   ;;  %v8925_v4 = vld [vmem:[#allocation9 + $0xf0] sm:$0xff]  }
 0x67d   : > { %vm12299_vm11 = vmpackc.low %vm12296_vm0, %vm12298_vm7 }
 0x67e   : > { %vm12312_vm0 = vmpackc.low %vm11239_vm12, %vm11233_vm6  ;;  %vm12316_vm12 = vcmask 64512  }
 0x67f   : > { %7872 = vmatpush3.bf16.msk.msra.mxu1 %vm12284_vm14, %v12015_v38  ;;  %vm12302_vm14 = vnez %v12301_v41  ;;  %vm12313_vm7 = vmpackc.low %vm11259_vm4, %vm11255_vm15  ;;  %v8922_v41 = vld [vmem:[#allocation9 + $0xb8] sm:$0xff]  }
 0x680   : > { %7873 = vmatprep.subr.msk.bf16.mxu1 %vm12289_vm10, %v12015_v38  ;;  %vm12305_vm8 = vmpackc.low %vm12302_vm14, %vm12304_vm5  ;;  %vm12307_vm10 = vnez %v12306_v2  ;;  %v8924_v2 = vld [vmem:[#allocation9 + $0x20] sm:$0xff]   ;;  %vm6159_vm14 = vcmask 1040384  }
 0x681   : > { %vm12310_vm1 = vmpackc.low %vm12307_vm10, %vm12309_vm2 }
 0x683   : > { %7874 = vmatpush3.bf16.msk.msra.mxu1 %vm12294_vm3, %v12015_v38  ;;  %vm12311_vm3 = vmpackc.low %vm11217_vm13, %vm11207_vm9 }
 0x684   : > { %7875 = vmatprep.subr.msk.bf16.mxu1 %vm12299_vm11, %v12015_v38  ;;  %vm12314_vm11 = vcmask 1043456   ;;  %vm12317_vm9 = vmmov %vm12316_vm12 }
 0x685   : > { %vm12315_vm13 = vmmov %vm12314_vm11 }
 0x686   : > { %vm12318_vm6 = vmmov %vm12317_vm9 }
 0x687   : > { %7876 = vmatpush3.bf16.msk.msra.mxu1 %vm12305_vm8, %v12015_v38  ;;  %vm12319_vm15 = vmmov %vm12318_vm6 }
 0x688   : > { %7877 = vmatprep.subr.msk.bf16.mxu1 %vm12310_vm1, %v12015_v38  ;;  %vm12320_vm4 = vmmov %vm12318_vm6 }
 0x68b   : > { %7878 = vmatpush3.bf16.msk.msra.mxu1 %vm12311_vm3, %v12015_v38 }
 0x68c   : > { %7879 = vmatprep.subr.msk.bf16.mxu1 %vm12312_vm0, %v12015_v38 }
 0x68f   : > { %7880 = vmatpush3.bf16.msk.msra.mxu1 %vm12313_vm7, %v12015_v38 }
 0x690   : > { %7689 = vmatprep.subr.msk.bf16.mxu1 %vm12314_vm11, %v11376_v35 }
 0x692   : > { %5964 = vmatmul.mubr.bf16.vlgmr.msra.gmra.mxu1 %v5849_v48  ;;  %v8929_v48 = vld [vmem:[#allocation9 + $0xe8] sm:$0xff]  }
 0x693   : > { %6009 = vmatpush1.bf16.msra.mxu1 %v11383_v56  ;;  %6026 = vmatprep.mubr.bf16.mxu1 %v9164_v19 }
 0x694   : > { %7691 = vmatprep.subr.msk.bf16.mxu1 %vm12315_vm13, %v11380_v54 }
 0x702   : > { %v11632_v46 = vpop.f32.mrf.mxu1 }
 0x704   : > { %v11634_v22 = vpop.f32.mrf.mxu1 }
 0x706   : > { %v5664_v38 = vpop.f32.mrf.mxu1 }
 0x707   : > { %v8935_v38 = vld [vmem:[#allocation9 + $0x48] sm:$0xff]  }
 0x708   : > { %v5665_v15 = vpop.f32.mrf.mxu1 }
 0x709   : > { %v8936_v15 = vld [vmem:[#allocation9 + $0x8] sm:$0xff]  }
 0x70a   : > { %v11636_v35 = vpop.f32.mrf.mxu1 }
 0x70c   : > { %v11638_v21 = vpop.f32.mrf.mxu1 }
 0x70e   : > { %v5705_v56 = vpop.f32.mrf.mxu1 }
 0x70f   : > { %v8937_v56 = vld [vmem:[#allocation9 + $0xd8] sm:$0xff]  }
 0x710   : > { %v5706_v25 = vpop.f32.mrf.mxu1 }
 0x711   : > { %v8938_v25 = vld [vmem:[#allocation9 + $0x98] sm:$0xff]  }
 0x712   : > { %v11640_v32 = vpop.f32.mrf.mxu1 }
 0x714   : > { %v11642_v54 = vpop.f32.mrf.mxu1 }
 0x716   : > { %v5746_v34 = vpop.f32.mrf.mxu1 }
 0x717   : > { %v8939_v34 = vld [vmem:[#allocation9 + $0x40] sm:$0xff]  }
 0x718   : > { %v5747_v23 = vpop.f32.mrf.mxu1 }
 0x719   : > { %v8940_v23 = vld [vmem:[#allocation9] sm:$0xff]  }
 0x732   : > { %v7837_v44 = vpop.f32.mrf.mxu1 }
 0x734   : > { %v7838_v47 = vpop.f32.mrf.mxu1 }
 0x735   : > { %v7839_v58 = vadd.f32 %v7838_v47, %v7837_v44  ;;  %v8942_v44 = vld [vmem:[#allocation9 + $0x90] sm:$0xff]   ;;  %v8943_v47 = vld [vmem:[#allocation9 + $0x178] sm:$0xff]  }
 0x736   : > { %v7840_v5 = vpop.f32.mrf.mxu1 }
 0x737   : > { %v5926_v55 = vadd.f32 %v7861_v0, %v7839_v58  ;;  %v8932_v0 = vld [vmem:[#allocation9 + $0x10] sm:$0xff]   ;;  %v8944_v5 = vld [vmem:[#allocation9 + $0xc8] sm:$0xff]   ;;  %v8948_v58 = vld [vmem:[#allocation9 + $0xc0] sm:$0xff]  }
 0x738   : > { %v7841_v42 = vpop.f32.mrf.mxu1 }
 0x739   : > { %v8946_v42 = vld [vmem:[#allocation9 + $0x88] sm:$0xff]  }
 0x752   : > { %v7881_v18 = vpop.f32.mrf.mxu1 }
 0x754   : > { %v7882_v28 = vpop.f32.mrf.mxu1 }
 0x755   : > { %v7883_v52 = vadd.f32 %v7882_v28, %v7881_v18  ;;  %v8950_v18 = vld [vmem:[#allocation9 + $0x80] sm:$0xff]   ;;  %v5414_v28 = vld [vmem:[#allocation3 + $0xc0] sm:$0xff] }
 0x756   : > { %v7884_v20 = vpop.f32.mrf.mxu1 }
 0x757   : > { %v5966_v33 = vadd.f32 %v7883_v52, %v5926_v55  ;;  %v5415_v55 = vld [vmem:[#allocation3 + $0xc8] sm:$0xff]  ;;  %v5749_v52 = vmul.f32 %v11632_v46, %v5414_v28 }
 0x758   : > { %v7885_v14 = vpop.f32.mrf.mxu1  ;;  %v5419_v20 = vld [vmem:[#allocation3 + $0xe8] sm:$0xff] }
 0x759   : > { %v5971_v59 = vsel %vm12316_vm12, %v5966_v33, -inf  ;;  %v5754_v14 = vmul.f32 %v11642_v54, %v5419_v20 }
 0x75a   : > { %v5972_v3 = vrot.slane %v5971_v59, 4 }
 0x75c   : > { %v5973_v45 = vmax.f32 %v5971_v59, %v5972_v3  ;;  %v5755_v59 = vrot.slane %v5749_v52, 4 }
 0x75e   : > { %v5974_v61 = vrot.slane %v5973_v45, 2 }
 0x760   : > { %v5975_v9 = vmax.f32 %v5973_v45, %v5974_v61  ;;  %v5416_v45 = vld [vmem:[#allocation3 + $0xd0] sm:$0xff]  ;;  %v5417_v61 = vld [vmem:[#allocation3 + $0xd8] sm:$0xff] }
 0x762   : > { %v5976_v13 = vrot.slane %v5975_v9, 1 }
 0x764   : > { %v5977_v63 = vmax.f32 %v5975_v9, %v5976_v13  ;;  %v5785_v9 = vrot.slane %v5754_v14, 4  ;;  %v5756_v13 = vadd.f32 %v5755_v59, %v5749_v52 }
 0x766   : > { %v5978_v39 = vsub.f32 %v5966_v33, %v5977_v63  ;;  %v5750_v33 = vmul.f32 %v11634_v22, %v5415_v55  ;;  %v5803_v22 = vld [vmem:[#allocation3 + $0xf8] sm:$0xff] }
 0x768   : > { %v5979_v16 = vmul.f32 1.442695, %v5978_v39  ;;  %v5761_v3 = vrot.slane %v5750_v33, 4  ;;  %v5751_v39 = vmul.f32 %v11636_v35, %v5416_v45 }
 0x76a   : > { %8967 = vpow2.f32 %v5979_v16  ;;  %v5762_v63 = vadd.f32 %v5761_v3, %v5750_v33  ;;  %v5752_v16 = vmul.f32 %v11638_v21, %v5417_v61 }
 0x777   : > { %v8968_v7 = vpop.eup %8967 }
 0x778   : > { %v5981_v31 = vsel %vm12317_vm9, %v8968_v7, 0.0 }
 0x779   : > { %v5982_v36 = vrot.slane %v5981_v31, 4 }
 0x77b   : > { %v5983_v1 = vadd.f32 %v5982_v36, %v5981_v31  ;;  %v5786_v31 = vadd.f32 %v5785_v9, %v5754_v14  ;;  %v5757_v36 = vrot.slane %v5756_v13, 2 }
 0x77d   : > { %v5984_v49 = vrot.slane %v5983_v1, 2 }
 0x77f   : > { %v5985_v24 = vadd.f32 %v5984_v49, %v5983_v1  ;;  %v5807_v49 = vld [vmem:[#allocation3 + $0x118] sm:$0xff] }
 0x781   : > { %v5986_v57 = vrot.slane %v5985_v24, 1 }
 0x783   : > { %v5987_v62 = vadd.f32 %v5986_v57, %v5985_v24  ;;  %v5763_v24 = vrot.slane %v5762_v63, 2  ;;  %v5767_v57 = vrot.slane %v5751_v39, 4 }
 0x785   : > { %8969 = vrcp.f32 %v5987_v62  ;;  %v5773_v62 = vrot.slane %v5752_v16, 4 }
 0x792   : > { %v8970_v50 = vpop.eup %8969 }
 0x793   : > { %v5989_v10 = vmul.f32 %v8970_v50, %v8968_v7  ;;  %v5802_v7 = vld [vmem:[#allocation3 + $0xf0] sm:$0xff] }
 0x795   : > { %v5990_v6 = vpack.c.bf16 %v5989_v10, %v5989_v10 }
 0x797   : > { %7690 = vmatmul.mubr.msk.bf16.vlgmr.msra.gmra.mxu1 %vm12318_vm6, %v5990_v6  ;;  %7694 = vmatmul.mubr.msk.bf16.vlgmr.msra.gmra.mxu0 %vm12319_vm15, %v5990_v6 }
 0x798   : > { %6050 = vmatpush1.bf16.msra.mxu1 %v11412_v17  ;;  %6067 = vmatprep.mubr.bf16.mxu1 %v9164_v19  ;;  %v8926_v17 = vld [vmem:[#allocation9 + $0xb0] sm:$0xff]   ;;  %v8927_v19 = vld [vmem:[#allocation9 + $0x58] sm:$0xff]  }
 0x799   : > { %7888 = vmatpush3.bf16.msra.mxu0 %v8916_v8  ;;  %7909 = vmatprep.subr.bf16.mxu1 %v8921_v27 }
 0x79a   : > { %7889 = vmatprep.subr.bf16.mxu0 %v8917_v37  ;;  %v5758_v37 = vadd.f32 %v5757_v36, %v5756_v13 }
 0x79d   : > { %7890 = vmatpush3.bf16.msra.mxu0 %v8918_v26 }
 0x79e   : > { %7891 = vmatprep.subr.bf16.mxu0 %v8919_v43 }
 0x79f   : > { %7692 = vmatmul.mubr.msk.bf16.vlgmr.msra.gmra.mxu1 %vm12320_vm4, %v5990_v6  ;;  %v5787_v6 = vrot.slane %v5786_v31, 2 }
 0x7a0   : > { %7910 = vmatpush3.bf16.msra.mxu1 %v8922_v41 }
 0x7a1   : > { %7892 = vmatpush3.bf16.msra.mxu0 %v8920_v30  ;;  %7911 = vmatprep.subr.bf16.mxu1 %v8925_v4  ;;  %v5774_v4 = vadd.f32 %v5773_v62, %v5752_v16 }
 0x7a2   : > { %7893 = vmatprep.subr.bf16.mxu0 %v8923_v60  ;;  %v5764_v60 = vadd.f32 %v5763_v24, %v5762_v63 }
 0x7a4   : > { %7912 = vmatpush3.bf16.msra.mxu1 %v8926_v17 }
 0x7a5   : > { %7894 = vmatpush3.bf16.msra.mxu0 %v8924_v2  ;;  %7913 = vmatprep.subr.bf16.mxu1 %v8929_v48  ;;  %v5768_v2 = vadd.f32 %v5767_v57, %v5751_v39 }
 0x7a6   : > { %7895 = vmatprep.subr.bf16.mxu0 %v8927_v19 }
 0x7a8   : > { %7914 = vmatpush3.bf16.msra.mxu1 %v8930_v40 }
 0x7a9   : > { %7896 = vmatpush3.bf16.msra.mxu0 %v8928_v12  ;;  %7915 = vmatprep.subr.bf16.mxu1 %v8933_v51  ;;  %v5788_v12 = vadd.f32 %v5787_v6, %v5786_v31  ;;  %v5759_v51 = vrot.slane %v5758_v37, 1 }
 0x7aa   : > { %7897 = vmatprep.subr.bf16.mxu0 %v8931_v29 }
 0x7ab   : > { %v5760_v28 = vadd.f32 %v5759_v51, %v5758_v37 }
 0x7ac   : > { %7916 = vmatpush3.bf16.msra.mxu1 %v8934_v53 }
 0x7ad   : > { %7898 = vmatpush3.bf16.msra.mxu0 %v8932_v0  ;;  %7917 = vmatprep.subr.bf16.mxu1 %v8937_v56  ;;  %v5804_v0 = vld [vmem:[#allocation3 + $0x100] sm:$0xff] }
 0x7ae   : > { %7899 = vmatprep.subr.bf16.mxu0 %v8935_v38 }
 0x7b0   : > { %7918 = vmatpush3.bf16.msra.mxu1 %v8938_v25  ;;  %v5805_v25 = vld [vmem:[#allocation3 + $0x108] sm:$0xff] }
 0x7b1   : > { %7900 = vmatpush3.bf16.msra.mxu0 %v8936_v15  ;;  %7919 = vmatprep.subr.bf16.mxu1 %v8941_v11  ;;  %v5775_v11 = vrot.slane %v5774_v4, 2 }
 0x7b2   : > { %7901 = vmatprep.subr.bf16.mxu0 %v8939_v34  ;;  %v5765_v34 = vrot.slane %v5764_v60, 1 }
 0x7b3   : > { %v5776_v63 = vadd.f32 %v5775_v11, %v5774_v4  ;;  %v8956_v11 = vld [vmem:[#allocation9 + $0x118] sm:$0xff]  }
 0x7b4   : > { %7920 = vmatpush3.bf16.msra.mxu1 %v8942_v44  ;;  %v5766_v3 = vadd.f32 %v5765_v34, %v5764_v60 }
 0x7b5   : > { %7902 = vmatpush3.bf16.msra.mxu0 %v8940_v23  ;;  %7921 = vmatprep.subr.bf16.mxu1 %v8944_v5  ;;  %v5769_v23 = vrot.slane %v5768_v2, 2  ;;  %v5789_v5 = vrot.slane %v5788_v12, 1  ;;  %v5777_v6 = vrot.slane %v5776_v63, 1 }
 0x7b6   : > { %7931 = vmatprep.subr.bf16.mxu0 %v8943_v47 }
 0x7b7   : > { %v5770_v45 = vadd.f32 %v5769_v23, %v5768_v2  ;;  %v5790_v39 = vadd.f32 %v5789_v5, %v5788_v12  ;;  %v8949_v2 = vld [vmem:[#allocation9 + $0x130] sm:$0xff]  }
 0x7b8   : > { %7922 = vmatpush3.bf16.msra.mxu1 %v8946_v42 }
 0x7b9   : > { %7923 = vmatprep.subr.bf16.mxu1 %v8948_v58 }
 0x7bc   : > { %7924 = vmatpush3.bf16.msra.mxu1 %v8950_v18 }
 0x857   : > { %v6028_v46 = vpop.f32.mrf.mxu1  ;;  %v11656_v1 = vpop.f32.mrf.mxu0 }
 0x858   : > { %v6117_v54 = vmul.f32 %v6028_v46, %v5802_v7 }
 0x859   : > { %v6030_v50 = vpop.f32.mrf.mxu1  ;;  %v6112_v10 = vpop.f32.mrf.mxu0 }
 0x85a   : > { %v6123_v8 = vrot.slane %v6117_v54, 4  ;;  %v6118_v27 = vmul.f32 %v6030_v50, %v5803_v22  ;;  %v6122_v35 = vmul.f32 %v6112_v10, %v5807_v49  ;;  %v5806_v22 = vld [vmem:[#allocation3 + $0x110] sm:$0xff]  ;;  %v8945_v50 = vld [vmem:[#allocation9 + $0x138] sm:$0xff]   ;;  %v5771_v10 = vrot.slane %v5770_v45, 1 }
 0x85b   : > { %v6032_v21 = vpop.f32.mrf.mxu1  ;;  %v6114_v26 = vpop.f32.mrf.mxu0  ;;  %v6121_v37 = vmul.f32 %v11656_v1, %v5806_v22 }
 0x85c   : > { %v6124_v43 = vadd.f32 %v6123_v8, %v6117_v54  ;;  %v6129_v41 = vrot.slane %v6118_v27, 4  ;;  %v6153_v30 = vrot.slane %v6122_v35, 4  ;;  %v5418_v8 = vld [vmem:[#allocation3 + $0xe0] sm:$0xff]  ;;  %v5772_v4 = vadd.f32 %v5771_v10, %v5770_v45 }
 0x85d   : > { %v6033_v17 = vpop.f32.mrf.mxu1  ;;  %v6115_v19 = vpop.f32.mrf.mxu0  ;;  %v6147_v12 = vrot.slane %v6121_v37, 4 }
 0x85e   : > { %v6125_v48 = vrot.slane %v6124_v43, 2  ;;  %v6130_v40 = vadd.f32 %v6129_v41, %v6118_v27  ;;  %v6154_v29 = vadd.f32 %v6153_v30, %v6122_v35  ;;  %v8947_v35 = vld [vmem:[#allocation9 + $0x170] sm:$0xff]   ;;  %v5753_v41 = vmul.f32 %v11640_v32, %v5418_v8  ;;  %v8951_v17 = vld [vmem:[#allocation9 + $0x168] sm:$0xff]   ;;  %v8953_v32 = vld [vmem:[#allocation9 + $0x160] sm:$0xff]  }
 0x85f   : > { %v6069_v53 = vpop.f32.mrf.mxu1  ;;  %v5778_v19 = vadd.f32 %v5777_v6, %v5776_v63 }
 0x860   : > { %v6126_v38 = vadd.f32 %v6125_v48, %v6124_v43  ;;  %v6131_v15 = vrot.slane %v6130_v40, 2  ;;  %v6155_v56 = vrot.slane %v6154_v29, 2  ;;  %v6119_v44 = vmul.f32 %v6069_v53, %v5804_v0  ;;  %v8952_v0 = vld [vmem:[#allocation9 + $0x128] sm:$0xff]  }
 0x861   : > { %v6071_v47 = vpop.f32.mrf.mxu1  ;;  %v6148_v53 = vadd.f32 %v6147_v12, %v6121_v37 }
 0x862   : > { %v6127_v42 = vrot.slane %v6126_v38, 1  ;;  %v6132_v58 = vadd.f32 %v6131_v15, %v6130_v40  ;;  %v6156_v18 = vadd.f32 %v6155_v56, %v6154_v29  ;;  %v6135_v55 = vrot.slane %v6119_v44, 4  ;;  %v8954_v56 = vld [vmem:[#allocation9 + $0x120] sm:$0xff]  }
 0x863   : > { %v6120_v52 = vmul.f32 %v6071_v47, %v5805_v25  ;;  %v6073_v20 = vpop.f32.mrf.mxu1  ;;  %v5779_v40 = vrot.slane %v5753_v41, 4  ;;  %v8955_v25 = vld [vmem:[#allocation9 + $0x158] sm:$0xff]   ;;  %v6149_v34 = vrot.slane %v6148_v53, 2 }
 0x864   : > { %v6128_v33 = vadd.f32 %v6127_v42, %v6126_v38  ;;  %v6133_v14 = vrot.slane %v6132_v58, 1  ;;  %v6157_v59 = vrot.slane %v6156_v18, 1  ;;  %v6136_v61 = vadd.f32 %v6135_v55, %v6119_v44  ;;  %v8957_v44 = vld [vmem:[#allocation9 + $0x150] sm:$0xff]   ;;  %v8960_v55 = vld [vmem:[#allocation9 + $0x108] sm:$0xff]  }
 0x865   : > { %v6141_v9 = vrot.slane %v6120_v52, 4  ;;  %v6074_v13 = vpop.f32.mrf.mxu1  ;;  %v5780_v15 = vadd.f32 %v5779_v40, %v5753_v41  ;;  %v6150_v47 = vadd.f32 %v6149_v34, %v6148_v53  ;;  %v8958_v42 = vld [vmem:[#allocation9 + $0x110] sm:$0xff]  }
 0x866   : > { %v6134_v16 = vadd.f32 %v6133_v14, %v6132_v58  ;;  %v6158_v7 = vadd.f32 %v6157_v59, %v6156_v18  ;;  %v6137_v31 = vrot.slane %v6136_v61, 2  ;;  %v6160_v46 = vsel %vm6159_vm14, %v5760_v28, %v6128_v33  ;;  %v8959_v58 = vld [vmem:[#allocation9 + $0x148] sm:$0xff]   ;;  %v8962_v14 = vld [vmem:[#allocation9 + $0x100] sm:$0xff]  }
 0x867   : > { %v6142_v36 = vadd.f32 %v6141_v9, %v6120_v52  ;;  %v6166_v27 = vpack.c.bf16 %v6160_v46, %v6160_v46  ;;  %v5781_v23 = vrot.slane %v5780_v15, 2  ;;  %v6151_v18 = vrot.slane %v6150_v47, 1  ;;  %v8961_v52 = vld [vmem:[#allocation9 + $0x140] sm:$0xff]  }
 0x868   : > { %v6161_v49 = vsel %vm6159_vm14, %v5766_v3, %v6134_v16  ;;  %v6165_v54 = vsel %vm6159_vm14, %v5790_v39, %v6158_v7  ;;  %v6138_v24 = vadd.f32 %v6137_v31, %v6136_v61 }
 0x869   : > { %v6143_v57 = vrot.slane %v6142_v36, 2  ;;  %v6167_v62 = vpack.c.bf16 %v6161_v49, %v6161_v49  ;;  %v6171_v43 = vpack.c.bf16 %v6165_v54, %v6165_v54  ;;  %v5782_v5 = vadd.f32 %v5781_v23, %v5780_v15 }
 0x86a   : > { %v6139_v21 = vrot.slane %v6138_v24, 1  ;;  %v6152_v20 = vadd.f32 %v6151_v18, %v6150_v47 }
 0x86b   : > { %v6144_v26 = vadd.f32 %v6143_v57, %v6142_v36  ;;  %6595 = vmatprep.mubr.bf16.mxu0 %v6167_v62  ;;  %v5783_v28 = vrot.slane %v5782_v5, 1  ;;  %v7695_v36 = vld [vmem:[#allocation10] ss:$0 sm:$0xff] }
 0x86c   : > { %6596 = vmatmul.mubr.bf16.vlgmr.msra.gmra.mxu0 %v6166_v27  ;;  %v6140_v30 = vadd.f32 %v6139_v21, %v6138_v24 }
 0x86d   : > { %v6145_v60 = vrot.slane %v6144_v26, 1  ;;  %7932 = vmatpush3.bf16.msra.mxu0 %v8945_v50  ;;  %6675 = vmatprep.mubr.bf16.mxu0 %v6171_v43  ;;  %v5784_v33 = vadd.f32 %v5783_v28, %v5782_v5 }
 0x86e   : > { %7933 = vmatprep.subr.bf16.mxu0 %v8947_v35  ;;  %v6162_v1 = vsel %vm6159_vm14, %v5772_v4, %v6140_v30 }
 0x86f   : > { %v6146_v48 = vadd.f32 %v6145_v60, %v6144_v26  ;;  %v6168_v38 = vpack.c.bf16 %v6162_v1, %v6162_v1  ;;  %v6164_v59 = vsel %vm6159_vm14, %v5784_v33, %v6152_v20 }
 0x870   : > { %v6170_v3 = vpack.c.bf16 %v6164_v59, %v6164_v59 }
 0x871   : > { %7934 = vmatpush3.bf16.msra.mxu0 %v8949_v2  ;;  %v6163_v29 = vsel %vm6159_vm14, %v5778_v19, %v6146_v48 }
 0x872   : > { %v6169_v51 = vpack.c.bf16 %v6163_v29, %v6163_v29  ;;  %7935 = vmatprep.subr.bf16.mxu0 %v8951_v17 }
 0x874   : > { %6635 = vmatprep.mubr.bf16.mxu1 %v6169_v51 }
 0x875   : > { %6636 = vmatmul.mubr.bf16.vlgmr.msra.gmra.mxu1 %v6168_v38  ;;  %7936 = vmatpush3.bf16.msra.mxu0 %v8952_v0 }
 0x876   : > { %7937 = vmatprep.subr.bf16.mxu0 %v8953_v32 }
 0x879   : > { %7938 = vmatpush3.bf16.msra.mxu0 %v8954_v56 }
 0x87a   : > { %7939 = vmatprep.subr.bf16.mxu0 %v8955_v25 }
 0x87d   : > { %7940 = vmatpush3.bf16.msra.mxu0 %v8956_v11 }
 0x87e   : > { %7941 = vmatprep.subr.bf16.mxu0 %v8957_v44 }
 0x881   : > { %7942 = vmatpush3.bf16.msra.mxu0 %v8958_v42 }
 0x882   : > { %7943 = vmatprep.subr.bf16.mxu0 %v8959_v58 }
 0x885   : > { %7944 = vmatpush3.bf16.msra.mxu0 %v8960_v55 }
 0x886   : > { %7945 = vmatprep.subr.bf16.mxu0 %v8961_v52 }
 0x889   : > { %7946 = vmatpush3.bf16.msra.mxu0 %v8962_v14 }
 0x88c   : > { %6676 = vmatmul.mubr.bf16.vlgmr.msra.gmra.mxu0 %v6170_v3 }
 0x92c   : > { %v7903_v45 = vpop.f32.mrf.mxu0 }
 0x92e   : > { %v7904_v61 = vpop.f32.mrf.mxu0 }
 0x92f   : > { %v7905_v31 = vadd.f32 %v7904_v61, %v7903_v45 }
 0x930   : > { %v7906_v9 = vpop.f32.mrf.mxu0 }
 0x931   : > { %v6598_v49 = vadd.f32 %v7905_v31, %v7695_v36 }
 0x932   : > { %v7907_v13 = vpop.f32.mrf.mxu0 }
 0x935   : > { %v7925_v63 = vpop.f32.mrf.mxu1 }
 0x937   : > { %v7926_v39 = vpop.f32.mrf.mxu1 }
 0x938   : > { %v7927_v46 = vadd.f32 %v7926_v39, %v7925_v63 }
 0x939   : > { %v7928_v16 = vpop.f32.mrf.mxu1 }
 0x93a   : > { %v6638_v24 = vadd.f32 %v7927_v46, %v6598_v49 }
 0x93b   : > { %v7929_v7 = vpop.f32.mrf.mxu1 }
 0x94c   : > { %v7947_v22 = vpop.f32.mrf.mxu0 }
 0x94e   : > { %v7948_v54 = vpop.f32.mrf.mxu0 }
 0x94f   : > { %v7949_v57 = vadd.f32 %v7948_v54, %v7947_v22 }
 0x950   : > { %v7950_v62 = vpop.f32.mrf.mxu0 }
 0x951   : > { %v6678_v50 = vadd.f32 %v7949_v57, %v6638_v24 }
 0x952   : > { %v7951_v10 = vpop.f32.mrf.mxu0 }
 0x953   : > { %6683 = vst [vmem:[#allocation12] sm:$0x3] %v6678_v50 }
 0x954 PF: > { %p7994_p8 = scmp.eq.s32.totalorder %s9216_s22, 3  ;;  %s9166_s6 = smov [#allocation12]  }
 0x955   : > { %s6691_s9 = sshll.u32 %s9166_s6, 4  ;;  %s6692_s9 = int_to_ptr.vmem [resolvable:$true] %s6691_s9 }
 0x956   : > { %s9079_s10 = scalar_lea.vmem %s6692_s9, 32  ;;  %p9086_p5 = scmp.lt.s32.totalorder %s6692_s9, %s6692_s9 }
 0x957   : > { %p9080_p13 = scmp.ne.s32.totalorder %s6692_s9, %s9079_s10  ;;  %p9087_p12 = scmp.lt.s32.totalorder %s9079_s10, %s9079_s10 }
 0x959   : > { %p9081_p0 = pnand %p9080_p13, %p7994_p8  ;;  %p9088_p11 = por %p9087_p12, %p9086_p5 }
 0x95b   : > { %p9082_p1 = pneg %p9081_p0 }
 0x95d   : > { %p9089_p6 = pnand %p9088_p11, %p9082_p1 }
 0x95f   : > { %9092 = shalt.err (!%p9089_p6)
}
 0x960   : > { %7972 = dma.vmem_to_hbm [thread:$0]  (%p7994_p8), %s6692_s9, 32, %s11696_s5, [#allocation6]  }
 0x961   : > { %9136 = dma.done.wait (%p7994_p8), [#allocation6], 32  }
 0x962   : > { %9138 = vsyncadd (%p7994_p8), [#allocation6], 4294967264 }
 0x963 PF: > { %s12321_s13 = smov %s9273_s18  ;;  %p20_p10 = scmp.ge.s32.totalorder %s9260_s14, 6  }
 0x964   : > { %s12322_s18 = smov %s9145_s19  ;;  %s12323_s19 = smov %s9149_s20 }
 0x965   : > { %s12324_s20 = smov %s12321_s13  ;;  %s12325_s21 = smov %s9260_s14 }
 0x966   :  { %22 = sbr.rel (!%p20_p10) target bundleno = 7 (0x7), region = 112 }
 0x96b   :  { %6704 = vsyncpa [#allocation5], 1 }
 0x96c   :  { %6706 = vsyncpa [#allocation5 + $0x1], 1 }
 0x96d   :  { %6707 = vsyncpa [#allocation8], 1 }
 0x96e   :  { %6709 = vsyncpa [#allocation8 + $0x1], 1 }
 0x96f   :  { %6710 = vsyncpa [#allocation11], 1 }
 0x970   :  { %6711 = vsyncpa [#allocation6], 1 }
 0x971   :  { %6713 = vsyncpa [#allocation6 + $0x1], 1 }

</bundles_post_ra>
